<compile_context>
chip_gen: v7x
topology: tpu7x:2x2x1
jax: 0.10.0
libtpu: 0.0.40
codegen_flags: <defaults>
</compile_context>

<pallas_src>
import functools
import math

import jax
import jax.numpy as jnp
from jax.experimental import pallas as pl
from jax.experimental.pallas import tpu as pltpu

# ----------------------------------------------------------------------------
# Small synthetic Q-Former config (same structure as Blip2QFormerConfig).
# ----------------------------------------------------------------------------
CFG = dict(
    num_queries=8,
    hidden_size=32,
    num_hidden_layers=2,
    num_attention_heads=4,
    intermediate_size=64,
    encoder_hidden_size=48,
    cross_attention_frequency=2,   # layer 0 has cross-attn, layer 1 does not
    layer_norm_eps=1e-12,
    initializer_range=0.02,
)


# ----------------------------------------------------------------------------
# The fused kernel: one grid step == one batch TILE, whole stack in VMEM.
# ----------------------------------------------------------------------------
def _fused_qformer_kernel(enc_ref, wslab_ref, vslab_ref, out_ref, *,
                          w_idx, v_idx, layer_has_cross, num_heads, eps,
                          bt, nq, hidden):
    H = hidden
    nh = num_heads
    dh = H // nh
    scale = 1.0 / math.sqrt(dh)

    # ---- static slab slicing (offsets are Python ints -> zero-cost views) ---
    def wmat(name):
        off, r, c = w_idx[name]
        return wslab_ref[off:off + r, 0:c]                # bf16 [r, c]

    def vrow(name):
        off, r, c = v_idx[name]
        return vslab_ref[off:off + r, 0:c]                # f32  [r, c]

    def layernorm(x, gname, bname):
        mean = jnp.mean(x, axis=-1, keepdims=True)
        cdev = x - mean
        var = jnp.mean(cdev * cdev, axis=-1, keepdims=True)
        return cdev * jax.lax.rsqrt(var + eps) * vrow(gname) + vrow(bname)

    def dense(x, wname, bname):
        # bf16 MXU operands, f32 accumulation, f32 bias add.
        y = jnp.dot(x.astype(jnp.bfloat16), wmat(wname),
                    preferred_element_type=jnp.float32)
        return y + vrow(bname)

    def gelu(y):
        # tanh-form GELU -> transcendental lands on the EUP slot.
        # TODO(synk): exact erf GELU for strict HF "gelu" parity if needed.
        c0 = math.sqrt(2.0 / math.pi)
        return 0.5 * y * (1.0 + jnp.tanh(c0 * (y + 0.044715 * y * y * y)))

    def attention(x_res, q, k, v, sk, prefix):
        """q: [bt*nq, H], k/v: [bt*sk, H] (f32, already projected).

        Scores / softmax / P@V are batched over the batch tile (einsum batch
        dim); heads stay a small static Python loop over lane slices.  Per-head
        contexts are concatenated and pushed through a single output
        projection, then residual-add + LayerNorm.
        """
        qs = (q * scale).astype(jnp.bfloat16).reshape(bt, nq, H)
        ks = k.astype(jnp.bfloat16).reshape(bt, sk, H)
        vs = v.astype(jnp.bfloat16).reshape(bt, sk, H)
        ctx_heads = []
        for h in range(nh):
            sl = slice(h * dh, (h + 1) * dh)
            s = jnp.einsum("bqd,bkd->bqk", qs[:, :, sl], ks[:, :, sl],
                           preferred_element_type=jnp.float32)   # [bt,nq,sk]
            s = s - jnp.max(s, axis=-1, keepdims=True)
            p = jnp.exp(s)
            p = p * pl.reciprocal(jnp.sum(p, axis=-1, keepdims=True),
                                  approx=True)
            ctx = jnp.einsum("bqk,bkd->bqd", p.astype(jnp.bfloat16),
                             vs[:, :, sl],
                             preferred_element_type=jnp.float32)  # [bt,nq,dh]
            ctx_heads.append(ctx.reshape(bt * nq, dh))
        ctx = jnp.concatenate(ctx_heads, axis=-1)                 # [bt*nq, H]
        out = jnp.dot(ctx.astype(jnp.bfloat16), wmat(prefix + "o_w"),
                      preferred_element_type=jnp.float32) + vrow(prefix + "o_b")
        return layernorm(out + x_res, prefix + "ln_g", prefix + "ln_b")

    # ---- forward -------------------------------------------------------------
    enc = enc_ref[...]                                    # [bt, N_img, E] f32
    n_img = enc.shape[1]
    enc2d = enc.reshape(bt * n_img, enc.shape[2])         # [bt*N_img, E]

    # learned queries -> LayerNorm (batch-independent) -> tile over batch rows
    q0 = layernorm(vrow("queries"), "ln0_g", "ln0_b")     # [nq, H]
    x = jnp.broadcast_to(q0[None], (bt, nq, H)).reshape(bt * nq, H)

    for li, has_cross in enumerate(layer_has_cross):
        pre = f"l{li}_"

        # self-attention: fused Q/K/V projection (single [H, 3H] matmul)
        qkv = dense(x, pre + "self_qkv_w", pre + "self_qkv_b")   # [bt*nq, 3H]
        x = attention(x, qkv[:, 0:H], qkv[:, H:2 * H], qkv[:, 2 * H:3 * H],
                      nq, pre + "self_")

        # cross-attention over visual features: fused K/V ([E, 2H] matmul)
        if has_cross:
            cq = dense(x, pre + "cross_q_w", pre + "cross_q_b")        # [bt*nq, H]
            kv = dense(enc2d, pre + "cross_kv_w", pre + "cross_kv_b")  # [bt*N, 2H]
            x = attention(x, cq, kv[:, 0:H], kv[:, H:2 * H], n_img,
                          pre + "cross_")

        # feed-forward: dense -> GELU -> dense -> residual LayerNorm
        h1 = gelu(dense(x, pre + "ffn_in_w", pre + "ffn_in_b"))   # [bt*nq, I]
        y = dense(h1, pre + "ffn_out_w", pre + "ffn_out_b")       # [bt*nq, H]
        x = layernorm(y + x, pre + "ffn_ln_g", pre + "ffn_ln_b")

    # TODO(synk): for large Q*H, emit a lane-dense [bt, nq*H] output slab; at
    # Q*H=256 f32 per batch element the masked 32-lane store is noise.
    out_ref[...] = x                                      # [bt*nq, H]


# ----------------------------------------------------------------------------
# Host-side parameter packing: two 128-lane slabs + static slice offsets.
# ----------------------------------------------------------------------------
def pack_params(params, cfg):
    del cfg  # shapes are taken from the arrays themselves
    w_entries, v_entries = [], []

    v_entries.append(("queries", params["queries"][0]))
    v_entries.append(("ln0_g", params["ln0"]["g"].reshape(1, -1)))
    v_entries.append(("ln0_b", params["ln0"]["b"].reshape(1, -1)))

    def add_dense(pre, lin):
        w_entries.append((pre + "_w", lin["w"]))
        v_entries.append((pre + "_b", lin["b"].reshape(1, -1)))

    def add_ln(pre, ln):
        v_entries.append((pre + "_g", ln["g"].reshape(1, -1)))
        v_entries.append((pre + "_b", ln["b"].reshape(1, -1)))

    layer_has_cross = []
    for li, layer in enumerate(params["layers"]):
        p = f"l{li}_"
        add_dense(p + "self_qkv", layer["self_qkv"])
        add_dense(p + "self_o", layer["self_o"])
        add_ln(p + "self_ln", layer["self_ln"])
        has_cross = "cross" in layer
        layer_has_cross.append(has_cross)
        if has_cross:
            add_dense(p + "cross_q", layer["cross"]["q"])
            add_dense(p + "cross_kv", layer["cross"]["kv"])
            add_dense(p + "cross_o", layer["cross"]["o"])
            add_ln(p + "cross_ln", layer["cross"]["ln"])
        add_dense(p + "ffn_in", layer["ffn_in"])
        add_dense(p + "ffn_out", layer["ffn_out"])
        add_ln(p + "ffn_ln", layer["ffn_ln"])

    def build(entries, dtype, row_align):
        lane = max(int(a.shape[1]) for _, a in entries)
        lane = ((lane + 127) // 128) * 128                # 128-lane padded
        idx, chunks, off = {}, [], 0
        for name, a in entries:
            r, c = int(a.shape[0]), int(a.shape[1])
            rp = ((r + row_align - 1) // row_align) * row_align
            buf = jnp.zeros((rp, lane), jnp.float32).at[:r, :c].set(a)
            chunks.append(buf)
            idx[name] = (off, r, c)
            off += rp
        return jnp.concatenate(chunks, axis=0).astype(dtype), idx

    # Weights -> bf16 (MXU operands); biases / LN / queries stay f32.
    wslab, w_idx = build(w_entries, jnp.bfloat16, row_align=16)
    vslab, v_idx = build(v_entries, jnp.float32, row_align=8)
    meta = dict(w_idx=w_idx, v_idx=v_idx,
                layer_has_cross=tuple(layer_has_cross))
    return (wslab, vslab), meta


# ----------------------------------------------------------------------------
# Wrapper: single pallas_call, grid over batch TILES.
# ----------------------------------------------------------------------------
def _pick_batch_tile(B, Q, min_rows=64, max_rows=512):
    # Largest divisor bt of B with bt*Q <= max_rows: fills sublanes / MXU M-dim
    # and collapses the grid (ideal for single-TC v5e/v6e).  Keep >= 2 steps
    # (v7x has 2 TensorCores) only when each step would still have >= min_rows.
    divs = [d for d in range(1, B + 1) if B % d == 0 and d * Q <= max_rows]
    bt = max(divs) if divs else 1
    if bt == B and B % 2 == 0 and (B // 2) * Q >= min_rows:
        bt = B // 2
    return bt


def perceiver_resampler_forward(wslab, vslab, encoder_hidden_states, cfg, meta):
    B, N, E = encoder_hidden_states.shape
    Q, H = cfg["num_queries"], cfg["hidden_size"]
    bt = _pick_batch_tile(B, Q)
    grid = (B // bt,)

    kernel = functools.partial(
        _fused_qformer_kernel,
        w_idx=meta["w_idx"], v_idx=meta["v_idx"],
        layer_has_cross=meta["layer_has_cross"],
        num_heads=cfg["num_attention_heads"], eps=cfg["layer_norm_eps"],
        bt=bt, nq=Q, hidden=H)

    out = pl.pallas_call(
        kernel,
        out_shape=jax.ShapeDtypeStruct((B * Q, H), jnp.float32),
        grid=grid,
        in_specs=[
            pl.BlockSpec((bt, N, E), lambda i: (i, 0, 0)),   # per-tile encoder states
            pl.BlockSpec(wslab.shape, lambda i: (0, 0)),     # resident bf16 weights
            pl.BlockSpec(vslab.shape, lambda i: (0, 0)),     # resident f32 bias/LN
        ],
        out_specs=pl.BlockSpec((bt * Q, H), lambda i: (i, 0)),
        compiler_params=pltpu.CompilerParams(
            # TODO(synk): on v7x with large batches, force an even grid-step
            # count / pltpu.CORE_PARALLEL so both TensorCores get work.
            dimension_semantics=("parallel",)),
    )(encoder_hidden_states, wslab, vslab)

    last_hidden_state = out.reshape(B, Q, H)
    # HF Blip2QFormerModel: pooled_output = sequence_output[:, 0, :]
    pooler_output = last_hidden_state[:, 0, :]
    return last_hidden_state, pooler_output


# ----------------------------------------------------------------------------
# Deterministic parameter initialization (shapes per Blip2QFormerModel, with
# Q/K/V (self) and K/V (cross) stored pre-concatenated).
# ----------------------------------------------------------------------------
def init_params(key, cfg):
    H, I, E = cfg["hidden_size"], cfg["intermediate_size"], cfg["encoder_hidden_size"]
    std = cfg["initializer_range"]
    keys = iter(jax.random.split(key, 256))

    def dense(d_in, d_out):
        return {
            "w": std * jax.random.normal(next(keys), (d_in, d_out), jnp.float32),
            "b": jnp.zeros((d_out,), jnp.float32),
        }

    def ln():
        return {"g": jnp.ones((H,), jnp.float32), "b": jnp.zeros((H,), jnp.float32)}

    params = {
        "queries": std * jax.random.normal(
            next(keys), (1, cfg["num_queries"], H), jnp.float32),
        "ln0": ln(),  # Blip2QFormerModel.layernorm applied to query_embeds
        "layers": [],
    }
    for li in range(cfg["num_hidden_layers"]):
        layer = {
            "self_qkv": dense(H, 3 * H),   # concatenated Q|K|V projection
            "self_o": dense(H, H),
            "self_ln": ln(),
            "ffn_in": dense(H, I),
            "ffn_out": dense(I, H),
            "ffn_ln": ln(),
        }
        if li % cfg["cross_attention_frequency"] == 0:
            layer["cross"] = {
                "q": dense(H, H),
                "kv": dense(E, 2 * H),     # concatenated K|V over encoder states
                "o": dense(H, H),
                "ln": ln(),
            }
        params["layers"].append(layer)
    return params


# ----------------------------------------------------------------------------
if __name__ == "__main__":
    key = jax.random.PRNGKey(0)
    k_params, k_enc = jax.random.split(key)

    params = init_params(k_params, CFG)
    # Visual encoder features: [B, N_img_tokens, encoder_hidden_size]
    encoder_hidden_states = jax.random.normal(
        k_enc, (2, 16, CFG["encoder_hidden_size"]), jnp.float32)

    (wslab, vslab), meta = pack_params(params, CFG)

    fwd = jax.jit(functools.partial(perceiver_resampler_forward,
                                    cfg=CFG, meta=meta))
    last_hidden_state, pooler_output = fwd(wslab, vslab, encoder_hidden_states)
    jax.block_until_ready((last_hidden_state, pooler_output))

    assert last_hidden_state.shape == (2, CFG["num_queries"], CFG["hidden_size"])
    assert pooler_output.shape == (2, CFG["hidden_size"])
    assert bool(jnp.all(jnp.isfinite(last_hidden_state)))

    print("KERNEL_OK")
</pallas_src>

<mosaic_0001>
module attributes {stable_mosaic.version = 11 : i64} {
  func.func @_fused_qformer_kernel(%arg0: i32, %arg1: memref<2x16x48xf32, #tpu.memory_space<vmem>>, %arg2: memref<432x128xbf16, #tpu.memory_space<vmem>>, %arg3: memref<192x128xf32, #tpu.memory_space<vmem>>, %arg4: memref<16x32xf32, #tpu.memory_space<vmem>>) attributes {dimension_semantics = [#tpu.dimension_semantics<parallel>], iteration_bounds = array<i64: 1>, scalar_prefetch = 0 : i64, scratch_operands = 0 : i64, tpu.core_type = #tpu.core_type<tc>, window_params = [{transform_indices = @transform_0, window_bounds = array<i64: 2, 16, 48>}, {pipeline_mode = #tpu.pipeline_mode<synchronous>, transform_indices = @transform_1, window_bounds = array<i64: 432, 128>}, {pipeline_mode = #tpu.pipeline_mode<synchronous>, transform_indices = @transform_2, window_bounds = array<i64: 192, 128>}, {transform_indices = @transform_3, window_bounds = array<i64: 16, 32>}]} {
    %c0 = arith.constant 0 : index
    %c0_0 = arith.constant 0 : index
    %c0_1 = arith.constant 0 : index
    %0 = vector.load %arg1[%c0, %c0_0, %c0_1] : memref<2x16x48xf32, #tpu.memory_space<vmem>>, vector<2x16x48xf32>
    %1 = vector.shape_cast %0 : vector<2x16x48xf32> to vector<32x48xf32>
    %c0_2 = arith.constant 0 : index
    %c0_3 = arith.constant 0 : index
    %2 = vector.load %arg3[%c0_2, %c0_3] : memref<192x128xf32, #tpu.memory_space<vmem>>, vector<8x32xf32>
    %cst = arith.constant dense<0.000000e+00> : vector<8xf32>
    %3 = vector.multi_reduction <add>, %2, %cst [1] : vector<8x32xf32> to vector<8xf32>
    %4 = vector.shape_cast %3 : vector<8xf32> to vector<8x1xf32>
    %cst_4 = arith.constant 3.200000e+01 : f32
    %5 = vector.broadcast %cst_4 : f32 to vector<8x1xf32>
    %6 = arith.divf %4, %5 : vector<8x1xf32>
    %7 = vector.broadcast %6 : vector<8x1xf32> to vector<8x32xf32>
    %8 = arith.subf %2, %7 : vector<8x32xf32>
    %9 = arith.mulf %8, %8 : vector<8x32xf32>
    %cst_5 = arith.constant dense<0.000000e+00> : vector<8xf32>
    %10 = vector.multi_reduction <add>, %9, %cst_5 [1] : vector<8x32xf32> to vector<8xf32>
    %11 = vector.shape_cast %10 : vector<8xf32> to vector<8x1xf32>
    %cst_6 = arith.constant 3.200000e+01 : f32
    %12 = vector.broadcast %cst_6 : f32 to vector<8x1xf32>
    %13 = arith.divf %11, %12 : vector<8x1xf32>
    %cst_7 = arith.constant 9.99999996E-13 : f32
    %14 = vector.broadcast %cst_7 : f32 to vector<8x1xf32>
    %15 = arith.addf %13, %14 : vector<8x1xf32>
    %16 = math.rsqrt %15 : vector<8x1xf32>
    %17 = vector.broadcast %16 : vector<8x1xf32> to vector<8x32xf32>
    %18 = arith.mulf %8, %17 : vector<8x32xf32>
    %c8 = arith.constant 8 : index
    %c0_8 = arith.constant 0 : index
    %19 = vector.load %arg3[%c8, %c0_8] : memref<192x128xf32, #tpu.memory_space<vmem>>, vector<1x32xf32>
    %20 = vector.broadcast %19 : vector<1x32xf32> to vector<8x32xf32>
    %21 = arith.mulf %18, %20 : vector<8x32xf32>
    %c16 = arith.constant 16 : index
    %c0_9 = arith.constant 0 : index
    %22 = vector.load %arg3[%c16, %c0_9] : memref<192x128xf32, #tpu.memory_space<vmem>>, vector<1x32xf32>
    %23 = vector.broadcast %22 : vector<1x32xf32> to vector<8x32xf32>
    %24 = arith.addf %21, %23 : vector<8x32xf32>
    %25 = vector.shape_cast %24 : vector<8x32xf32> to vector<1x8x32xf32>
    %26 = vector.shape_cast %25 : vector<1x8x32xf32> to vector<1x8x32xf32>
    %27 = vector.broadcast %26 : vector<1x8x32xf32> to vector<2x8x32xf32>
    %28 = vector.shape_cast %27 : vector<2x8x32xf32> to vector<16x32xf32>
    %29 = arith.truncf %28 : vector<16x32xf32> to vector<16x32xbf16>
    %c0_10 = arith.constant 0 : index
    %c0_11 = arith.constant 0 : index
    %30 = vector.load %arg2[%c0_10, %c0_11] : memref<432x128xbf16, #tpu.memory_space<vmem>>, vector<32x96xbf16>
    %cst_12 = arith.constant dense<0.000000e+00> : vector<16x96xf32>
    %31 = tpu.matmul %29, %30, %cst_12 {dimension_numbers = #tpu.dot_dimension_numbers<[1], [0], [0], [1], [0, 0, 1, 1], [], []>} : vector<16x32xbf16>, vector<32x96xbf16>, vector<16x96xf32> -> vector<16x96xf32>
    %c24 = arith.constant 24 : index
    %c0_13 = arith.constant 0 : index
    %32 = vector.load %arg3[%c24, %c0_13] : memref<192x128xf32, #tpu.memory_space<vmem>>, vector<1x96xf32>
    %33 = vector.broadcast %32 : vector<1x96xf32> to vector<16x96xf32>
    %34 = arith.addf %31, %33 : vector<16x96xf32>
    %35 = vector.extract_strided_slice %34 {offsets = [0, 0], sizes = [16, 32], strides = [1, 1]} : vector<16x96xf32> to vector<16x32xf32>
    %36 = vector.extract_strided_slice %34 {offsets = [0, 32], sizes = [16, 32], strides = [1, 1]} : vector<16x96xf32> to vector<16x32xf32>
    %37 = vector.extract_strided_slice %34 {offsets = [0, 64], sizes = [16, 32], strides = [1, 1]} : vector<16x96xf32> to vector<16x32xf32>
    %cst_14 = arith.constant 0.353553385 : f32
    %38 = vector.broadcast %cst_14 : f32 to vector<16x32xf32>
    %39 = arith.mulf %35, %38 : vector<16x32xf32>
    %40 = arith.truncf %39 : vector<16x32xf32> to vector<16x32xbf16>
    %41 = vector.shape_cast %40 : vector<16x32xbf16> to vector<2x8x32xbf16>
    %42 = arith.truncf %36 : vector<16x32xf32> to vector<16x32xbf16>
    %43 = vector.shape_cast %42 : vector<16x32xbf16> to vector<2x8x32xbf16>
    %44 = arith.truncf %37 : vector<16x32xf32> to vector<16x32xbf16>
    %45 = vector.shape_cast %44 : vector<16x32xbf16> to vector<2x8x32xbf16>
    %46 = vector.extract_strided_slice %41 {offsets = [0, 0, 0], sizes = [2, 8, 8], strides = [1, 1, 1]} : vector<2x8x32xbf16> to vector<2x8x8xbf16>
    %47 = vector.extract_strided_slice %43 {offsets = [0, 0, 0], sizes = [2, 8, 8], strides = [1, 1, 1]} : vector<2x8x32xbf16> to vector<2x8x8xbf16>
    "tpu.trace_start"() <{level = 10 : i32, message = "bqd,bkd->bqk"}> : () -> ()
    %cst_15 = arith.constant dense<0.000000e+00> : vector<2x8x8xf32>
    %48 = tpu.matmul %46, %47, %cst_15 {dimension_numbers = #tpu.dot_dimension_numbers<[2], [2], [1], [1], [0, 0, 0, 1, 1, 1], [0], [0]>} : vector<2x8x8xbf16>, vector<2x8x8xbf16>, vector<2x8x8xf32> -> vector<2x8x8xf32>
    "tpu.trace_stop"() : () -> ()
    %cst_16 = arith.constant dense<0xFF800000> : vector<2x8xf32>
    %49 = vector.multi_reduction <maximumf>, %48, %cst_16 [2] : vector<2x8x8xf32> to vector<2x8xf32>
    %50 = vector.shape_cast %49 : vector<2x8xf32> to vector<2x8x1xf32>
    %51 = vector.broadcast %50 : vector<2x8x1xf32> to vector<2x8x8xf32>
    %52 = arith.subf %48, %51 : vector<2x8x8xf32>
    %53 = math.exp %52 : vector<2x8x8xf32>
    %cst_17 = arith.constant dense<0.000000e+00> : vector<2x8xf32>
    %54 = vector.multi_reduction <add>, %53, %cst_17 [2] : vector<2x8x8xf32> to vector<2x8xf32>
    %55 = vector.shape_cast %54 : vector<2x8xf32> to vector<2x8x1xf32>
    %56 = tpu.reciprocal %55 {approx = true} : vector<2x8x1xf32> -> vector<2x8x1xf32>
    %57 = vector.broadcast %56 : vector<2x8x1xf32> to vector<2x8x8xf32>
    %58 = arith.mulf %53, %57 : vector<2x8x8xf32>
    %59 = arith.truncf %58 : vector<2x8x8xf32> to vector<2x8x8xbf16>
    %60 = vector.extract_strided_slice %45 {offsets = [0, 0, 0], sizes = [2, 8, 8], strides = [1, 1, 1]} : vector<2x8x32xbf16> to vector<2x8x8xbf16>
    "tpu.trace_start"() <{level = 10 : i32, message = "bqk,bkd->bqd"}> : () -> ()
    %cst_18 = arith.constant dense<0.000000e+00> : vector<2x8x8xf32>
    %61 = tpu.matmul %59, %60, %cst_18 {dimension_numbers = #tpu.dot_dimension_numbers<[2], [1], [1], [2], [0, 0, 0, 1, 1, 2], [0], [0]>} : vector<2x8x8xbf16>, vector<2x8x8xbf16>, vector<2x8x8xf32> -> vector<2x8x8xf32>
    "tpu.trace_stop"() : () -> ()
    %62 = vector.shape_cast %61 : vector<2x8x8xf32> to vector<16x8xf32>
    %63 = vector.extract_strided_slice %41 {offsets = [0, 0, 8], sizes = [2, 8, 8], strides = [1, 1, 1]} : vector<2x8x32xbf16> to vector<2x8x8xbf16>
    %64 = vector.extract_strided_slice %43 {offsets = [0, 0, 8], sizes = [2, 8, 8], strides = [1, 1, 1]} : vector<2x8x32xbf16> to vector<2x8x8xbf16>
    "tpu.trace_start"() <{level = 10 : i32, message = "bqd,bkd->bqk"}> : () -> ()
    %cst_19 = arith.constant dense<0.000000e+00> : vector<2x8x8xf32>
    %65 = tpu.matmul %63, %64, %cst_19 {dimension_numbers = #tpu.dot_dimension_numbers<[2], [2], [1], [1], [0, 0, 0, 1, 1, 1], [0], [0]>} : vector<2x8x8xbf16>, vector<2x8x8xbf16>, vector<2x8x8xf32> -> vector<2x8x8xf32>
    "tpu.trace_stop"() : () -> ()
    %cst_20 = arith.constant dense<0xFF800000> : vector<2x8xf32>
    %66 = vector.multi_reduction <maximumf>, %65, %cst_20 [2] : vector<2x8x8xf32> to vector<2x8xf32>
    %67 = vector.shape_cast %66 : vector<2x8xf32> to vector<2x8x1xf32>
    %68 = vector.broadcast %67 : vector<2x8x1xf32> to vector<2x8x8xf32>
    %69 = arith.subf %65, %68 : vector<2x8x8xf32>
    %70 = math.exp %69 : vector<2x8x8xf32>
    %cst_21 = arith.constant dense<0.000000e+00> : vector<2x8xf32>
    %71 = vector.multi_reduction <add>, %70, %cst_21 [2] : vector<2x8x8xf32> to vector<2x8xf32>
    %72 = vector.shape_cast %71 : vector<2x8xf32> to vector<2x8x1xf32>
    %73 = tpu.reciprocal %72 {approx = true} : vector<2x8x1xf32> -> vector<2x8x1xf32>
    %74 = vector.broadcast %73 : vector<2x8x1xf32> to vector<2x8x8xf32>
    %75 = arith.mulf %70, %74 : vector<2x8x8xf32>
    %76 = arith.truncf %75 : vector<2x8x8xf32> to vector<2x8x8xbf16>
    %77 = vector.extract_strided_slice %45 {offsets = [0, 0, 8], sizes = [2, 8, 8], strides = [1, 1, 1]} : vector<2x8x32xbf16> to vector<2x8x8xbf16>
    "tpu.trace_start"() <{level = 10 : i32, message = "bqk,bkd->bqd"}> : () -> ()
    %cst_22 = arith.constant dense<0.000000e+00> : vector<2x8x8xf32>
    %78 = tpu.matmul %76, %77, %cst_22 {dimension_numbers = #tpu.dot_dimension_numbers<[2], [1], [1], [2], [0, 0, 0, 1, 1, 2], [0], [0]>} : vector<2x8x8xbf16>, vector<2x8x8xbf16>, vector<2x8x8xf32> -> vector<2x8x8xf32>
    "tpu.trace_stop"() : () -> ()
    %79 = vector.shape_cast %78 : vector<2x8x8xf32> to vector<16x8xf32>
    %80 = vector.extract_strided_slice %41 {offsets = [0, 0, 16], sizes = [2, 8, 8], strides = [1, 1, 1]} : vector<2x8x32xbf16> to vector<2x8x8xbf16>
    %81 = vector.extract_strided_slice %43 {offsets = [0, 0, 16], sizes = [2, 8, 8], strides = [1, 1, 1]} : vector<2x8x32xbf16> to vector<2x8x8xbf16>
    "tpu.trace_start"() <{level = 10 : i32, message = "bqd,bkd->bqk"}> : () -> ()
    %cst_23 = arith.constant dense<0.000000e+00> : vector<2x8x8xf32>
    %82 = tpu.matmul %80, %81, %cst_23 {dimension_numbers = #tpu.dot_dimension_numbers<[2], [2], [1], [1], [0, 0, 0, 1, 1, 1], [0], [0]>} : vector<2x8x8xbf16>, vector<2x8x8xbf16>, vector<2x8x8xf32> -> vector<2x8x8xf32>
    "tpu.trace_stop"() : () -> ()
    %cst_24 = arith.constant dense<0xFF800000> : vector<2x8xf32>
    %83 = vector.multi_reduction <maximumf>, %82, %cst_24 [2] : vector<2x8x8xf32> to vector<2x8xf32>
    %84 = vector.shape_cast %83 : vector<2x8xf32> to vector<2x8x1xf32>
    %85 = vector.broadcast %84 : vector<2x8x1xf32> to vector<2x8x8xf32>
    %86 = arith.subf %82, %85 : vector<2x8x8xf32>
    %87 = math.exp %86 : vector<2x8x8xf32>
    %cst_25 = arith.constant dense<0.000000e+00> : vector<2x8xf32>
    %88 = vector.multi_reduction <add>, %87, %cst_25 [2] : vector<2x8x8xf32> to vector<2x8xf32>
    %89 = vector.shape_cast %88 : vector<2x8xf32> to vector<2x8x1xf32>
    %90 = tpu.reciprocal %89 {approx = true} : vector<2x8x1xf32> -> vector<2x8x1xf32>
    %91 = vector.broadcast %90 : vector<2x8x1xf32> to vector<2x8x8xf32>
    %92 = arith.mulf %87, %91 : vector<2x8x8xf32>
    %93 = arith.truncf %92 : vector<2x8x8xf32> to vector<2x8x8xbf16>
    %94 = vector.extract_strided_slice %45 {offsets = [0, 0, 16], sizes = [2, 8, 8], strides = [1, 1, 1]} : vector<2x8x32xbf16> to vector<2x8x8xbf16>
    "tpu.trace_start"() <{level = 10 : i32, message = "bqk,bkd->bqd"}> : () -> ()
    %cst_26 = arith.constant dense<0.000000e+00> : vector<2x8x8xf32>
    %95 = tpu.matmul %93, %94, %cst_26 {dimension_numbers = #tpu.dot_dimension_numbers<[2], [1], [1], [2], [0, 0, 0, 1, 1, 2], [0], [0]>} : vector<2x8x8xbf16>, vector<2x8x8xbf16>, vector<2x8x8xf32> -> vector<2x8x8xf32>
    "tpu.trace_stop"() : () -> ()
    %96 = vector.shape_cast %95 : vector<2x8x8xf32> to vector<16x8xf32>
    %97 = vector.extract_strided_slice %41 {offsets = [0, 0, 24], sizes = [2, 8, 8], strides = [1, 1, 1]} : vector<2x8x32xbf16> to vector<2x8x8xbf16>
    %98 = vector.extract_strided_slice %43 {offsets = [0, 0, 24], sizes = [2, 8, 8], strides = [1, 1, 1]} : vector<2x8x32xbf16> to vector<2x8x8xbf16>
    "tpu.trace_start"() <{level = 10 : i32, message = "bqd,bkd->bqk"}> : () -> ()
    %cst_27 = arith.constant dense<0.000000e+00> : vector<2x8x8xf32>
    %99 = tpu.matmul %97, %98, %cst_27 {dimension_numbers = #tpu.dot_dimension_numbers<[2], [2], [1], [1], [0, 0, 0, 1, 1, 1], [0], [0]>} : vector<2x8x8xbf16>, vector<2x8x8xbf16>, vector<2x8x8xf32> -> vector<2x8x8xf32>
    "tpu.trace_stop"() : () -> ()
    %cst_28 = arith.constant dense<0xFF800000> : vector<2x8xf32>
    %100 = vector.multi_reduction <maximumf>, %99, %cst_28 [2] : vector<2x8x8xf32> to vector<2x8xf32>
    %101 = vector.shape_cast %100 : vector<2x8xf32> to vector<2x8x1xf32>
    %102 = vector.broadcast %101 : vector<2x8x1xf32> to vector<2x8x8xf32>
    %103 = arith.subf %99, %102 : vector<2x8x8xf32>
    %104 = math.exp %103 : vector<2x8x8xf32>
    %cst_29 = arith.constant dense<0.000000e+00> : vector<2x8xf32>
    %105 = vector.multi_reduction <add>, %104, %cst_29 [2] : vector<2x8x8xf32> to vector<2x8xf32>
    %106 = vector.shape_cast %105 : vector<2x8xf32> to vector<2x8x1xf32>
    %107 = tpu.reciprocal %106 {approx = true} : vector<2x8x1xf32> -> vector<2x8x1xf32>
    %108 = vector.broadcast %107 : vector<2x8x1xf32> to vector<2x8x8xf32>
    %109 = arith.mulf %104, %108 : vector<2x8x8xf32>
    %110 = arith.truncf %109 : vector<2x8x8xf32> to vector<2x8x8xbf16>
    %111 = vector.extract_strided_slice %45 {offsets = [0, 0, 24], sizes = [2, 8, 8], strides = [1, 1, 1]} : vector<2x8x32xbf16> to vector<2x8x8xbf16>
    "tpu.trace_start"() <{level = 10 : i32, message = "bqk,bkd->bqd"}> : () -> ()
    %cst_30 = arith.constant dense<0.000000e+00> : vector<2x8x8xf32>
    %112 = tpu.matmul %110, %111, %cst_30 {dimension_numbers = #tpu.dot_dimension_numbers<[2], [1], [1], [2], [0, 0, 0, 1, 1, 2], [0], [0]>} : vector<2x8x8xbf16>, vector<2x8x8xbf16>, vector<2x8x8xf32> -> vector<2x8x8xf32>
    "tpu.trace_stop"() : () -> ()
    %113 = vector.shape_cast %112 : vector<2x8x8xf32> to vector<16x8xf32>
    %114 = tpu.concatenate %62, %79, %96, %113 in 1 : vector<16x8xf32>, vector<16x8xf32>, vector<16x8xf32>, vector<16x8xf32> -> vector<16x32xf32>
    %115 = arith.truncf %114 : vector<16x32xf32> to vector<16x32xbf16>
    %c32 = arith.constant 32 : index
    %c0_31 = arith.constant 0 : index
    %116 = vector.load %arg2[%c32, %c0_31] : memref<432x128xbf16, #tpu.memory_space<vmem>>, vector<32x32xbf16>
    %cst_32 = arith.constant dense<0.000000e+00> : vector<16x32xf32>
    %117 = tpu.matmul %115, %116, %cst_32 {dimension_numbers = #tpu.dot_dimension_numbers<[1], [0], [0], [1], [0, 0, 1, 1], [], []>} : vector<16x32xbf16>, vector<32x32xbf16>, vector<16x32xf32> -> vector<16x32xf32>
    %c32_33 = arith.constant 32 : index
    %c0_34 = arith.constant 0 : index
    %118 = vector.load %arg3[%c32_33, %c0_34] : memref<192x128xf32, #tpu.memory_space<vmem>>, vector<1x32xf32>
    %119 = vector.broadcast %118 : vector<1x32xf32> to vector<16x32xf32>
    %120 = arith.addf %117, %119 : vector<16x32xf32>
    %121 = arith.addf %120, %28 : vector<16x32xf32>
    %cst_35 = arith.constant dense<0.000000e+00> : vector<16xf32>
    %122 = vector.multi_reduction <add>, %121, %cst_35 [1] : vector<16x32xf32> to vector<16xf32>
    %123 = vector.shape_cast %122 : vector<16xf32> to vector<16x1xf32>
    %cst_36 = arith.constant 3.200000e+01 : f32
    %124 = vector.broadcast %cst_36 : f32 to vector<16x1xf32>
    %125 = arith.divf %123, %124 : vector<16x1xf32>
    %126 = vector.broadcast %125 : vector<16x1xf32> to vector<16x32xf32>
    %127 = arith.subf %121, %126 : vector<16x32xf32>
    %128 = arith.mulf %127, %127 : vector<16x32xf32>
    %cst_37 = arith.constant dense<0.000000e+00> : vector<16xf32>
    %129 = vector.multi_reduction <add>, %128, %cst_37 [1] : vector<16x32xf32> to vector<16xf32>
    %130 = vector.shape_cast %129 : vector<16xf32> to vector<16x1xf32>
    %cst_38 = arith.constant 3.200000e+01 : f32
    %131 = vector.broadcast %cst_38 : f32 to vector<16x1xf32>
    %132 = arith.divf %130, %131 : vector<16x1xf32>
    %cst_39 = arith.constant 9.99999996E-13 : f32
    %133 = vector.broadcast %cst_39 : f32 to vector<16x1xf32>
    %134 = arith.addf %132, %133 : vector<16x1xf32>
    %135 = math.rsqrt %134 : vector<16x1xf32>
    %136 = vector.broadcast %135 : vector<16x1xf32> to vector<16x32xf32>
    %137 = arith.mulf %127, %136 : vector<16x32xf32>
    %c40 = arith.constant 40 : index
    %c0_40 = arith.constant 0 : index
    %138 = vector.load %arg3[%c40, %c0_40] : memref<192x128xf32, #tpu.memory_space<vmem>>, vector<1x32xf32>
    %139 = vector.broadcast %138 : vector<1x32xf32> to vector<16x32xf32>
    %140 = arith.mulf %137, %139 : vector<16x32xf32>
    %c48 = arith.constant 48 : index
    %c0_41 = arith.constant 0 : index
    %141 = vector.load %arg3[%c48, %c0_41] : memref<192x128xf32, #tpu.memory_space<vmem>>, vector<1x32xf32>
    %142 = vector.broadcast %141 : vector<1x32xf32> to vector<16x32xf32>
    %143 = arith.addf %140, %142 : vector<16x32xf32>
    %144 = arith.truncf %143 : vector<16x32xf32> to vector<16x32xbf16>
    %c64 = arith.constant 64 : index
    %c0_42 = arith.constant 0 : index
    %145 = vector.load %arg2[%c64, %c0_42] : memref<432x128xbf16, #tpu.memory_space<vmem>>, vector<32x32xbf16>
    %cst_43 = arith.constant dense<0.000000e+00> : vector<16x32xf32>
    %146 = tpu.matmul %144, %145, %cst_43 {dimension_numbers = #tpu.dot_dimension_numbers<[1], [0], [0], [1], [0, 0, 1, 1], [], []>} : vector<16x32xbf16>, vector<32x32xbf16>, vector<16x32xf32> -> vector<16x32xf32>
    %c56 = arith.constant 56 : index
    %c0_44 = arith.constant 0 : index
    %147 = vector.load %arg3[%c56, %c0_44] : memref<192x128xf32, #tpu.memory_space<vmem>>, vector<1x32xf32>
    %148 = vector.broadcast %147 : vector<1x32xf32> to vector<16x32xf32>
    %149 = arith.addf %146, %148 : vector<16x32xf32>
    %150 = arith.truncf %1 : vector<32x48xf32> to vector<32x48xbf16>
    %c96 = arith.constant 96 : index
    %c0_45 = arith.constant 0 : index
    %151 = vector.load %arg2[%c96, %c0_45] : memref<432x128xbf16, #tpu.memory_space<vmem>>, vector<48x64xbf16>
    %cst_46 = arith.constant dense<0.000000e+00> : vector<32x64xf32>
    %152 = tpu.matmul %150, %151, %cst_46 {dimension_numbers = #tpu.dot_dimension_numbers<[1], [0], [0], [1], [0, 0, 1, 1], [], []>} : vector<32x48xbf16>, vector<48x64xbf16>, vector<32x64xf32> -> vector<32x64xf32>
    %c64_47 = arith.constant 64 : index
    %c0_48 = arith.constant 0 : index
    %153 = vector.load %arg3[%c64_47, %c0_48] : memref<192x128xf32, #tpu.memory_space<vmem>>, vector<1x64xf32>
    %154 = vector.broadcast %153 : vector<1x64xf32> to vector<32x64xf32>
    %155 = arith.addf %152, %154 : vector<32x64xf32>
    %156 = vector.extract_strided_slice %155 {offsets = [0, 0], sizes = [32, 32], strides = [1, 1]} : vector<32x64xf32> to vector<32x32xf32>
    %157 = vector.extract_strided_slice %155 {offsets = [0, 32], sizes = [32, 32], strides = [1, 1]} : vector<32x64xf32> to vector<32x32xf32>
    %cst_49 = arith.constant 0.353553385 : f32
    %158 = vector.broadcast %cst_49 : f32 to vector<16x32xf32>
    %159 = arith.mulf %149, %158 : vector<16x32xf32>
    %160 = arith.truncf %159 : vector<16x32xf32> to vector<16x32xbf16>
    %161 = vector.shape_cast %160 : vector<16x32xbf16> to vector<2x8x32xbf16>
    %162 = arith.truncf %156 : vector<32x32xf32> to vector<32x32xbf16>
    %163 = vector.shape_cast %162 : vector<32x32xbf16> to vector<2x16x32xbf16>
    %164 = arith.truncf %157 : vector<32x32xf32> to vector<32x32xbf16>
    %165 = vector.shape_cast %164 : vector<32x32xbf16> to vector<2x16x32xbf16>
    %166 = vector.extract_strided_slice %161 {offsets = [0, 0, 0], sizes = [2, 8, 8], strides = [1, 1, 1]} : vector<2x8x32xbf16> to vector<2x8x8xbf16>
    %167 = vector.extract_strided_slice %163 {offsets = [0, 0, 0], sizes = [2, 16, 8], strides = [1, 1, 1]} : vector<2x16x32xbf16> to vector<2x16x8xbf16>
    "tpu.trace_start"() <{level = 10 : i32, message = "bqd,bkd->bqk"}> : () -> ()
    %cst_50 = arith.constant dense<0.000000e+00> : vector<2x8x16xf32>
    %168 = tpu.matmul %166, %167, %cst_50 {dimension_numbers = #tpu.dot_dimension_numbers<[2], [2], [1], [1], [0, 0, 0, 1, 1, 1], [0], [0]>} : vector<2x8x8xbf16>, vector<2x16x8xbf16>, vector<2x8x16xf32> -> vector<2x8x16xf32>
    "tpu.trace_stop"() : () -> ()
    %cst_51 = arith.constant dense<0xFF800000> : vector<2x8xf32>
    %169 = vector.multi_reduction <maximumf>, %168, %cst_51 [2] : vector<2x8x16xf32> to vector<2x8xf32>
    %170 = vector.shape_cast %169 : vector<2x8xf32> to vector<2x8x1xf32>
    %171 = vector.broadcast %170 : vector<2x8x1xf32> to vector<2x8x16xf32>
    %172 = arith.subf %168, %171 : vector<2x8x16xf32>
    %173 = math.exp %172 : vector<2x8x16xf32>
    %cst_52 = arith.constant dense<0.000000e+00> : vector<2x8xf32>
    %174 = vector.multi_reduction <add>, %173, %cst_52 [2] : vector<2x8x16xf32> to vector<2x8xf32>
    %175 = vector.shape_cast %174 : vector<2x8xf32> to vector<2x8x1xf32>
    %176 = tpu.reciprocal %175 {approx = true} : vector<2x8x1xf32> -> vector<2x8x1xf32>
    %177 = vector.broadcast %176 : vector<2x8x1xf32> to vector<2x8x16xf32>
    %178 = arith.mulf %173, %177 : vector<2x8x16xf32>
    %179 = arith.truncf %178 : vector<2x8x16xf32> to vector<2x8x16xbf16>
    %180 = vector.extract_strided_slice %165 {offsets = [0, 0, 0], sizes = [2, 16, 8], strides = [1, 1, 1]} : vector<2x16x32xbf16> to vector<2x16x8xbf16>
    "tpu.trace_start"() <{level = 10 : i32, message = "bqk,bkd->bqd"}> : () -> ()
    %cst_53 = arith.constant dense<0.000000e+00> : vector<2x8x8xf32>
    %181 = tpu.matmul %179, %180, %cst_53 {dimension_numbers = #tpu.dot_dimension_numbers<[2], [1], [1], [2], [0, 0, 0, 1, 1, 2], [0], [0]>} : vector<2x8x16xbf16>, vector<2x16x8xbf16>, vector<2x8x8xf32> -> vector<2x8x8xf32>
    "tpu.trace_stop"() : () -> ()
    %182 = vector.shape_cast %181 : vector<2x8x8xf32> to vector<16x8xf32>
    %183 = vector.extract_strided_slice %161 {offsets = [0, 0, 8], sizes = [2, 8, 8], strides = [1, 1, 1]} : vector<2x8x32xbf16> to vector<2x8x8xbf16>
    %184 = vector.extract_strided_slice %163 {offsets = [0, 0, 8], sizes = [2, 16, 8], strides = [1, 1, 1]} : vector<2x16x32xbf16> to vector<2x16x8xbf16>
    "tpu.trace_start"() <{level = 10 : i32, message = "bqd,bkd->bqk"}> : () -> ()
    %cst_54 = arith.constant dense<0.000000e+00> : vector<2x8x16xf32>
    %185 = tpu.matmul %183, %184, %cst_54 {dimension_numbers = #tpu.dot_dimension_numbers<[2], [2], [1], [1], [0, 0, 0, 1, 1, 1], [0], [0]>} : vector<2x8x8xbf16>, vector<2x16x8xbf16>, vector<2x8x16xf32> -> vector<2x8x16xf32>
    "tpu.trace_stop"() : () -> ()
    %cst_55 = arith.constant dense<0xFF800000> : vector<2x8xf32>
    %186 = vector.multi_reduction <maximumf>, %185, %cst_55 [2] : vector<2x8x16xf32> to vector<2x8xf32>
    %187 = vector.shape_cast %186 : vector<2x8xf32> to vector<2x8x1xf32>
    %188 = vector.broadcast %187 : vector<2x8x1xf32> to vector<2x8x16xf32>
    %189 = arith.subf %185, %188 : vector<2x8x16xf32>
    %190 = math.exp %189 : vector<2x8x16xf32>
    %cst_56 = arith.constant dense<0.000000e+00> : vector<2x8xf32>
    %191 = vector.multi_reduction <add>, %190, %cst_56 [2] : vector<2x8x16xf32> to vector<2x8xf32>
    %192 = vector.shape_cast %191 : vector<2x8xf32> to vector<2x8x1xf32>
    %193 = tpu.reciprocal %192 {approx = true} : vector<2x8x1xf32> -> vector<2x8x1xf32>
    %194 = vector.broadcast %193 : vector<2x8x1xf32> to vector<2x8x16xf32>
    %195 = arith.mulf %190, %194 : vector<2x8x16xf32>
    %196 = arith.truncf %195 : vector<2x8x16xf32> to vector<2x8x16xbf16>
    %197 = vector.extract_strided_slice %165 {offsets = [0, 0, 8], sizes = [2, 16, 8], strides = [1, 1, 1]} : vector<2x16x32xbf16> to vector<2x16x8xbf16>
    "tpu.trace_start"() <{level = 10 : i32, message = "bqk,bkd->bqd"}> : () -> ()
    %cst_57 = arith.constant dense<0.000000e+00> : vector<2x8x8xf32>
    %198 = tpu.matmul %196, %197, %cst_57 {dimension_numbers = #tpu.dot_dimension_numbers<[2], [1], [1], [2], [0, 0, 0, 1, 1, 2], [0], [0]>} : vector<2x8x16xbf16>, vector<2x16x8xbf16>, vector<2x8x8xf32> -> vector<2x8x8xf32>
    "tpu.trace_stop"() : () -> ()
    %199 = vector.shape_cast %198 : vector<2x8x8xf32> to vector<16x8xf32>
    %200 = vector.extract_strided_slice %161 {offsets = [0, 0, 16], sizes = [2, 8, 8], strides = [1, 1, 1]} : vector<2x8x32xbf16> to vector<2x8x8xbf16>
    %201 = vector.extract_strided_slice %163 {offsets = [0, 0, 16], sizes = [2, 16, 8], strides = [1, 1, 1]} : vector<2x16x32xbf16> to vector<2x16x8xbf16>
    "tpu.trace_start"() <{level = 10 : i32, message = "bqd,bkd->bqk"}> : () -> ()
    %cst_58 = arith.constant dense<0.000000e+00> : vector<2x8x16xf32>
    %202 = tpu.matmul %200, %201, %cst_58 {dimension_numbers = #tpu.dot_dimension_numbers<[2], [2], [1], [1], [0, 0, 0, 1, 1, 1], [0], [0]>} : vector<2x8x8xbf16>, vector<2x16x8xbf16>, vector<2x8x16xf32> -> vector<2x8x16xf32>
    "tpu.trace_stop"() : () -> ()
    %cst_59 = arith.constant dense<0xFF800000> : vector<2x8xf32>
    %203 = vector.multi_reduction <maximumf>, %202, %cst_59 [2] : vector<2x8x16xf32> to vector<2x8xf32>
    %204 = vector.shape_cast %203 : vector<2x8xf32> to vector<2x8x1xf32>
    %205 = vector.broadcast %204 : vector<2x8x1xf32> to vector<2x8x16xf32>
    %206 = arith.subf %202, %205 : vector<2x8x16xf32>
    %207 = math.exp %206 : vector<2x8x16xf32>
    %cst_60 = arith.constant dense<0.000000e+00> : vector<2x8xf32>
    %208 = vector.multi_reduction <add>, %207, %cst_60 [2] : vector<2x8x16xf32> to vector<2x8xf32>
    %209 = vector.shape_cast %208 : vector<2x8xf32> to vector<2x8x1xf32>
    %210 = tpu.reciprocal %209 {approx = true} : vector<2x8x1xf32> -> vector<2x8x1xf32>
    %211 = vector.broadcast %210 : vector<2x8x1xf32> to vector<2x8x16xf32>
    %212 = arith.mulf %207, %211 : vector<2x8x16xf32>
    %213 = arith.truncf %212 : vector<2x8x16xf32> to vector<2x8x16xbf16>
    %214 = vector.extract_strided_slice %165 {offsets = [0, 0, 16], sizes = [2, 16, 8], strides = [1, 1, 1]} : vector<2x16x32xbf16> to vector<2x16x8xbf16>
    "tpu.trace_start"() <{level = 10 : i32, message = "bqk,bkd->bqd"}> : () -> ()
    %cst_61 = arith.constant dense<0.000000e+00> : vector<2x8x8xf32>
    %215 = tpu.matmul %213, %214, %cst_61 {dimension_numbers = #tpu.dot_dimension_numbers<[2], [1], [1], [2], [0, 0, 0, 1, 1, 2], [0], [0]>} : vector<2x8x16xbf16>, vector<2x16x8xbf16>, vector<2x8x8xf32> -> vector<2x8x8xf32>
    "tpu.trace_stop"() : () -> ()
    %216 = vector.shape_cast %215 : vector<2x8x8xf32> to vector<16x8xf32>
    %217 = vector.extract_strided_slice %161 {offsets = [0, 0, 24], sizes = [2, 8, 8], strides = [1, 1, 1]} : vector<2x8x32xbf16> to vector<2x8x8xbf16>
    %218 = vector.extract_strided_slice %163 {offsets = [0, 0, 24], sizes = [2, 16, 8], strides = [1, 1, 1]} : vector<2x16x32xbf16> to vector<2x16x8xbf16>
    "tpu.trace_start"() <{level = 10 : i32, message = "bqd,bkd->bqk"}> : () -> ()
    %cst_62 = arith.constant dense<0.000000e+00> : vector<2x8x16xf32>
    %219 = tpu.matmul %217, %218, %cst_62 {dimension_numbers = #tpu.dot_dimension_numbers<[2], [2], [1], [1], [0, 0, 0, 1, 1, 1], [0], [0]>} : vector<2x8x8xbf16>, vector<2x16x8xbf16>, vector<2x8x16xf32> -> vector<2x8x16xf32>
    "tpu.trace_stop"() : () -> ()
    %cst_63 = arith.constant dense<0xFF800000> : vector<2x8xf32>
    %220 = vector.multi_reduction <maximumf>, %219, %cst_63 [2] : vector<2x8x16xf32> to vector<2x8xf32>
    %221 = vector.shape_cast %220 : vector<2x8xf32> to vector<2x8x1xf32>
    %222 = vector.broadcast %221 : vector<2x8x1xf32> to vector<2x8x16xf32>
    %223 = arith.subf %219, %222 : vector<2x8x16xf32>
    %224 = math.exp %223 : vector<2x8x16xf32>
    %cst_64 = arith.constant dense<0.000000e+00> : vector<2x8xf32>
    %225 = vector.multi_reduction <add>, %224, %cst_64 [2] : vector<2x8x16xf32> to vector<2x8xf32>
    %226 = vector.shape_cast %225 : vector<2x8xf32> to vector<2x8x1xf32>
    %227 = tpu.reciprocal %226 {approx = true} : vector<2x8x1xf32> -> vector<2x8x1xf32>
    %228 = vector.broadcast %227 : vector<2x8x1xf32> to vector<2x8x16xf32>
    %229 = arith.mulf %224, %228 : vector<2x8x16xf32>
    %230 = arith.truncf %229 : vector<2x8x16xf32> to vector<2x8x16xbf16>
    %231 = vector.extract_strided_slice %165 {offsets = [0, 0, 24], sizes = [2, 16, 8], strides = [1, 1, 1]} : vector<2x16x32xbf16> to vector<2x16x8xbf16>
    "tpu.trace_start"() <{level = 10 : i32, message = "bqk,bkd->bqd"}> : () -> ()
    %cst_65 = arith.constant dense<0.000000e+00> : vector<2x8x8xf32>
    %232 = tpu.matmul %230, %231, %cst_65 {dimension_numbers = #tpu.dot_dimension_numbers<[2], [1], [1], [2], [0, 0, 0, 1, 1, 2], [0], [0]>} : vector<2x8x16xbf16>, vector<2x16x8xbf16>, vector<2x8x8xf32> -> vector<2x8x8xf32>
    "tpu.trace_stop"() : () -> ()
    %233 = vector.shape_cast %232 : vector<2x8x8xf32> to vector<16x8xf32>
    %234 = tpu.concatenate %182, %199, %216, %233 in 1 : vector<16x8xf32>, vector<16x8xf32>, vector<16x8xf32>, vector<16x8xf32> -> vector<16x32xf32>
    %235 = arith.truncf %234 : vector<16x32xf32> to vector<16x32xbf16>
    %c144 = arith.constant 144 : index
    %c0_66 = arith.constant 0 : index
    %236 = vector.load %arg2[%c144, %c0_66] : memref<432x128xbf16, #tpu.memory_space<vmem>>, vector<32x32xbf16>
    %cst_67 = arith.constant dense<0.000000e+00> : vector<16x32xf32>
    %237 = tpu.matmul %235, %236, %cst_67 {dimension_numbers = #tpu.dot_dimension_numbers<[1], [0], [0], [1], [0, 0, 1, 1], [], []>} : vector<16x32xbf16>, vector<32x32xbf16>, vector<16x32xf32> -> vector<16x32xf32>
    %c72 = arith.constant 72 : index
    %c0_68 = arith.constant 0 : index
    %238 = vector.load %arg3[%c72, %c0_68] : memref<192x128xf32, #tpu.memory_space<vmem>>, vector<1x32xf32>
    %239 = vector.broadcast %238 : vector<1x32xf32> to vector<16x32xf32>
    %240 = arith.addf %237, %239 : vector<16x32xf32>
    %241 = arith.addf %240, %143 : vector<16x32xf32>
    %cst_69 = arith.constant dense<0.000000e+00> : vector<16xf32>
    %242 = vector.multi_reduction <add>, %241, %cst_69 [1] : vector<16x32xf32> to vector<16xf32>
    %243 = vector.shape_cast %242 : vector<16xf32> to vector<16x1xf32>
    %cst_70 = arith.constant 3.200000e+01 : f32
    %244 = vector.broadcast %cst_70 : f32 to vector<16x1xf32>
    %245 = arith.divf %243, %244 : vector<16x1xf32>
    %246 = vector.broadcast %245 : vector<16x1xf32> to vector<16x32xf32>
    %247 = arith.subf %241, %246 : vector<16x32xf32>
    %248 = arith.mulf %247, %247 : vector<16x32xf32>
    %cst_71 = arith.constant dense<0.000000e+00> : vector<16xf32>
    %249 = vector.multi_reduction <add>, %248, %cst_71 [1] : vector<16x32xf32> to vector<16xf32>
    %250 = vector.shape_cast %249 : vector<16xf32> to vector<16x1xf32>
    %cst_72 = arith.constant 3.200000e+01 : f32
    %251 = vector.broadcast %cst_72 : f32 to vector<16x1xf32>
    %252 = arith.divf %250, %251 : vector<16x1xf32>
    %cst_73 = arith.constant 9.99999996E-13 : f32
    %253 = vector.broadcast %cst_73 : f32 to vector<16x1xf32>
    %254 = arith.addf %252, %253 : vector<16x1xf32>
    %255 = math.rsqrt %254 : vector<16x1xf32>
    %256 = vector.broadcast %255 : vector<16x1xf32> to vector<16x32xf32>
    %257 = arith.mulf %247, %256 : vector<16x32xf32>
    %c80 = arith.constant 80 : index
    %c0_74 = arith.constant 0 : index
    %258 = vector.load %arg3[%c80, %c0_74] : memref<192x128xf32, #tpu.memory_space<vmem>>, vector<1x32xf32>
    %259 = vector.broadcast %258 : vector<1x32xf32> to vector<16x32xf32>
    %260 = arith.mulf %257, %259 : vector<16x32xf32>
    %c88 = arith.constant 88 : index
    %c0_75 = arith.constant 0 : index
    %261 = vector.load %arg3[%c88, %c0_75] : memref<192x128xf32, #tpu.memory_space<vmem>>, vector<1x32xf32>
    %262 = vector.broadcast %261 : vector<1x32xf32> to vector<16x32xf32>
    %263 = arith.addf %260, %262 : vector<16x32xf32>
    %264 = arith.truncf %263 : vector<16x32xf32> to vector<16x32xbf16>
    %c176 = arith.constant 176 : index
    %c0_76 = arith.constant 0 : index
    %265 = vector.load %arg2[%c176, %c0_76] : memref<432x128xbf16, #tpu.memory_space<vmem>>, vector<32x64xbf16>
    %cst_77 = arith.constant dense<0.000000e+00> : vector<16x64xf32>
    %266 = tpu.matmul %264, %265, %cst_77 {dimension_numbers = #tpu.dot_dimension_numbers<[1], [0], [0], [1], [0, 0, 1, 1], [], []>} : vector<16x32xbf16>, vector<32x64xbf16>, vector<16x64xf32> -> vector<16x64xf32>
    %c96_78 = arith.constant 96 : index
    %c0_79 = arith.constant 0 : index
    %267 = vector.load %arg3[%c96_78, %c0_79] : memref<192x128xf32, #tpu.memory_space<vmem>>, vector<1x64xf32>
    %268 = vector.broadcast %267 : vector<1x64xf32> to vector<16x64xf32>
    %269 = arith.addf %266, %268 : vector<16x64xf32>
    %cst_80 = arith.constant 5.000000e-01 : f32
    %270 = vector.broadcast %cst_80 : f32 to vector<16x64xf32>
    %271 = arith.mulf %270, %269 : vector<16x64xf32>
    %cst_81 = arith.constant 4.471500e-02 : f32
    %272 = vector.broadcast %cst_81 : f32 to vector<16x64xf32>
    %273 = arith.mulf %272, %269 : vector<16x64xf32>
    %274 = arith.mulf %273, %269 : vector<16x64xf32>
    %275 = arith.mulf %274, %269 : vector<16x64xf32>
    %276 = arith.addf %269, %275 : vector<16x64xf32>
    %cst_82 = arith.constant 0.797884583 : f32
    %277 = vector.broadcast %cst_82 : f32 to vector<16x64xf32>
    %278 = arith.mulf %277, %276 : vector<16x64xf32>
    %279 = math.tanh %278 : vector<16x64xf32>
    %cst_83 = arith.constant 1.000000e+00 : f32
    %280 = vector.broadcast %cst_83 : f32 to vector<16x64xf32>
    %281 = arith.addf %280, %279 : vector<16x64xf32>
    %282 = arith.mulf %271, %281 : vector<16x64xf32>
    %283 = arith.truncf %282 : vector<16x64xf32> to vector<16x64xbf16>
    %c208 = arith.constant 208 : index
    %c0_84 = arith.constant 0 : index
    %284 = vector.load %arg2[%c208, %c0_84] : memref<432x128xbf16, #tpu.memory_space<vmem>>, vector<64x32xbf16>
    %cst_85 = arith.constant dense<0.000000e+00> : vector<16x32xf32>
    %285 = tpu.matmul %283, %284, %cst_85 {dimension_numbers = #tpu.dot_dimension_numbers<[1], [0], [0], [1], [0, 0, 1, 1], [], []>} : vector<16x64xbf16>, vector<64x32xbf16>, vector<16x32xf32> -> vector<16x32xf32>
    %c104 = arith.constant 104 : index
    %c0_86 = arith.constant 0 : index
    %286 = vector.load %arg3[%c104, %c0_86] : memref<192x128xf32, #tpu.memory_space<vmem>>, vector<1x32xf32>
    %287 = vector.broadcast %286 : vector<1x32xf32> to vector<16x32xf32>
    %288 = arith.addf %285, %287 : vector<16x32xf32>
    %289 = arith.addf %288, %263 : vector<16x32xf32>
    %cst_87 = arith.constant dense<0.000000e+00> : vector<16xf32>
    %290 = vector.multi_reduction <add>, %289, %cst_87 [1] : vector<16x32xf32> to vector<16xf32>
    %291 = vector.shape_cast %290 : vector<16xf32> to vector<16x1xf32>
    %cst_88 = arith.constant 3.200000e+01 : f32
    %292 = vector.broadcast %cst_88 : f32 to vector<16x1xf32>
    %293 = arith.divf %291, %292 : vector<16x1xf32>
    %294 = vector.broadcast %293 : vector<16x1xf32> to vector<16x32xf32>
    %295 = arith.subf %289, %294 : vector<16x32xf32>
    %296 = arith.mulf %295, %295 : vector<16x32xf32>
    %cst_89 = arith.constant dense<0.000000e+00> : vector<16xf32>
    %297 = vector.multi_reduction <add>, %296, %cst_89 [1] : vector<16x32xf32> to vector<16xf32>
    %298 = vector.shape_cast %297 : vector<16xf32> to vector<16x1xf32>
    %cst_90 = arith.constant 3.200000e+01 : f32
    %299 = vector.broadcast %cst_90 : f32 to vector<16x1xf32>
    %300 = arith.divf %298, %299 : vector<16x1xf32>
    %cst_91 = arith.constant 9.99999996E-13 : f32
    %301 = vector.broadcast %cst_91 : f32 to vector<16x1xf32>
    %302 = arith.addf %300, %301 : vector<16x1xf32>
    %303 = math.rsqrt %302 : vector<16x1xf32>
    %304 = vector.broadcast %303 : vector<16x1xf32> to vector<16x32xf32>
    %305 = arith.mulf %295, %304 : vector<16x32xf32>
    %c112 = arith.constant 112 : index
    %c0_92 = arith.constant 0 : index
    %306 = vector.load %arg3[%c112, %c0_92] : memref<192x128xf32, #tpu.memory_space<vmem>>, vector<1x32xf32>
    %307 = vector.broadcast %306 : vector<1x32xf32> to vector<16x32xf32>
    %308 = arith.mulf %305, %307 : vector<16x32xf32>
    %c120 = arith.constant 120 : index
    %c0_93 = arith.constant 0 : index
    %309 = vector.load %arg3[%c120, %c0_93] : memref<192x128xf32, #tpu.memory_space<vmem>>, vector<1x32xf32>
    %310 = vector.broadcast %309 : vector<1x32xf32> to vector<16x32xf32>
    %311 = arith.addf %308, %310 : vector<16x32xf32>
    %312 = arith.truncf %311 : vector<16x32xf32> to vector<16x32xbf16>
    %c272 = arith.constant 272 : index
    %c0_94 = arith.constant 0 : index
    %313 = vector.load %arg2[%c272, %c0_94] : memref<432x128xbf16, #tpu.memory_space<vmem>>, vector<32x96xbf16>
    %cst_95 = arith.constant dense<0.000000e+00> : vector<16x96xf32>
    %314 = tpu.matmul %312, %313, %cst_95 {dimension_numbers = #tpu.dot_dimension_numbers<[1], [0], [0], [1], [0, 0, 1, 1], [], []>} : vector<16x32xbf16>, vector<32x96xbf16>, vector<16x96xf32> -> vector<16x96xf32>
    %c128 = arith.constant 128 : index
    %c0_96 = arith.constant 0 : index
    %315 = vector.load %arg3[%c128, %c0_96] : memref<192x128xf32, #tpu.memory_space<vmem>>, vector<1x96xf32>
    %316 = vector.broadcast %315 : vector<1x96xf32> to vector<16x96xf32>
    %317 = arith.addf %314, %316 : vector<16x96xf32>
    %318 = vector.extract_strided_slice %317 {offsets = [0, 0], sizes = [16, 32], strides = [1, 1]} : vector<16x96xf32> to vector<16x32xf32>
    %319 = vector.extract_strided_slice %317 {offsets = [0, 32], sizes = [16, 32], strides = [1, 1]} : vector<16x96xf32> to vector<16x32xf32>
    %320 = vector.extract_strided_slice %317 {offsets = [0, 64], sizes = [16, 32], strides = [1, 1]} : vector<16x96xf32> to vector<16x32xf32>
    %cst_97 = arith.constant 0.353553385 : f32
    %321 = vector.broadcast %cst_97 : f32 to vector<16x32xf32>
    %322 = arith.mulf %318, %321 : vector<16x32xf32>
    %323 = arith.truncf %322 : vector<16x32xf32> to vector<16x32xbf16>
    %324 = vector.shape_cast %323 : vector<16x32xbf16> to vector<2x8x32xbf16>
    %325 = arith.truncf %319 : vector<16x32xf32> to vector<16x32xbf16>
    %326 = vector.shape_cast %325 : vector<16x32xbf16> to vector<2x8x32xbf16>
    %327 = arith.truncf %320 : vector<16x32xf32> to vector<16x32xbf16>
    %328 = vector.shape_cast %327 : vector<16x32xbf16> to vector<2x8x32xbf16>
    %329 = vector.extract_strided_slice %324 {offsets = [0, 0, 0], sizes = [2, 8, 8], strides = [1, 1, 1]} : vector<2x8x32xbf16> to vector<2x8x8xbf16>
    %330 = vector.extract_strided_slice %326 {offsets = [0, 0, 0], sizes = [2, 8, 8], strides = [1, 1, 1]} : vector<2x8x32xbf16> to vector<2x8x8xbf16>
    "tpu.trace_start"() <{level = 10 : i32, message = "bqd,bkd->bqk"}> : () -> ()
    %cst_98 = arith.constant dense<0.000000e+00> : vector<2x8x8xf32>
    %331 = tpu.matmul %329, %330, %cst_98 {dimension_numbers = #tpu.dot_dimension_numbers<[2], [2], [1], [1], [0, 0, 0, 1, 1, 1], [0], [0]>} : vector<2x8x8xbf16>, vector<2x8x8xbf16>, vector<2x8x8xf32> -> vector<2x8x8xf32>
    "tpu.trace_stop"() : () -> ()
    %cst_99 = arith.constant dense<0xFF800000> : vector<2x8xf32>
    %332 = vector.multi_reduction <maximumf>, %331, %cst_99 [2] : vector<2x8x8xf32> to vector<2x8xf32>
    %333 = vector.shape_cast %332 : vector<2x8xf32> to vector<2x8x1xf32>
    %334 = vector.broadcast %333 : vector<2x8x1xf32> to vector<2x8x8xf32>
    %335 = arith.subf %331, %334 : vector<2x8x8xf32>
    %336 = math.exp %335 : vector<2x8x8xf32>
    %cst_100 = arith.constant dense<0.000000e+00> : vector<2x8xf32>
    %337 = vector.multi_reduction <add>, %336, %cst_100 [2] : vector<2x8x8xf32> to vector<2x8xf32>
    %338 = vector.shape_cast %337 : vector<2x8xf32> to vector<2x8x1xf32>
    %339 = tpu.reciprocal %338 {approx = true} : vector<2x8x1xf32> -> vector<2x8x1xf32>
    %340 = vector.broadcast %339 : vector<2x8x1xf32> to vector<2x8x8xf32>
    %341 = arith.mulf %336, %340 : vector<2x8x8xf32>
    %342 = arith.truncf %341 : vector<2x8x8xf32> to vector<2x8x8xbf16>
    %343 = vector.extract_strided_slice %328 {offsets = [0, 0, 0], sizes = [2, 8, 8], strides = [1, 1, 1]} : vector<2x8x32xbf16> to vector<2x8x8xbf16>
    "tpu.trace_start"() <{level = 10 : i32, message = "bqk,bkd->bqd"}> : () -> ()
    %cst_101 = arith.constant dense<0.000000e+00> : vector<2x8x8xf32>
    %344 = tpu.matmul %342, %343, %cst_101 {dimension_numbers = #tpu.dot_dimension_numbers<[2], [1], [1], [2], [0, 0, 0, 1, 1, 2], [0], [0]>} : vector<2x8x8xbf16>, vector<2x8x8xbf16>, vector<2x8x8xf32> -> vector<2x8x8xf32>
    "tpu.trace_stop"() : () -> ()
    %345 = vector.shape_cast %344 : vector<2x8x8xf32> to vector<16x8xf32>
    %346 = vector.extract_strided_slice %324 {offsets = [0, 0, 8], sizes = [2, 8, 8], strides = [1, 1, 1]} : vector<2x8x32xbf16> to vector<2x8x8xbf16>
    %347 = vector.extract_strided_slice %326 {offsets = [0, 0, 8], sizes = [2, 8, 8], strides = [1, 1, 1]} : vector<2x8x32xbf16> to vector<2x8x8xbf16>
    "tpu.trace_start"() <{level = 10 : i32, message = "bqd,bkd->bqk"}> : () -> ()
    %cst_102 = arith.constant dense<0.000000e+00> : vector<2x8x8xf32>
    %348 = tpu.matmul %346, %347, %cst_102 {dimension_numbers = #tpu.dot_dimension_numbers<[2], [2], [1], [1], [0, 0, 0, 1, 1, 1], [0], [0]>} : vector<2x8x8xbf16>, vector<2x8x8xbf16>, vector<2x8x8xf32> -> vector<2x8x8xf32>
    "tpu.trace_stop"() : () -> ()
    %cst_103 = arith.constant dense<0xFF800000> : vector<2x8xf32>
    %349 = vector.multi_reduction <maximumf>, %348, %cst_103 [2] : vector<2x8x8xf32> to vector<2x8xf32>
    %350 = vector.shape_cast %349 : vector<2x8xf32> to vector<2x8x1xf32>
    %351 = vector.broadcast %350 : vector<2x8x1xf32> to vector<2x8x8xf32>
    %352 = arith.subf %348, %351 : vector<2x8x8xf32>
    %353 = math.exp %352 : vector<2x8x8xf32>
    %cst_104 = arith.constant dense<0.000000e+00> : vector<2x8xf32>
    %354 = vector.multi_reduction <add>, %353, %cst_104 [2] : vector<2x8x8xf32> to vector<2x8xf32>
    %355 = vector.shape_cast %354 : vector<2x8xf32> to vector<2x8x1xf32>
    %356 = tpu.reciprocal %355 {approx = true} : vector<2x8x1xf32> -> vector<2x8x1xf32>
    %357 = vector.broadcast %356 : vector<2x8x1xf32> to vector<2x8x8xf32>
    %358 = arith.mulf %353, %357 : vector<2x8x8xf32>
    %359 = arith.truncf %358 : vector<2x8x8xf32> to vector<2x8x8xbf16>
    %360 = vector.extract_strided_slice %328 {offsets = [0, 0, 8], sizes = [2, 8, 8], strides = [1, 1, 1]} : vector<2x8x32xbf16> to vector<2x8x8xbf16>
    "tpu.trace_start"() <{level = 10 : i32, message = "bqk,bkd->bqd"}> : () -> ()
    %cst_105 = arith.constant dense<0.000000e+00> : vector<2x8x8xf32>
    %361 = tpu.matmul %359, %360, %cst_105 {dimension_numbers = #tpu.dot_dimension_numbers<[2], [1], [1], [2], [0, 0, 0, 1, 1, 2], [0], [0]>} : vector<2x8x8xbf16>, vector<2x8x8xbf16>, vector<2x8x8xf32> -> vector<2x8x8xf32>
    "tpu.trace_stop"() : () -> ()
    %362 = vector.shape_cast %361 : vector<2x8x8xf32> to vector<16x8xf32>
    %363 = vector.extract_strided_slice %324 {offsets = [0, 0, 16], sizes = [2, 8, 8], strides = [1, 1, 1]} : vector<2x8x32xbf16> to vector<2x8x8xbf16>
    %364 = vector.extract_strided_slice %326 {offsets = [0, 0, 16], sizes = [2, 8, 8], strides = [1, 1, 1]} : vector<2x8x32xbf16> to vector<2x8x8xbf16>
    "tpu.trace_start"() <{level = 10 : i32, message = "bqd,bkd->bqk"}> : () -> ()
    %cst_106 = arith.constant dense<0.000000e+00> : vector<2x8x8xf32>
    %365 = tpu.matmul %363, %364, %cst_106 {dimension_numbers = #tpu.dot_dimension_numbers<[2], [2], [1], [1], [0, 0, 0, 1, 1, 1], [0], [0]>} : vector<2x8x8xbf16>, vector<2x8x8xbf16>, vector<2x8x8xf32> -> vector<2x8x8xf32>
    "tpu.trace_stop"() : () -> ()
    %cst_107 = arith.constant dense<0xFF800000> : vector<2x8xf32>
    %366 = vector.multi_reduction <maximumf>, %365, %cst_107 [2] : vector<2x8x8xf32> to vector<2x8xf32>
    %367 = vector.shape_cast %366 : vector<2x8xf32> to vector<2x8x1xf32>
    %368 = vector.broadcast %367 : vector<2x8x1xf32> to vector<2x8x8xf32>
    %369 = arith.subf %365, %368 : vector<2x8x8xf32>
    %370 = math.exp %369 : vector<2x8x8xf32>
    %cst_108 = arith.constant dense<0.000000e+00> : vector<2x8xf32>
    %371 = vector.multi_reduction <add>, %370, %cst_108 [2] : vector<2x8x8xf32> to vector<2x8xf32>
    %372 = vector.shape_cast %371 : vector<2x8xf32> to vector<2x8x1xf32>
    %373 = tpu.reciprocal %372 {approx = true} : vector<2x8x1xf32> -> vector<2x8x1xf32>
    %374 = vector.broadcast %373 : vector<2x8x1xf32> to vector<2x8x8xf32>
    %375 = arith.mulf %370, %374 : vector<2x8x8xf32>
    %376 = arith.truncf %375 : vector<2x8x8xf32> to vector<2x8x8xbf16>
    %377 = vector.extract_strided_slice %328 {offsets = [0, 0, 16], sizes = [2, 8, 8], strides = [1, 1, 1]} : vector<2x8x32xbf16> to vector<2x8x8xbf16>
    "tpu.trace_start"() <{level = 10 : i32, message = "bqk,bkd->bqd"}> : () -> ()
    %cst_109 = arith.constant dense<0.000000e+00> : vector<2x8x8xf32>
    %378 = tpu.matmul %376, %377, %cst_109 {dimension_numbers = #tpu.dot_dimension_numbers<[2], [1], [1], [2], [0, 0, 0, 1, 1, 2], [0], [0]>} : vector<2x8x8xbf16>, vector<2x8x8xbf16>, vector<2x8x8xf32> -> vector<2x8x8xf32>
    "tpu.trace_stop"() : () -> ()
    %379 = vector.shape_cast %378 : vector<2x8x8xf32> to vector<16x8xf32>
    %380 = vector.extract_strided_slice %324 {offsets = [0, 0, 24], sizes = [2, 8, 8], strides = [1, 1, 1]} : vector<2x8x32xbf16> to vector<2x8x8xbf16>
    %381 = vector.extract_strided_slice %326 {offsets = [0, 0, 24], sizes = [2, 8, 8], strides = [1, 1, 1]} : vector<2x8x32xbf16> to vector<2x8x8xbf16>
    "tpu.trace_start"() <{level = 10 : i32, message = "bqd,bkd->bqk"}> : () -> ()
    %cst_110 = arith.constant dense<0.000000e+00> : vector<2x8x8xf32>
    %382 = tpu.matmul %380, %381, %cst_110 {dimension_numbers = #tpu.dot_dimension_numbers<[2], [2], [1], [1], [0, 0, 0, 1, 1, 1], [0], [0]>} : vector<2x8x8xbf16>, vector<2x8x8xbf16>, vector<2x8x8xf32> -> vector<2x8x8xf32>
    "tpu.trace_stop"() : () -> ()
    %cst_111 = arith.constant dense<0xFF800000> : vector<2x8xf32>
    %383 = vector.multi_reduction <maximumf>, %382, %cst_111 [2] : vector<2x8x8xf32> to vector<2x8xf32>
    %384 = vector.shape_cast %383 : vector<2x8xf32> to vector<2x8x1xf32>
    %385 = vector.broadcast %384 : vector<2x8x1xf32> to vector<2x8x8xf32>
    %386 = arith.subf %382, %385 : vector<2x8x8xf32>
    %387 = math.exp %386 : vector<2x8x8xf32>
    %cst_112 = arith.constant dense<0.000000e+00> : vector<2x8xf32>
    %388 = vector.multi_reduction <add>, %387, %cst_112 [2] : vector<2x8x8xf32> to vector<2x8xf32>
    %389 = vector.shape_cast %388 : vector<2x8xf32> to vector<2x8x1xf32>
    %390 = tpu.reciprocal %389 {approx = true} : vector<2x8x1xf32> -> vector<2x8x1xf32>
    %391 = vector.broadcast %390 : vector<2x8x1xf32> to vector<2x8x8xf32>
    %392 = arith.mulf %387, %391 : vector<2x8x8xf32>
    %393 = arith.truncf %392 : vector<2x8x8xf32> to vector<2x8x8xbf16>
    %394 = vector.extract_strided_slice %328 {offsets = [0, 0, 24], sizes = [2, 8, 8], strides = [1, 1, 1]} : vector<2x8x32xbf16> to vector<2x8x8xbf16>
    "tpu.trace_start"() <{level = 10 : i32, message = "bqk,bkd->bqd"}> : () -> ()
    %cst_113 = arith.constant dense<0.000000e+00> : vector<2x8x8xf32>
    %395 = tpu.matmul %393, %394, %cst_113 {dimension_numbers = #tpu.dot_dimension_numbers<[2], [1], [1], [2], [0, 0, 0, 1, 1, 2], [0], [0]>} : vector<2x8x8xbf16>, vector<2x8x8xbf16>, vector<2x8x8xf32> -> vector<2x8x8xf32>
    "tpu.trace_stop"() : () -> ()
    %396 = vector.shape_cast %395 : vector<2x8x8xf32> to vector<16x8xf32>
    %397 = tpu.concatenate %345, %362, %379, %396 in 1 : vector<16x8xf32>, vector<16x8xf32>, vector<16x8xf32>, vector<16x8xf32> -> vector<16x32xf32>
    %398 = arith.truncf %397 : vector<16x32xf32> to vector<16x32xbf16>
    %c304 = arith.constant 304 : index
    %c0_114 = arith.constant 0 : index
    %399 = vector.load %arg2[%c304, %c0_114] : memref<432x128xbf16, #tpu.memory_space<vmem>>, vector<32x32xbf16>
    %cst_115 = arith.constant dense<0.000000e+00> : vector<16x32xf32>
    %400 = tpu.matmul %398, %399, %cst_115 {dimension_numbers = #tpu.dot_dimension_numbers<[1], [0], [0], [1], [0, 0, 1, 1], [], []>} : vector<16x32xbf16>, vector<32x32xbf16>, vector<16x32xf32> -> vector<16x32xf32>
    %c136 = arith.constant 136 : index
    %c0_116 = arith.constant 0 : index
    %401 = vector.load %arg3[%c136, %c0_116] : memref<192x128xf32, #tpu.memory_space<vmem>>, vector<1x32xf32>
    %402 = vector.broadcast %401 : vector<1x32xf32> to vector<16x32xf32>
    %403 = arith.addf %400, %402 : vector<16x32xf32>
    %404 = arith.addf %403, %311 : vector<16x32xf32>
    %cst_117 = arith.constant dense<0.000000e+00> : vector<16xf32>
    %405 = vector.multi_reduction <add>, %404, %cst_117 [1] : vector<16x32xf32> to vector<16xf32>
    %406 = vector.shape_cast %405 : vector<16xf32> to vector<16x1xf32>
    %cst_118 = arith.constant 3.200000e+01 : f32
    %407 = vector.broadcast %cst_118 : f32 to vector<16x1xf32>
    %408 = arith.divf %406, %407 : vector<16x1xf32>
    %409 = vector.broadcast %408 : vector<16x1xf32> to vector<16x32xf32>
    %410 = arith.subf %404, %409 : vector<16x32xf32>
    %411 = arith.mulf %410, %410 : vector<16x32xf32>
    %cst_119 = arith.constant dense<0.000000e+00> : vector<16xf32>
    %412 = vector.multi_reduction <add>, %411, %cst_119 [1] : vector<16x32xf32> to vector<16xf32>
    %413 = vector.shape_cast %412 : vector<16xf32> to vector<16x1xf32>
    %cst_120 = arith.constant 3.200000e+01 : f32
    %414 = vector.broadcast %cst_120 : f32 to vector<16x1xf32>
    %415 = arith.divf %413, %414 : vector<16x1xf32>
    %cst_121 = arith.constant 9.99999996E-13 : f32
    %416 = vector.broadcast %cst_121 : f32 to vector<16x1xf32>
    %417 = arith.addf %415, %416 : vector<16x1xf32>
    %418 = math.rsqrt %417 : vector<16x1xf32>
    %419 = vector.broadcast %418 : vector<16x1xf32> to vector<16x32xf32>
    %420 = arith.mulf %410, %419 : vector<16x32xf32>
    %c144_122 = arith.constant 144 : index
    %c0_123 = arith.constant 0 : index
    %421 = vector.load %arg3[%c144_122, %c0_123] : memref<192x128xf32, #tpu.memory_space<vmem>>, vector<1x32xf32>
    %422 = vector.broadcast %421 : vector<1x32xf32> to vector<16x32xf32>
    %423 = arith.mulf %420, %422 : vector<16x32xf32>
    %c152 = arith.constant 152 : index
    %c0_124 = arith.constant 0 : index
    %424 = vector.load %arg3[%c152, %c0_124] : memref<192x128xf32, #tpu.memory_space<vmem>>, vector<1x32xf32>
    %425 = vector.broadcast %424 : vector<1x32xf32> to vector<16x32xf32>
    %426 = arith.addf %423, %425 : vector<16x32xf32>
    %427 = arith.truncf %426 : vector<16x32xf32> to vector<16x32xbf16>
    %c336 = arith.constant 336 : index
    %c0_125 = arith.constant 0 : index
    %428 = vector.load %arg2[%c336, %c0_125] : memref<432x128xbf16, #tpu.memory_space<vmem>>, vector<32x64xbf16>
    %cst_126 = arith.constant dense<0.000000e+00> : vector<16x64xf32>
    %429 = tpu.matmul %427, %428, %cst_126 {dimension_numbers = #tpu.dot_dimension_numbers<[1], [0], [0], [1], [0, 0, 1, 1], [], []>} : vector<16x32xbf16>, vector<32x64xbf16>, vector<16x64xf32> -> vector<16x64xf32>
    %c160 = arith.constant 160 : index
    %c0_127 = arith.constant 0 : index
    %430 = vector.load %arg3[%c160, %c0_127] : memref<192x128xf32, #tpu.memory_space<vmem>>, vector<1x64xf32>
    %431 = vector.broadcast %430 : vector<1x64xf32> to vector<16x64xf32>
    %432 = arith.addf %429, %431 : vector<16x64xf32>
    %cst_128 = arith.constant 5.000000e-01 : f32
    %433 = vector.broadcast %cst_128 : f32 to vector<16x64xf32>
    %434 = arith.mulf %433, %432 : vector<16x64xf32>
    %cst_129 = arith.constant 4.471500e-02 : f32
    %435 = vector.broadcast %cst_129 : f32 to vector<16x64xf32>
    %436 = arith.mulf %435, %432 : vector<16x64xf32>
    %437 = arith.mulf %436, %432 : vector<16x64xf32>
    %438 = arith.mulf %437, %432 : vector<16x64xf32>
    %439 = arith.addf %432, %438 : vector<16x64xf32>
    %cst_130 = arith.constant 0.797884583 : f32
    %440 = vector.broadcast %cst_130 : f32 to vector<16x64xf32>
    %441 = arith.mulf %440, %439 : vector<16x64xf32>
    %442 = math.tanh %441 : vector<16x64xf32>
    %cst_131 = arith.constant 1.000000e+00 : f32
    %443 = vector.broadcast %cst_131 : f32 to vector<16x64xf32>
    %444 = arith.addf %443, %442 : vector<16x64xf32>
    %445 = arith.mulf %434, %444 : vector<16x64xf32>
    %446 = arith.truncf %445 : vector<16x64xf32> to vector<16x64xbf16>
    %c368 = arith.constant 368 : index
    %c0_132 = arith.constant 0 : index
    %447 = vector.load %arg2[%c368, %c0_132] : memref<432x128xbf16, #tpu.memory_space<vmem>>, vector<64x32xbf16>
    %cst_133 = arith.constant dense<0.000000e+00> : vector<16x32xf32>
    %448 = tpu.matmul %446, %447, %cst_133 {dimension_numbers = #tpu.dot_dimension_numbers<[1], [0], [0], [1], [0, 0, 1, 1], [], []>} : vector<16x64xbf16>, vector<64x32xbf16>, vector<16x32xf32> -> vector<16x32xf32>
    %c168 = arith.constant 168 : index
    %c0_134 = arith.constant 0 : index
    %449 = vector.load %arg3[%c168, %c0_134] : memref<192x128xf32, #tpu.memory_space<vmem>>, vector<1x32xf32>
    %450 = vector.broadcast %449 : vector<1x32xf32> to vector<16x32xf32>
    %451 = arith.addf %448, %450 : vector<16x32xf32>
    %452 = arith.addf %451, %426 : vector<16x32xf32>
    %cst_135 = arith.constant dense<0.000000e+00> : vector<16xf32>
    %453 = vector.multi_reduction <add>, %452, %cst_135 [1] : vector<16x32xf32> to vector<16xf32>
    %454 = vector.shape_cast %453 : vector<16xf32> to vector<16x1xf32>
    %cst_136 = arith.constant 3.200000e+01 : f32
    %455 = vector.broadcast %cst_136 : f32 to vector<16x1xf32>
    %456 = arith.divf %454, %455 : vector<16x1xf32>
    %457 = vector.broadcast %456 : vector<16x1xf32> to vector<16x32xf32>
    %458 = arith.subf %452, %457 : vector<16x32xf32>
    %459 = arith.mulf %458, %458 : vector<16x32xf32>
    %cst_137 = arith.constant dense<0.000000e+00> : vector<16xf32>
    %460 = vector.multi_reduction <add>, %459, %cst_137 [1] : vector<16x32xf32> to vector<16xf32>
    %461 = vector.shape_cast %460 : vector<16xf32> to vector<16x1xf32>
    %cst_138 = arith.constant 3.200000e+01 : f32
    %462 = vector.broadcast %cst_138 : f32 to vector<16x1xf32>
    %463 = arith.divf %461, %462 : vector<16x1xf32>
    %cst_139 = arith.constant 9.99999996E-13 : f32
    %464 = vector.broadcast %cst_139 : f32 to vector<16x1xf32>
    %465 = arith.addf %463, %464 : vector<16x1xf32>
    %466 = math.rsqrt %465 : vector<16x1xf32>
    %467 = vector.broadcast %466 : vector<16x1xf32> to vector<16x32xf32>
    %468 = arith.mulf %458, %467 : vector<16x32xf32>
    %c176_140 = arith.constant 176 : index
    %c0_141 = arith.constant 0 : index
    %469 = vector.load %arg3[%c176_140, %c0_141] : memref<192x128xf32, #tpu.memory_space<vmem>>, vector<1x32xf32>
    %470 = vector.broadcast %469 : vector<1x32xf32> to vector<16x32xf32>
    %471 = arith.mulf %468, %470 : vector<16x32xf32>
    %c184 = arith.constant 184 : index
    %c0_142 = arith.constant 0 : index
    %472 = vector.load %arg3[%c184, %c0_142] : memref<192x128xf32, #tpu.memory_space<vmem>>, vector<1x32xf32>
    %473 = vector.broadcast %472 : vector<1x32xf32> to vector<16x32xf32>
    %474 = arith.addf %471, %473 : vector<16x32xf32>
    %c0_143 = arith.constant 0 : index
    %c0_144 = arith.constant 0 : index
    %475 = vector.load %arg4[%c0_143, %c0_144] : memref<16x32xf32, #tpu.memory_space<vmem>>, vector<16x32xf32>
    tpu.vector_store %arg4[%c0_143, %c0_144], %474 {strides = array<i32>} : memref<16x32xf32, #tpu.memory_space<vmem>>, vector<16x32xf32>,
    return
  }
  func.func @transform_0(%arg0: i32) -> (i32, i32, i32) {
    %c0_i32 = arith.constant 0 : i32
    %c0_i32_0 = arith.constant 0 : i32
    %c0_i32_1 = arith.constant 0 : i32
    return %arg0, %c0_i32, %c0_i32_0 : i32, i32, i32
  }
  func.func @transform_1(%arg0: i32) -> (i32, i32) {
    %c0_i32 = arith.constant 0 : i32
    %c0_i32_0 = arith.constant 0 : i32
    %c0_i32_1 = arith.constant 0 : i32
    return %c0_i32, %c0_i32_0 : i32, i32
  }
  func.func @transform_2(%arg0: i32) -> (i32, i32) {
    %c0_i32 = arith.constant 0 : i32
    %c0_i32_0 = arith.constant 0 : i32
    %c0_i32_1 = arith.constant 0 : i32
    return %c0_i32, %c0_i32_0 : i32, i32
  }
  func.func @transform_3(%arg0: i32) -> (i32, i32) {
    %c0_i32 = arith.constant 0 : i32
    %c0_i32_0 = arith.constant 0 : i32
    return %arg0, %c0_i32 : i32, i32
  }
}

</mosaic_0001>

<bundles_post_ra>
// kernel: perceiver_resampler_forward.1
= control target key start
LH: loop header
LB: loop body
LE: loop exit
PB: predicated region body
PF: predicated region fallthrough
CT: control target
= control target key end

     0   :  { %8 = vsyncpa [#allocation3], 0  ;;  %s5503_s0 = inlined_call_operand.hbm [shape: f32[2,16,48], index: 0, kind: input, shape index: {}]   ;;  %s5504_s1 = inlined_call_operand.hbm [shape: bf16[432,128], index: 1, kind: input, shape index: {}]   ;;  %s5505_s2 = inlined_call_operand.hbm [shape: f32[192,128], index: 2, kind: input, shape index: {}]   ;;  %s5506_s3 = inlined_call_operand.vmem [shape: f32[16,32], index: 3, kind: output, shape index: {}]  }
   0x1   :  { %9 = vsyncpa [#allocation5], 0  ;;  %s4804_s12 = smov [#allocation4]   ;;  %s4734_s16 = scalar_lea.hbm %s5504_s1, 3456 }
   0x2   :  { %s27_s13 = sshll.u32 %s4804_s12, 4  ;;  %p4735_p0 = scmp.ne.s32.totalorder %s5504_s1, %s4734_s16  ;;  %s28_s13 = int_to_ptr.vmem [resolvable:$true] %s27_s13 }
   0x3   :  { %p4738_p1 = scmp.lt.u32.totalorder %s4734_s16, %s5504_s1 }
   0x5   :  { %p4740_p2 = pnand %p4738_p1, %p4735_p0 }
   0x7   :  { %4743 = shalt.err (!%p4740_p2)
}
   0x8   :  { %s4744_s21 = scalar_lea.vmem %s28_s13, 3456  ;;  %p4749_p4 = scmp.lt.s32.totalorder %s28_s13, %s28_s13 }
   0x9   :  { %p4745_p3 = scmp.ne.s32.totalorder %s28_s13, %s4744_s21  ;;  %p4750_p5 = scmp.lt.s32.totalorder %s4744_s21, %s4744_s21 }
   0xb   :  { %p4751_p6 = por %p4750_p5, %p4749_p4 }
   0xd   :  { %p4752_p7 = pnand %p4751_p6, %p4745_p3 }
   0xf   :  { %4755 = shalt.err (!%p4752_p7)
}
  0x10   :  { %s4805_s22 = smov 64   ;;  %s4806_s23 = smov 4  }
  0x11   :  { %33 = dma.hbm_to_vmem [thread:$0]  %s5504_s1, 3456, %s28_s13, [#allocation5], %s4805_s22, %s4805_s22, %s4806_s23  }
  0x12   :  { %s4807_s26 = smov [#allocation2]   ;;  %s4756_s30 = scalar_lea.hbm %s5503_s0, 512 }
  0x13   :  { %s15_s27 = sshll.u32 %s4807_s26, 4  ;;  %p4757_p8 = scmp.ne.s32.totalorder %s5503_s0, %s4756_s30  ;;  %s16_s27 = int_to_ptr.vmem [resolvable:$true] %s15_s27 }
  0x14   :  { %p4760_p9 = scmp.lt.u32.totalorder %s4756_s30, %s5503_s0 }
  0x16   :  { %p4762_p10 = pnand %p4760_p9, %p4757_p8 }
  0x18   :  { %4765 = shalt.err (!%p4762_p10)
}
  0x19   :  { %s4766_s8 = scalar_lea.vmem %s16_s27, 512  ;;  %p4771_p12 = scmp.lt.s32.totalorder %s16_s27, %s16_s27 }
  0x1a   :  { %p4767_p11 = scmp.ne.s32.totalorder %s16_s27, %s4766_s8  ;;  %p4772_p13 = scmp.lt.s32.totalorder %s4766_s8, %s4766_s8 }
  0x1c   :  { %p4773_p0 = por %p4772_p13, %p4771_p12 }
  0x1e   :  { %p4774_p1 = pnand %p4773_p0, %p4767_p11 }
  0x20   :  { %4777 = shalt.err (!%p4774_p1)
}
  0x21   :  { %s4808_s1 = smov 128   ;;  %s4809_s9 = smov 8  }
  0x22   :  { %21 = dma.hbm_to_vmem [thread:$0]  %s5503_s0, 512, %s16_s27, [#allocation3], %s4808_s1, %s4808_s1, %s4809_s9  }
  0x23   :  { %s4810_s12 = smov [#allocation6]   ;;  %s4778_s16 = scalar_lea.hbm %s5505_s2, 3072 }
  0x24   :  { %s39_s13 = sshll.u32 %s4810_s12, 4  ;;  %p4779_p2 = scmp.ne.s32.totalorder %s5505_s2, %s4778_s16  ;;  %s40_s13 = int_to_ptr.vmem [resolvable:$true] %s39_s13 }
  0x25   :  { %p4782_p3 = scmp.lt.u32.totalorder %s4778_s16, %s5505_s2 }
  0x27   :  { %p4784_p4 = pnand %p4782_p3, %p4779_p2 }
  0x29   :  { %4787 = shalt.err (!%p4784_p4)
}
  0x2a   :  { %s4788_s21 = scalar_lea.vmem %s40_s13, 3072  ;;  %p4793_p6 = scmp.lt.s32.totalorder %s40_s13, %s40_s13 }
  0x2b   :  { %p4789_p5 = scmp.ne.s32.totalorder %s40_s13, %s4788_s21  ;;  %p4794_p7 = scmp.lt.s32.totalorder %s4788_s21, %s4788_s21 }
  0x2d   :  { %p4795_p8 = por %p4794_p7, %p4793_p6 }
  0x2f   :  { %p4796_p9 = pnand %p4795_p8, %p4789_p5 }
  0x31   :  { %4799 = shalt.err (!%p4796_p9)
}
  0x32   :  { %45 = dma.hbm_to_vmem [thread:$0]  %s5505_s2, 3072, %s40_s13, [#allocation5], %s4808_s1, %s4808_s1, %s4809_s9  }
  0x33   :  { %4800 = dma.done.wait [#allocation3], 512  }
  0x34   :  { %4801 = vsyncadd [#allocation3], 4294966784 }
  0x35   :  { %4802 = dma.done.wait [#allocation5], 6528  }
  0x36   :  { %4803 = vsyncadd [#allocation5], 4294960768  ;;  %vm61_vm0 = vcmask 261120   ;;  %v60_v0 = vld [vmem:[#allocation6] sm:$0xff]  ;;  %v4581_v7 = vld [vmem:[#allocation4] sm:$0xff]   ;;  %v4811_v8 = vmov 0.0  }
  0x37   :  { %v62_v1 = vsel %vm61_vm0, %v60_v0, 0.0  ;;  %4129 = vmatprep.subr.bf16.mxu0 %v4811_v8  ;;  %4149 = vmatprep.subr.bf16.mxu1 %v4811_v8  ;;  %v4582_v9 = vld [vmem:[#allocation4 + $0x8] sm:$0xff]   ;;  %vm4812_vm1 = vmmov 0   ;;  %v3864_v14 = vld [vmem:[#allocation6 + $0x8] ss:$0 sm:$0xff]  ;;  %s4813_s2 = smov 96  }
  0x38   :  { %63 = vadd.xlane.f32.xlu0 %v62_v1  ;;  %4130 = vmatpush3.bf16.msra.mxu0 %v4581_v7  ;;  %v3865_v16 = vld [vmem:[#allocation6 + $0x10] ss:$0 sm:$0xff]  ;;  %v3866_v20 = vld [vmem:[#allocation6 + $0x18] ss:$0 sm:$0xff]  ;;  %vm169_vm2 = vcmask 64512   ;;  %s4814_s24 = smov 88  }
  0x39   :  { %4133 = vmatprep.mubr.msk.bf16.mxu0 %vm4812_vm1, %v4811_v8  ;;  %4131 = vmatprep.subr.bf16.mxu0 %v4811_v8  ;;  %vm294_vm3 = vcmask 1043456   ;;  %s4815_s25 = smov 120   ;;  %s4816_s26 = smov 56   ;;  %vm1072_vm4 = vcmask 130048   ;;  %vm1075_vm5 = vcmask 195584   ;;  %vm1283_vm6 = vcmask 392192  }
  0x3a   :  { %4151 = vmatprep.mubr.msk.bf16.mxu1 %vm4812_vm1, %v4811_v8  ;;  %s4817_s27 = smov 80   ;;  %s4818_s28 = smov 112   ;;  %vm2467_vm7 = vcmask 523264  }
  0x3b   :  { %s4819_s29 = smov 48   ;;  %s4820_s30 = smov 72  }
  0x3c   :  { %4132 = vmatpush3.bf16.msra.mxu0 %v4582_v9  ;;  %s4821_s4 = smov 104   ;;  %s4822_s5 = smov 40  }
  0x3d   :  { %4137 = vmatprep.subr.bf16.mxu0 %v4811_v8  ;;  %s4823_s6 = smov 16   ;;  %s4824_s7 = smov 24  }
  0xc5   :  { %v64_v2 = vpop.xlane.xlu0 %63 }
  0xc6   :  { %v66_v3 = vmul.f32 0.03125, %v64_v2 }
  0xc8   :  { %v67_v4 = vsub.f32 %v60_v0, %v66_v3 }
  0xca   :  { %v68_v5 = vmul.f32 %v67_v4, %v67_v4 }
  0xcc   :  { %v69_v6 = vsel %vm61_vm0, %v68_v5, 0.0 }
  0xcd   :  { %70 = vadd.xlane.f32.xlu0 %v69_v6 }
 0x15a   :  { %v71_v10 = vpop.xlane.xlu0 %70 }
 0x15b   :  { %v72_v11 = vmul.f32 0.03125, %v71_v10 }
 0x15d   :  { %v73_v12 = vadd.f32 1e-12, %v72_v11 }
 0x15f   :  { %4608 = vrsqrt.f32 %v73_v12 }
 0x169   :  { %v4609_v13 = vpop.eup %4608 }
 0x16a   :  { %v75_v15 = vmul.f32 %v4609_v13, %v67_v4 }
 0x16c   :  { %v81_v17 = vmul.f32 %v3864_v14, %v75_v15 }
 0x16e   :  { %v4895_v18 = vadd.f32 %v3865_v16, %v81_v17 }
 0x170   :  { %v88_v19 = vpack.c.bf16 %v4895_v18, %v4895_v18 }
 0x172   :  { %4134 = vmatmul.mubr.msk.bf16.vlgmr.msra.gmra.mrb[0].mxu0 %vm61_vm0, %v88_v19 }
 0x173   :  { %4139 = vmatprep.mubr.msk.bf16.mxu0 %vm4812_vm1, %v4811_v8 }
 0x245   :  { %v147_v21 = vpop.f32.mrb[0].mxu0 }
 0x246   :  { %v148_v22 = vadd.f32 %v3866_v20, %v147_v21  ;;  %v4135_v23 = vpop.f32.mrb[1].mxu0 }
 0x247   :  { %v150_v24 = vpop.f32.mrb[2].mxu0 }
 0x248   :  { %v4902_v25 = vpack.c.bf16 %v148_v22, %v148_v22  ;;  %v151_v26 = vadd.f32 %v3866_v20, %v150_v24  ;;  %v4136_v27 = vpop.f32.mrb[3].mxu0  ;;  %v154_v31 = vmul.f32 0.35355338, %v148_v22 }
 0x24a   :  { %167 = vrot.lane.b32.xlu1 %v4902_v25, %s4813_s2  ;;  %v4906_v28 = vpack.c.bf16 %v151_v26, %v151_v26  ;;  %v4912_v33 = vpack.c.bf16 %v154_v31, %v154_v31  ;;  %v155_v35 = vmul.f32 0.35355338, %v151_v26 }
 0x24c   :  { %v4920_v36 = vpack.c.bf16 %v155_v35, %v155_v35 }
 0x24e   :  { %217 = vrot.lane.b32.xlu1 %v4906_v28, %s4813_s2 }
 0x2bc   :  { %v168_v29 = vpop.permute.xlu1 %167 }
 0x2bd   :  { %v174_v30 = vsel %vm169_vm2, %v168_v29, 0 }
 0x2be   :  { %4138 = vmatpush3.bf16.xpose.msra.mxu0 %v174_v30 }
 0x2bf   :  { %4143 = vmatprep.subr.bf16.mxu0 %v4811_v8 }
 0x2c0   :  { %v218_v32 = vpop.permute.xlu1 %217 }
 0x2c1   :  { %v223_v34 = vsel %vm169_vm2, %v218_v32, 0 }
 0x2c5   :  { %4140 = vmatmul.mubr.msk.bf16.vlgmr.msra.gmra.mrb[4].mxu0 %vm169_vm2, %v4912_v33 }
 0x2c6   :  { %4144 = vmatpush3.bf16.xpose.msra.mxu0 %v223_v34  ;;  %4145 = vmatprep.mubr.msk.bf16.mxu0 %vm4812_vm1, %v4811_v8 }
 0x2c7   :  { %4155 = vmatprep.subr.bf16.mxu0 %v4811_v8 }
 0x2cd   :  { %4146 = vmatmul.mubr.msk.bf16.vlgmr.msra.gmra.mrb[8].mxu0 %vm169_vm2, %v4920_v36 }
 0x2ce   :  { %4157 = vmatprep.mubr.msk.bf16.mxu0 %vm4812_vm1, %v4811_v8 }
 0x398   :  { %v210_v37 = vpop.f32.mrb[4].mxu0 }
 0x399   :  { %v4141_v38 = vpop.f32.mrb[5].mxu0  ;;  %v265_v39 = vsel %vm169_vm2, %v210_v37, -inf }
 0x39a   :  { %266 = vmax.xlane.f32.xlu0 %v265_v39  ;;  %v213_v40 = vpop.f32.mrb[6].mxu0 }
 0x39b   :  { %v4142_v41 = vpop.f32.mrb[7].mxu0 }
 0x3a0   :  { %v259_v42 = vpop.f32.mrb[8].mxu0 }
 0x3a1   :  { %v4147_v43 = vpop.f32.mrb[9].mxu0  ;;  %v268_v44 = vsel %vm169_vm2, %v259_v42, -inf }
 0x3a2   :  { %269 = vmax.xlane.f32.xlu1 %v268_v44  ;;  %v262_v45 = vpop.f32.mrb[10].mxu0 }
 0x3a3   :  { %v4148_v46 = vpop.f32.mrb[11].mxu0 }
 0x3b0   :  { %289 = vrot.lane.b32.xlu0 %v4902_v25, %s4805_s22 }
 0x3b3   :  { %388 = vrot.lane.b32.xlu1 %v4902_v25, %s4814_s24 }
 0x3b4   :  { %338 = vrot.lane.b32.xlu0 %v4906_v28, %s4805_s22 }
 0x427   :  { %v267_v47 = vpop.xlane.xlu0 %266 }
 0x428   :  { %v271_v48 = vsub.f32 %v210_v37, %v267_v47 }
 0x42a   :  { %v273_v49 = vmul.f32 1.442695, %v271_v48 }
 0x42b   :  { %v290_v50 = vpop.permute.xlu0 %289 }
 0x42c   :  { %4610 = vpow2.f32 %v273_v49  ;;  %v296_v51 = vsel %vm294_vm3, %v290_v50, 0 }
 0x42d   :  { %4150 = vmatpush3.bf16.msra.mxu1 %v296_v51 }
 0x42e   :  { %4161 = vmatprep.subr.bf16.mxu1 %v4811_v8 }
 0x42f   :  { %v339_v52 = vpop.permute.xlu0 %338  ;;  %v270_v53 = vpop.xlane.xlu1 %269 }
 0x430   :  { %v344_v54 = vsel %vm294_vm3, %v339_v52, 0  ;;  %v272_v55 = vsub.f32 %v259_v42, %v270_v53 }
 0x431   :  { %4156 = vmatpush3.bf16.msra.mxu0 %v344_v54 }
 0x432   :  { %v275_v56 = vmul.f32 1.442695, %v272_v55  ;;  %4167 = vmatprep.subr.bf16.mxu0 %v4811_v8 }
 0x433   :  { %v389_v1 = vpop.permute.xlu1 %388 }
 0x434   :  { %4612 = vpow2.f32 %v275_v56  ;;  %v394_v3 = vsel %vm169_vm2, %v389_v1, 0 }
 0x436   :  { %v4611_v57 = vpop.eup %4610 }
 0x437   :  { %v277_v58 = vsel %vm169_vm2, %v4611_v57, 0.0 }
 0x438   :  { %278 = vadd.xlane.f32.xlu0 %v277_v58 }
 0x43e   :  { %v4613_v59 = vpop.eup %4612 }
 0x43f   :  { %v280_v60 = vsel %vm169_vm2, %v4613_v59, 0.0 }
 0x440   :  { %281 = vadd.xlane.f32.xlu0 %v280_v60 }
 0x456   :  { %438 = vrot.lane.b32.xlu0 %v4906_v28, %s4814_s24 }
 0x45a   :  { %386 = vrot.lane.b32.xlu0 %v4912_v33, %s4815_s25 }
 0x45e   :  { %436 = vrot.lane.b32.xlu0 %v4920_v36, %s4815_s25 }
 0x4c5   :  { %v279_v61 = vpop.xlane.xlu0 %278 }
 0x4c6   :  { %4614 = vrcp.f32 %v279_v61 }
 0x4cd   :  { %v282_v62 = vpop.xlane.xlu0 %281 }
 0x4ce   :  { %4616 = vrcp.f32 %v282_v62 }
 0x4d0   :  { %v4615_v63 = vpop.eup %4614 }
 0x4d1   :  { %v285_v0 = vmul.f32 %v4615_v63, %v4611_v57  ;;  %v439_v4 = vpop.permute.xlu0 %438 }
 0x4d2   :  { %v444_v10 = vsel %vm169_vm2, %v439_v4, 0 }
 0x4d3   :  { %v287_v2 = vpack.c.bf16 %v285_v0, %v285_v0 }
 0x4d5   :  { %4152 = vmatmul.mubr.msk.bf16.vlgmr.msra.gmra.mrb[0].mxu1 %vm169_vm2, %v287_v2  ;;  %v387_v9 = vpop.permute.xlu0 %386 }
 0x4d6   :  { %4162 = vmatpush3.bf16.xpose.msra.mxu1 %v394_v3  ;;  %4163 = vmatprep.mubr.msk.bf16.mxu1 %vm4812_vm1, %v4811_v8 }
 0x4d7   :  { %4173 = vmatprep.subr.bf16.mxu1 %v4811_v8 }
 0x4d8   :  { %v4617_v5 = vpop.eup %4616 }
 0x4d9   :  { %v286_v6 = vmul.f32 %v4617_v5, %v4613_v59  ;;  %v437_v11 = vpop.permute.xlu0 %436 }
 0x4db   :  { %v288_v7 = vpack.c.bf16 %v286_v6, %v286_v6 }
 0x4dd   :  { %4158 = vmatmul.mubr.msk.bf16.vlgmr.msra.gmra.mrb[12].mxu0 %vm169_vm2, %v288_v7  ;;  %4164 = vmatmul.mubr.msk.bf16.vlgmr.msra.gmra.mrb[4].mxu1 %vm169_vm2, %v387_v9 }
 0x4de   :  { %4168 = vmatpush3.bf16.xpose.msra.mxu0 %v444_v10  ;;  %4169 = vmatprep.mubr.msk.bf16.mxu0 %vm4812_vm1, %v4811_v8 }
 0x4df   :  { %4179 = vmatprep.subr.bf16.mxu0 %v4811_v8  ;;  %4175 = vmatprep.mubr.msk.bf16.mxu1 %vm4812_vm1, %v4811_v8 }
 0x4e5   :  { %4170 = vmatmul.mubr.msk.bf16.vlgmr.msra.gmra.mrb[16].mxu0 %vm169_vm2, %v437_v11 }
 0x4e6   :  { %4181 = vmatprep.mubr.msk.bf16.mxu0 %vm4812_vm1, %v4811_v8 }
 0x5a8   :  { %v4962_v12 = vpop.f32.mrb[0].mxu1 }
 0x5a9   :  { %v4153_v13 = vpop.f32.mrb[1].mxu1 }
 0x5aa   :  { %v335_v14 = vpop.f32.mrb[2].mxu1 }
 0x5ab   :  { %v4154_v15 = vpop.f32.mrb[3].mxu1 }
 0x5b0   :  { %v4964_v16 = vpop.f32.mrb[12].mxu0  ;;  %v430_v17 = vpop.f32.mrb[4].mxu1 }
 0x5b1   :  { %v4159_v19 = vpop.f32.mrb[13].mxu0  ;;  %v4165_v20 = vpop.f32.mrb[5].mxu1  ;;  %v486_v21 = vsel %vm169_vm2, %v430_v17, -inf }
 0x5b2   :  { %487 = vmax.xlane.f32.xlu0 %v486_v21  ;;  %v383_v22 = vpop.f32.mrb[14].mxu0  ;;  %v433_v23 = vpop.f32.mrb[6].mxu1 }
 0x5b3   :  { %v4160_v24 = vpop.f32.mrb[15].mxu0  ;;  %v4166_v26 = vpop.f32.mrb[7].mxu1 }
 0x5b8   :  { %v480_v27 = vpop.f32.mrb[16].mxu0 }
 0x5b9   :  { %v4171_v29 = vpop.f32.mrb[17].mxu0  ;;  %v489_v30 = vsel %vm169_vm2, %v480_v27, -inf }
 0x5ba   :  { %490 = vmax.xlane.f32.xlu1 %v489_v30  ;;  %v483_v31 = vpop.f32.mrb[18].mxu0 }
 0x5bb   :  { %v4172_v32 = vpop.f32.mrb[19].mxu0 }
 0x5cb   :  { %558 = vrot.lane.b32.xlu1 %v4906_v28, %s4816_s26 }
 0x5cf   :  { %608 = vrot.lane.b32.xlu1 %v4902_v25, %s4817_s27 }
 0x5d3   :  { %658 = vrot.lane.b32.xlu1 %v4906_v28, %s4817_s27 }
 0x5d7   :  { %656 = vrot.lane.b32.xlu1 %v4920_v36, %s4818_s28 }
 0x63f   :  { %v488_v34 = vpop.xlane.xlu0 %487 }
 0x640   :  { %v492_v35 = vsub.f32 %v430_v17, %v488_v34 }
 0x642   :  { %v494_v37 = vmul.f32 1.442695, %v492_v35 }
 0x644   :  { %4618 = vpow2.f32 %v494_v37 }
 0x647   :  { %v491_v38 = vpop.xlane.xlu1 %490 }
 0x648   :  { %v493_v39 = vsub.f32 %v480_v27, %v491_v38 }
 0x64a   :  { %v496_v40 = vmul.f32 1.442695, %v493_v39 }
 0x64b   :  { %v559_v41 = vpop.permute.xlu1 %558 }
 0x64c   :  { %4620 = vpow2.f32 %v496_v40  ;;  %v564_v42 = vsel %vm294_vm3, %v559_v41, 0 }
 0x64d   :  { %4180 = vmatpush3.bf16.msra.mxu0 %v564_v42 }
 0x64e   :  { %v4619_v43 = vpop.eup %4618  ;;  %4191 = vmatprep.subr.bf16.mxu0 %v4811_v8 }
 0x64f   :  { %v498_v44 = vsel %vm169_vm2, %v4619_v43, 0.0  ;;  %v609_v54 = vpop.permute.xlu1 %608 }
 0x650   :  { %499 = vadd.xlane.f32.xlu0 %v498_v44  ;;  %v614_v58 = vsel %vm169_vm2, %v609_v54, 0 }
 0x653   :  { %v659_v57 = vpop.permute.xlu1 %658 }
 0x654   :  { %v664_v60 = vsel %vm169_vm2, %v659_v57, 0 }
 0x656   :  { %v4621_v45 = vpop.eup %4620 }
 0x657   :  { %v501_v46 = vsel %vm169_vm2, %v4621_v45, 0.0  ;;  %v657_v62 = vpop.permute.xlu1 %656 }
 0x658   :  { %502 = vadd.xlane.f32.xlu0 %v501_v46 }
 0x66e   :  { %510 = vrot.lane.b32.xlu0 %v4902_v25, %s4816_s26 }
 0x672   :  { %606 = vrot.lane.b32.xlu0 %v4912_v33, %s4818_s28 }
 0x6dd   :  { %v500_v47 = vpop.xlane.xlu0 %499 }
 0x6de   :  { %4622 = vrcp.f32 %v500_v47 }
 0x6e5   :  { %v503_v48 = vpop.xlane.xlu0 %502 }
 0x6e6   :  { %4624 = vrcp.f32 %v503_v48 }
 0x6e8   :  { %v4623_v49 = vpop.eup %4622 }
 0x6e9   :  { %v511_v50 = vpop.permute.xlu0 %510  ;;  %v506_v51 = vmul.f32 %v4623_v49, %v4619_v43 }
 0x6ea   :  { %v516_v52 = vsel %vm294_vm3, %v511_v50, 0 }
 0x6eb   :  { %4174 = vmatpush3.bf16.msra.mxu1 %v516_v52  ;;  %v508_v53 = vpack.c.bf16 %v506_v51, %v506_v51 }
 0x6ec   :  { %4185 = vmatprep.subr.bf16.mxu1 %v4811_v8 }
 0x6ed   :  { %v607_v61 = vpop.permute.xlu0 %606 }
 0x6ee   :  { %4176 = vmatmul.mubr.msk.bf16.vlgmr.msra.gmra.mrb[8].mxu1 %vm169_vm2, %v508_v53 }
 0x6ef   :  { %4187 = vmatprep.mubr.msk.bf16.mxu1 %vm4812_vm1, %v4811_v8 }
 0x6f0   :  { %v4625_v55 = vpop.eup %4624 }
 0x6f1   :  { %v507_v56 = vmul.f32 %v4625_v55, %v4621_v45 }
 0x6f3   :  { %v509_v59 = vpack.c.bf16 %v507_v56, %v507_v56 }
 0x6f4   :  { %4186 = vmatpush3.bf16.xpose.msra.mxu1 %v614_v58 }
 0x6f5   :  { %4182 = vmatmul.mubr.msk.bf16.vlgmr.msra.gmra.mrb[20].mxu0 %vm169_vm2, %v509_v59  ;;  %4197 = vmatprep.subr.bf16.mxu1 %v4811_v8 }
 0x6f6   :  { %4192 = vmatpush3.bf16.xpose.msra.mxu0 %v664_v60  ;;  %4193 = vmatprep.mubr.msk.bf16.mxu0 %vm4812_vm1, %v4811_v8 }
 0x6f7   :  { %4203 = vmatprep.subr.bf16.mxu0 %v4811_v8 }
 0x6fb   :  { %4188 = vmatmul.mubr.msk.bf16.vlgmr.msra.gmra.mrb[12].mxu1 %vm169_vm2, %v607_v61 }
 0x6fc   :  { %4199 = vmatprep.mubr.msk.bf16.mxu1 %vm4812_vm1, %v4811_v8 }
 0x6fd   :  { %4194 = vmatmul.mubr.msk.bf16.vlgmr.msra.gmra.mrb[24].mxu0 %vm169_vm2, %v657_v62 }
 0x6fe   :  { %4205 = vmatprep.mubr.msk.bf16.mxu0 %vm4812_vm1, %v4811_v8 }
 0x7c1   :  { %v5002_v63 = vpop.f32.mrb[8].mxu1 }
 0x7c2   :  { %v4177_v0 = vpop.f32.mrb[9].mxu1 }
 0x7c3   :  { %v555_v1 = vpop.f32.mrb[10].mxu1 }
 0x7c4   :  { %v4178_v2 = vpop.f32.mrb[11].mxu1 }
 0x7c8   :  { %v5004_v3 = vpop.f32.mrb[20].mxu0 }
 0x7c9   :  { %v4536_v4 = vpack.i.bf16 %v5004_v3, %v5002_v63  ;;  %v4183_v5 = vpop.f32.mrb[21].mxu0 }
 0x7ca   :  { %v603_v6 = vpop.f32.mrb[22].mxu0 }
 0x7cb   :  { %v4184_v7 = vpop.f32.mrb[23].mxu0 }
 0x7ce   :  { %v650_v9 = vpop.f32.mrb[12].mxu1 }
 0x7cf   :  { %v4189_v10 = vpop.f32.mrb[13].mxu1  ;;  %v706_v11 = vsel %vm169_vm2, %v650_v9, -inf }
 0x7d0   :  { %707 = vmax.xlane.f32.xlu0 %v706_v11  ;;  %v653_v13 = vpop.f32.mrb[14].mxu1  ;;  %v700_v14 = vpop.f32.mrb[24].mxu0 }
 0x7d1   :  { %v4190_v15 = vpop.f32.mrb[15].mxu1  ;;  %v4195_v17 = vpop.f32.mrb[25].mxu0  ;;  %v709_v19 = vsel %vm169_vm2, %v700_v14, -inf }
 0x7d2   :  { %710 = vmax.xlane.f32.xlu1 %v709_v19  ;;  %v703_v20 = vpop.f32.mrb[26].mxu0 }
 0x7d3   :  { %v4196_v21 = vpop.f32.mrb[27].mxu0 }
 0x7e3   :  { %778 = vrot.lane.b32.xlu1 %v4906_v28, %s4819_s29 }
 0x7e7   :  { %828 = vrot.lane.b32.xlu1 %v4902_v25, %s4820_s30 }
 0x7eb   :  { %878 = vrot.lane.b32.xlu1 %v4906_v28, %s4820_s30 }
 0x7ef   :  { %876 = vrot.lane.b32.xlu1 %v4920_v36, %s4821_s4 }
 0x85d   :  { %v708_v22 = vpop.xlane.xlu0 %707 }
 0x85e   :  { %v712_v23 = vsub.f32 %v650_v9, %v708_v22 }
 0x85f   :  { %v711_v24 = vpop.xlane.xlu1 %710 }
 0x860   :  { %v714_v26 = vmul.f32 1.442695, %v712_v23  ;;  %v713_v27 = vsub.f32 %v700_v14, %v711_v24 }
 0x862   :  { %4626 = vpow2.f32 %v714_v26  ;;  %v716_v29 = vmul.f32 1.442695, %v713_v27 }
 0x863   :  { %v779_v30 = vpop.permute.xlu1 %778 }
 0x864   :  { %4628 = vpow2.f32 %v716_v29  ;;  %v784_v31 = vsel %vm294_vm3, %v779_v30, 0 }
 0x865   :  { %4204 = vmatpush3.bf16.msra.mxu0 %v784_v31 }
 0x866   :  { %4215 = vmatprep.subr.bf16.mxu0 %v4811_v8 }
 0x867   :  { %v829_v42 = vpop.permute.xlu1 %828 }
 0x86b   :  { %v879_v47 = vpop.permute.xlu1 %878 }
 0x86c   :  { %v4627_v32 = vpop.eup %4626  ;;  %v884_v49 = vsel %vm169_vm2, %v879_v47, 0 }
 0x86d   :  { %v718_v34 = vsel %vm169_vm2, %v4627_v32, 0.0 }
 0x86e   :  { %v4629_v35 = vpop.eup %4628  ;;  %719 = vadd.xlane.f32.xlu0 %v718_v34  ;;  %v4583_v34 = vld [vmem:[#allocation4 + $0x10] sm:$0xff]  }
 0x86f   :  { %v721_v36 = vsel %vm169_vm2, %v4629_v35, 0.0  ;;  %v877_v51 = vpop.permute.xlu1 %876 }
 0x872   :  { %722 = vadd.xlane.f32.xlu0 %v721_v36 }
 0x888   :  { %730 = vrot.lane.b32.xlu0 %v4902_v25, %s4819_s29 }
 0x88c   :  { %826 = vrot.lane.b32.xlu0 %v4912_v33, %s4821_s4  ;;  %v834_v33 = vsel %vm169_vm2, %v829_v42, 0 }
 0x8fb   :  { %v720_v37 = vpop.xlane.xlu0 %719 }
 0x8fc   :  { %4630 = vrcp.f32 %v720_v37 }
 0x8ff   :  { %v723_v38 = vpop.xlane.xlu0 %722 }
 0x900   :  { %4632 = vrcp.f32 %v723_v38 }
 0x903   :  { %v731_v39 = vpop.permute.xlu0 %730 }
 0x904   :  { %v736_v40 = vsel %vm294_vm3, %v731_v39, 0 }
 0x905   :  { %4198 = vmatpush3.bf16.msra.mxu1 %v736_v40 }
 0x906   :  { %v4631_v41 = vpop.eup %4630  ;;  %4209 = vmatprep.subr.bf16.mxu1 %v4811_v8 }
 0x907   :  { %v726_v43 = vmul.f32 %v4631_v41, %v4627_v32  ;;  %v827_v50 = vpop.permute.xlu0 %826 }
 0x909   :  { %v728_v44 = vpack.c.bf16 %v726_v43, %v726_v43 }
 0x90a   :  { %v4633_v45 = vpop.eup %4632 }
 0x90b   :  { %4200 = vmatmul.mubr.msk.bf16.vlgmr.msra.gmra.mrb[16].mxu1 %vm169_vm2, %v728_v44  ;;  %v727_v46 = vmul.f32 %v4633_v45, %v4629_v35  ;;  %v4584_v35 = vld [vmem:[#allocation4 + $0x18] sm:$0xff]  }
 0x90c   :  { %4211 = vmatprep.mubr.msk.bf16.mxu1 %vm4812_vm1, %v4811_v8 }
 0x90d   :  { %v729_v48 = vpack.c.bf16 %v727_v46, %v727_v46 }
 0x90e   :  { %4210 = vmatpush3.bf16.xpose.msra.mxu1 %v834_v33 }
 0x90f   :  { %4206 = vmatmul.mubr.msk.bf16.vlgmr.msra.gmra.mrb[28].mxu0 %vm169_vm2, %v729_v48  ;;  %4221 = vmatprep.subr.bf16.mxu1 %v4811_v8 }
 0x910   :  { %4216 = vmatpush3.bf16.xpose.msra.mxu0 %v884_v49  ;;  %4217 = vmatprep.mubr.msk.bf16.mxu0 %vm4812_vm1, %v4811_v8 }
 0x911   :  { %4227 = vmatprep.subr.bf16.mxu0 %v4811_v8 }
 0x915   :  { %4212 = vmatmul.mubr.msk.bf16.vlgmr.msra.gmra.mrb[20].mxu1 %vm169_vm2, %v827_v50 }
 0x916   :  { %4223 = vmatprep.mubr.msk.bf16.mxu1 %vm4812_vm1, %v4811_v8 }
 0x917   :  { %4218 = vmatmul.mubr.msk.bf16.vlgmr.msra.gmra.mrb[32].mxu0 %vm169_vm2, %v877_v51 }
 0x918   :  { %4229 = vmatprep.mubr.msk.bf16.mxu0 %vm4812_vm1, %v4811_v8 }
 0x9de   :  { %v772_v52 = vpop.f32.mrb[16].mxu1 }
 0x9df   :  { %v4201_v53 = vpop.f32.mrb[17].mxu1 }
 0x9e0   :  { %v775_v54 = vpop.f32.mrb[18].mxu1 }
 0x9e1   :  { %v4202_v55 = vpop.f32.mrb[19].mxu1 }
 0x9e2   :  { %v820_v56 = vpop.f32.mrb[28].mxu0 }
 0x9e3   :  { %v4541_v57 = vpack.i.bf16 %v820_v56, %v772_v52  ;;  %v4207_v58 = vpop.f32.mrb[29].mxu0 }
 0x9e4   :  { %v823_v59 = vpop.f32.mrb[30].mxu0 }
 0x9e5   :  { %v4208_v60 = vpop.f32.mrb[31].mxu0 }
 0x9e6   :  { %v3890_v60 = vld [vmem:[#allocation6 + $0x20] ss:$0 sm:$0xff] }
 0x9e8   :  { %v870_v61 = vpop.f32.mrb[20].mxu1 }
 0x9e9   :  { %v4213_v62 = vpop.f32.mrb[21].mxu1  ;;  %v926_v0 = vsel %vm169_vm2, %v870_v61, -inf }
 0x9ea   :  { %927 = vmax.xlane.f32.xlu0 %v926_v0  ;;  %v873_v1 = vpop.f32.mrb[22].mxu1  ;;  %v920_v2 = vpop.f32.mrb[32].mxu0 }
 0x9eb   :  { %v4214_v5 = vpop.f32.mrb[23].mxu1  ;;  %v4219_v6 = vpop.f32.mrb[33].mxu0  ;;  %v929_v7 = vsel %vm169_vm2, %v920_v2, -inf }
 0x9ec   :  { %930 = vmax.xlane.f32.xlu1 %v929_v7  ;;  %v923_v9 = vpop.f32.mrb[34].mxu0 }
 0x9ed   :  { %v4220_v10 = vpop.f32.mrb[35].mxu0 }
 0x9fd   :  { %998 = vrot.lane.b32.xlu1 %v4906_v28, %s4822_s5 }
 0xa01   :  { %4537 = vrot.lane.b32.xlu1 %v4536_v4, %s4809_s9 }
 0xa05   :  { %4542 = vrot.lane.b32.xlu1 %v4541_v57, %s4823_s6 }
 0xa77   :  { %v928_v11 = vpop.xlane.xlu0 %927 }
 0xa78   :  { %v932_v13 = vsub.f32 %v870_v61, %v928_v11 }
 0xa79   :  { %v931_v14 = vpop.xlane.xlu1 %930 }
 0xa7a   :  { %v934_v15 = vmul.f32 1.442695, %v932_v13  ;;  %v933_v17 = vsub.f32 %v920_v2, %v931_v14 }
 0xa7c   :  { %4634 = vpow2.f32 %v934_v15  ;;  %v936_v19 = vmul.f32 1.442695, %v933_v17 }
 0xa7d   :  { %v999_v20 = vpop.permute.xlu1 %998 }
 0xa7e   :  { %4636 = vpow2.f32 %v936_v19  ;;  %v1004_v21 = vsel %vm294_vm3, %v999_v20, 0 }
 0xa7f   :  { %4228 = vmatpush3.bf16.msra.mxu0 %v1004_v21 }
 0xa80   :  { %4241 = vmatprep.subr.bf16.mxu0 %v4811_v8 }
 0xa81   :  { %v4538_v45 = vpop.permute.xlu1 %4537 }
 0xa82   :  { %v4540_v47 = vunpack.i.h.bf16 %v4538_v45  ;;  %v4539_v33 = vunpack.i.l.bf16 %v4538_v45 }
 0xa84   :  { %v1071_v51 = vsel %vm169_vm2, %v4964_v16, %v4540_v47  ;;  %v1070_v52 = vsel %vm169_vm2, %v4962_v12, %v4539_v33  ;;  %v3900_v47 = vld [vmem:[#allocation6 + $0x40] ss:$0 sm:$0xff] }
 0xa85   :  { %v4543_v46 = vpop.permute.xlu1 %4542 }
 0xa86   :  { %v4635_v28 = vpop.eup %4634  ;;  %v4545_v48 = vunpack.i.h.bf16 %v4543_v46  ;;  %v4544_v49 = vunpack.i.l.bf16 %v4543_v46 }
 0xa87   :  { %v938_v63 = vsel %vm169_vm2, %v4635_v28, 0.0 }
 0xa88   :  { %v4637_v3 = vpop.eup %4636  ;;  %939 = vadd.xlane.f32.xlu0 %v938_v63  ;;  %v1073_v55 = vsel %vm1072_vm4, %v1070_v52, %v4544_v49  ;;  %v1074_v56 = vsel %vm1072_vm4, %v1071_v51, %v4545_v48  ;;  %v4587_v63 = vld [vmem:[#allocation4 + $0x40] sm:$0xff]  }
 0xa89   :  { %v941_v4 = vsel %vm169_vm2, %v4637_v3, 0.0 }
 0xa8c   :  { %942 = vadd.xlane.f32.xlu0 %v941_v4  ;;  %v57_v4 = vld [vmem:[#allocation2 + $0x8] sm:$0xff] }
 0xaa2   :  { %950 = vrot.lane.b32.xlu0 %v4902_v25, %s4822_s5 }
 0xb15   :  { %v940_v22 = vpop.xlane.xlu0 %939 }
 0xb16   :  { %4638 = vrcp.f32 %v940_v22 }
 0xb19   :  { %v943_v23 = vpop.xlane.xlu0 %942 }
 0xb1a   :  { %4640 = vrcp.f32 %v943_v23  ;;  %v58_v23 = vld [vmem:[#allocation2 + $0x10] sm:$0xff] }
 0xb1d   :  { %v951_v24 = vpop.permute.xlu0 %950 }
 0xb1e   :  { %v956_v26 = vsel %vm294_vm3, %v951_v24, 0  ;;  %v59_v24 = vld [vmem:[#allocation2 + $0x18] sm:$0xff] }
 0xb1f   :  { %4222 = vmatpush3.bf16.msra.mxu1 %v956_v26  ;;  %v1253_v26 = vpack.c.bf16 %v59_v24, %v58_v23 }
 0xb20   :  { %v4639_v27 = vpop.eup %4638  ;;  %4233 = vmatprep.subr.bf16.mxu1 %v4811_v8 }
 0xb21   :  { %v946_v29 = vmul.f32 %v4639_v27, %v4635_v28  ;;  %v4585_v28 = vld [vmem:[#allocation4 + $0x30] sm:$0xff]   ;;  %v4588_v27 = vld [vmem:[#allocation4 + $0x20] sm:$0xff]  }
 0xb23   :  { %v948_v30 = vpack.c.bf16 %v946_v29, %v946_v29  ;;  %v4589_v29 = vld [vmem:[#allocation4 + $0x28] sm:$0xff]  }
 0xb24   :  { %v4641_v31 = vpop.eup %4640 }
 0xb25   :  { %4224 = vmatmul.mubr.msk.bf16.vlgmr.msra.gmra.mrb[24].mxu1 %vm169_vm2, %v948_v30  ;;  %v947_v32 = vmul.f32 %v4641_v31, %v4637_v3  ;;  %v56_v3 = vld [vmem:[#allocation2] sm:$0xff] }
 0xb26   :  { %4237 = vmatprep.mubr.msk.bf16.mxu1 %vm4812_vm1, %v4811_v8  ;;  %4234 = vmatpush3.bf16.msra.mxu1 %v4583_v34  ;;  %v1252_v22 = vpack.c.bf16 %v57_v4, %v56_v3 }
 0xb27   :  { %v949_v25 = vpack.c.bf16 %v947_v32, %v947_v32  ;;  %4235 = vmatprep.subr.bf16.mxu1 %v4811_v8 }
 0xb29   :  { %4230 = vmatmul.mubr.msk.bf16.vlgmr.msra.gmra.mrb[36].mxu0 %vm169_vm2, %v949_v25 }
 0xb2a   :  { %4245 = vmatprep.mubr.msk.bf16.mxu0 %vm4812_vm1, %v4811_v8  ;;  %4236 = vmatpush3.bf16.msra.mxu1 %v4584_v35 }
 0xb2b   :  { %4249 = vmatprep.subr.bf16.mxu1 %v4585_v28  ;;  %4242 = vmatpush3.bf16.msra.mxu0 %v4588_v27 }
 0xb2c   :  { %4243 = vmatprep.subr.bf16.mxu0 %v4811_v8 }
 0xb2f   :  { %4244 = vmatpush3.bf16.msra.mxu0 %v4589_v29 }
 0xb30   :  { %4259 = vmatprep.subr.bf16.mxu0 %v4811_v8 }
 0xbf8   :  { %v992_v36 = vpop.f32.mrb[24].mxu1 }
 0xbf9   :  { %v4225_v37 = vpop.f32.mrb[25].mxu1 }
 0xbfa   :  { %v995_v38 = vpop.f32.mrb[26].mxu1 }
 0xbfb   :  { %v4226_v39 = vpop.f32.mrb[27].mxu1  ;;  %v3894_v38 = vld [vmem:[#allocation6 + $0x28] ss:$0 sm:$0xff] }
 0xbfc   :  { %v1040_v40 = vpop.f32.mrb[36].mxu0 }
 0xbfd   :  { %v4546_v41 = vpack.i.bf16 %v1040_v40, %v992_v36  ;;  %v4231_v42 = vpop.f32.mrb[37].mxu0 }
 0xbfe   :  { %v1043_v43 = vpop.f32.mrb[38].mxu0  ;;  %v3895_v42 = vld [vmem:[#allocation6 + $0x30] ss:$0 sm:$0xff] }
 0xbff   :  { %4547 = vrot.lane.b32.xlu0 %v4546_v41, %s4824_s7  ;;  %v4232_v44 = vpop.f32.mrb[39].mxu0 }
 0xc71   :  { %v4548_v50 = vpop.permute.xlu0 %4547 }
 0xc72   :  { %v4550_v53 = vunpack.i.h.bf16 %v4548_v50  ;;  %v4549_v54 = vunpack.i.l.bf16 %v4548_v50 }
 0xc74   :  { %v1077_v57 = vsel %vm1075_vm5, %v1074_v56, %v4550_v53  ;;  %v1076_v58 = vsel %vm1075_vm5, %v1073_v55, %v4549_v54 }
 0xc75   :  { %v1078_v59 = vpack.c.bf16 %v1077_v57, %v1076_v58 }
 0xc77   :  { %4238 = vmatmul.mubr.msk.bf16.vlgmr.msra.gmra.mrb[28].mxu1 %vm61_vm0, %v1078_v59  ;;  %v3896_v59 = vld [vmem:[#allocation6 + $0x38] ss:$0 sm:$0xff] }
 0xc78   :  { %4250 = vmatpush3.bf16.msra.mxu1 %v4585_v28  ;;  %4255 = vmatprep.mubr.msk.bf16.mxu1 %vm1283_vm6, %v1252_v22 }
 0xd4a   :  { %v1137_v61 = vpop.f32.mrb[28].mxu1 }
 0xd4b   :  { %v1138_v62 = vadd.f32 %v3890_v60, %v1137_v61  ;;  %v4239_v16 = vpop.f32.mrb[29].mxu1 }
 0xd4c   :  { %v1140_v0 = vpop.f32.mrb[30].mxu1 }
 0xd4d   :  { %v1141_v1 = vadd.f32 %v3890_v60, %v1140_v0  ;;  %v4240_v12 = vpop.f32.mrb[31].mxu1  ;;  %v1144_v2 = vadd.f32 %v1138_v62, %v4895_v18 }
 0xd4f   :  { %v1146_v5 = vsel %vm61_vm0, %v1144_v2, 0.0  ;;  %v1145_v6 = vadd.f32 %v1141_v1, %v4895_v18  ;;  %v4586_v18 = vld [vmem:[#allocation4 + $0x38] sm:$0xff]  }
 0xd50   :  { %1147 = vadd.xlane.f32.xlu1 %v1146_v5  ;;  %4251 = vmatprep.subr.bf16.mxu1 %v4586_v18 }
 0xd51   :  { %v1149_v7 = vsel %vm61_vm0, %v1145_v6, 0.0  ;;  %4252 = vmatpush3.bf16.msra.mxu1 %v4586_v18 }
 0xd52   :  { %1150 = vadd.xlane.f32.xlu0 %v1149_v7  ;;  %4253 = vmatprep.subr.bf16.mxu1 %v4587_v63 }
 0xd55   :  { %4254 = vmatpush3.bf16.msra.mxu1 %v4587_v63 }
 0xd56   :  { %4265 = vmatprep.subr.bf16.mxu1 %v4811_v8 }
 0xd58   :  { %4256 = vmatmul.mubr.msk.bf16.vlgmr.msra.gmra.mrb[32].mxu1 %vm1283_vm6, %v1253_v26 }
 0xd59   :  { %4267 = vmatprep.mubr.msk.bf16.mxu1 %vm4812_vm1, %v4811_v8 }
 0xddd   :  { %v1148_v9 = vpop.xlane.xlu1 %1147 }
 0xdde   :  { %v1152_v10 = vmul.f32 0.03125, %v1148_v9 }
 0xddf   :  { %v1151_v11 = vpop.xlane.xlu0 %1150 }
 0xde0   :  { %v1154_v13 = vsub.f32 %v1144_v2, %v1152_v10  ;;  %v1153_v14 = vmul.f32 0.03125, %v1151_v11 }
 0xde2   :  { %v1155_v15 = vsub.f32 %v1145_v6, %v1153_v14  ;;  %v1156_v17 = vmul.f32 %v1154_v13, %v1154_v13 }
 0xde4   :  { %v1158_v19 = vsel %vm61_vm0, %v1156_v17, 0.0  ;;  %v1157_v20 = vmul.f32 %v1155_v15, %v1155_v15 }
 0xde5   :  { %1159 = vadd.xlane.f32.xlu0 %v1158_v19 }
 0xde6   :  { %v1161_v21 = vsel %vm61_vm0, %v1157_v20, 0.0 }
 0xde9   :  { %1162 = vadd.xlane.f32.xlu0 %v1161_v21 }
 0xe2b   :  { %v4257_v33 = vpop.f32.mrb[32].mxu1 }
 0xe2c   :  { %v1333_v48 = vadd.f32 %v4257_v33, %v3900_v47  ;;  %v1324_v49 = vpop.f32.mrb[33].mxu1 }
 0xe2d   :  { %v1325_v50 = vadd.f32 %v3900_v47, %v1324_v49  ;;  %v4258_v51 = vpop.f32.mrb[34].mxu1 }
 0xe2e   :  { %v1336_v52 = vadd.f32 %v4258_v51, %v3900_v47  ;;  %v1327_v53 = vpop.f32.mrb[35].mxu1 }
 0xe2f   :  { %v1328_v54 = vadd.f32 %v3900_v47, %v1327_v53 }
 0xe30   :  { %v5098_v55 = vpack.c.bf16 %v1336_v52, %v1333_v48 }
 0xe31   :  { %v5100_v56 = vpack.c.bf16 %v1328_v54, %v1325_v50 }
 0xe32   :  { %v1399_v57 = vsel %vm169_vm2, %v5098_v55, 0 }
 0xe33   :  { %v1353_v58 = vsel %vm169_vm2, %v5100_v56, 0  ;;  %4266 = vmatpush3.bf16.xpose.msra.mxu1 %v1399_v57 }
 0xe34   :  { %4277 = vmatprep.subr.bf16.mxu1 %v4811_v8 }
 0xe72   :  { %v1160_v30 = vpop.xlane.xlu0 %1159 }
 0xe73   :  { %v1164_v31 = vmul.f32 0.03125, %v1160_v30 }
 0xe75   :  { %v1166_v32 = vadd.f32 1e-12, %v1164_v31 }
 0xe76   :  { %v1163_v25 = vpop.xlane.xlu0 %1162 }
 0xe77   :  { %4642 = vrsqrt.f32 %v1166_v32  ;;  %v1165_v34 = vmul.f32 0.03125, %v1163_v25 }
 0xe79   :  { %v1167_v35 = vadd.f32 1e-12, %v1165_v34 }
 0xe7b   :  { %4644 = vrsqrt.f32 %v1167_v35 }
 0xe81   :  { %v4643_v36 = vpop.eup %4642 }
 0xe82   :  { %v1170_v37 = vmul.f32 %v4643_v36, %v1154_v13 }
 0xe84   :  { %v1177_v41 = vmul.f32 %v3894_v38, %v1170_v37 }
 0xe85   :  { %v4645_v39 = vpop.eup %4644 }
 0xe86   :  { %v1171_v40 = vmul.f32 %v4645_v39, %v1155_v15  ;;  %v5089_v44 = vadd.f32 %v3895_v42, %v1177_v41 }
 0xe88   :  { %v1178_v43 = vmul.f32 %v3894_v38, %v1171_v40 }
 0xe8a   :  { %v5091_v45 = vadd.f32 %v3895_v42, %v1178_v43 }
 0xe8c   :  { %v1186_v46 = vpack.c.bf16 %v5091_v45, %v5089_v44 }
 0xe8e   :  { %4246 = vmatmul.mubr.msk.bf16.vlgmr.msra.gmra.mrb[40].mxu0 %vm61_vm0, %v1186_v46 }
 0xe8f   :  { %4261 = vmatprep.mubr.msk.bf16.mxu0 %vm4812_vm1, %v4811_v8  ;;  %4260 = vmatpush3.bf16.xpose.msra.mxu0 %v1353_v58 }
 0xe90   :  { %4271 = vmatprep.subr.bf16.mxu0 %v4811_v8 }
 0xf61   :  { %v1245_v60 = vpop.f32.mrb[40].mxu0 }
 0xf62   :  { %v1246_v61 = vadd.f32 %v3896_v59, %v1245_v60  ;;  %v4247_v62 = vpop.f32.mrb[41].mxu0 }
 0xf63   :  { %v1248_v16 = vpop.f32.mrb[42].mxu0 }
 0xf64   :  { %v1339_v0 = vmul.f32 0.35355338, %v1246_v61  ;;  %v1249_v1 = vadd.f32 %v3896_v59, %v1248_v16  ;;  %v4248_v12 = vpop.f32.mrb[43].mxu0 }
 0xf66   :  { %v5108_v2 = vpack.c.bf16 %v1339_v0, %v1339_v0  ;;  %v1340_v5 = vmul.f32 0.35355338, %v1249_v1 }
 0xf68   :  { %v5110_v6 = vpack.c.bf16 %v1340_v5, %v1340_v5  ;;  %4262 = vmatmul.mubr.msk.bf16.vlgmr.msra.gmra.mrb[44].mxu0 %vm169_vm2, %v5108_v2 }
 0xf69   :  { %4273 = vmatprep.mubr.msk.bf16.mxu0 %vm4812_vm1, %v4811_v8 }
 0xf6a   :  { %4268 = vmatmul.mubr.msk.bf16.vlgmr.msra.gmra.mrb[36].mxu1 %vm169_vm2, %v5110_v6 }
 0xf6b   :  { %4279 = vmatprep.mubr.msk.bf16.mxu1 %vm4812_vm1, %v4811_v8 }
0x103b   :  { %v1389_v7 = vpop.f32.mrb[44].mxu0 }
0x103c   :  { %v4263_v9 = vpop.f32.mrb[45].mxu0  ;;  %v1441_v10 = vsel %vm1072_vm4, %v1389_v7, -inf }
0x103d   :  { %v1435_v11 = vpop.f32.mrb[36].mxu1  ;;  %1442 = vmax.xlane.f32.xlu1 %v1441_v10  ;;  %v1392_v13 = vpop.f32.mrb[46].mxu0 }
0x103e   :  { %v4264_v14 = vpop.f32.mrb[47].mxu0  ;;  %v4269_v15 = vpop.f32.mrb[37].mxu1  ;;  %v1444_v17 = vsel %vm1072_vm4, %v1435_v11, -inf }
0x103f   :  { %1445 = vmax.xlane.f32.xlu0 %v1444_v17  ;;  %v1438_v19 = vpop.f32.mrb[38].mxu1 }
0x1040   :  { %v4270_v20 = vpop.f32.mrb[39].mxu1 }
0x104e   :  { %1466 = vrot.lane.b32.xlu1 %v5100_v56, %s4813_s2 }
0x10ca   :  { %v1443_v21 = vpop.xlane.xlu1 %1442 }
0x10cb   :  { %v1447_v28 = vsub.f32 %v1389_v7, %v1443_v21 }
0x10cc   :  { %v1446_v18 = vpop.xlane.xlu0 %1445 }
0x10cd   :  { %v1449_v63 = vmul.f32 1.442695, %v1447_v28  ;;  %v1448_v3 = vsub.f32 %v1435_v11, %v1446_v18 }
0x10ce   :  { %v1467_v4 = vpop.permute.xlu1 %1466 }
0x10cf   :  { %4646 = vpow2.f32 %v1449_v63  ;;  %v1451_v22 = vmul.f32 1.442695, %v1448_v3  ;;  %4272 = vmatpush3.bf16.msra.mxu0 %v1467_v4 }
0x10d0   :  { %4283 = vmatprep.subr.bf16.mxu0 %v4811_v8 }
0x10d1   :  { %4648 = vpow2.f32 %v1451_v22 }
0x10d9   :  { %v4647_v23 = vpop.eup %4646 }
0x10da   :  { %v1453_v24 = vsel %vm1072_vm4, %v4647_v23, 0.0 }
0x10db   :  { %v4649_v26 = vpop.eup %4648  ;;  %1454 = vadd.xlane.f32.xlu1 %v1453_v24 }
0x10dc   :  { %v1456_v27 = vsel %vm1072_vm4, %v4649_v26, 0.0 }
0x10dd   :  { %1457 = vadd.xlane.f32.xlu0 %v1456_v27 }
0x10ec   :  { %1561 = vrot.lane.b32.xlu1 %v5100_v56, %s4815_s25 }
0x10f0   :  { %1611 = vrot.lane.b32.xlu1 %v5098_v55, %s4815_s25 }
0x10f3   :  { %1513 = vrot.lane.b32.xlu0 %v5098_v55, %s4813_s2 }
0x10f4   :  { %1559 = vrot.lane.b32.xlu1 %v5108_v2, %s4815_s25 }
0x10f7   :  { %1609 = vrot.lane.b32.xlu0 %v5110_v6, %s4815_s25 }
0x1168   :  { %v1455_v29 = vpop.xlane.xlu1 %1454 }
0x1169   :  { %4650 = vrcp.f32 %v1455_v29 }
0x116a   :  { %v1458_v30 = vpop.xlane.xlu0 %1457 }
0x116b   :  { %4652 = vrcp.f32 %v1458_v30 }
0x116c   :  { %v1562_v32 = vpop.permute.xlu1 %1561 }
0x116d   :  { %v1567_v39 = vsel %vm169_vm2, %v1562_v32, 0 }
0x116e   :  { %v1514_v31 = vpop.permute.xlu0 %1513 }
0x116f   :  { %4278 = vmatpush3.bf16.msra.mxu1 %v1514_v31 }
0x1170   :  { %4289 = vmatprep.subr.bf16.mxu1 %v4811_v8  ;;  %v1612_v38 = vpop.permute.xlu1 %1611 }
0x1171   :  { %v1617_v41 = vsel %vm169_vm2, %v1612_v38, 0 }
0x1172   :  { %v1610_v43 = vpop.permute.xlu0 %1609 }
0x1173   :  { %v4651_v25 = vpop.eup %4650 }
0x1174   :  { %v1461_v34 = vmul.f32 %v4651_v25, %v4647_v23  ;;  %v1560_v42 = vpop.permute.xlu1 %1559 }
0x1175   :  { %v4653_v35 = vpop.eup %4652 }
0x1176   :  { %v1462_v36 = vmul.f32 %v4653_v35, %v4649_v26  ;;  %v1463_v37 = vpack.c.bf16 %v1461_v34, %v1461_v34 }
0x1178   :  { %4274 = vmatmul.mubr.msk.bf16.vlgmr.msra.gmra.mrb[48].mxu0 %vm1072_vm4, %v1463_v37  ;;  %v1464_v40 = vpack.c.bf16 %v1462_v36, %v1462_v36 }
0x1179   :  { %4284 = vmatpush3.bf16.xpose.msra.mxu0 %v1567_v39  ;;  %4285 = vmatprep.mubr.msk.bf16.mxu0 %vm4812_vm1, %v4811_v8 }
0x117a   :  { %4280 = vmatmul.mubr.msk.bf16.vlgmr.msra.gmra.mrb[40].mxu1 %vm1072_vm4, %v1464_v40  ;;  %4295 = vmatprep.subr.bf16.mxu0 %v4811_v8 }
0x117b   :  { %4290 = vmatpush3.bf16.xpose.msra.mxu1 %v1617_v41  ;;  %4291 = vmatprep.mubr.msk.bf16.mxu1 %vm4812_vm1, %v4811_v8 }
0x117c   :  { %4301 = vmatprep.subr.bf16.mxu1 %v4811_v8 }
0x1180   :  { %4286 = vmatmul.mubr.msk.bf16.vlgmr.msra.gmra.mrb[52].mxu0 %vm169_vm2, %v1560_v42 }
0x1181   :  { %4297 = vmatprep.mubr.msk.bf16.mxu0 %vm4812_vm1, %v4811_v8 }
0x1182   :  { %4292 = vmatmul.mubr.msk.bf16.vlgmr.msra.gmra.mrb[44].mxu1 %vm169_vm2, %v1610_v43 }
0x1183   :  { %4303 = vmatprep.mubr.msk.bf16.mxu1 %vm4812_vm1, %v4811_v8 }
0x124b   :  { %v5154_v46 = vpop.f32.mrb[48].mxu0 }
0x124c   :  { %v4275_v47 = vpop.f32.mrb[49].mxu0 }
0x124d   :  { %v1509_v33 = vpop.f32.mrb[50].mxu0  ;;  %v5156_v48 = vpop.f32.mrb[40].mxu1 }
0x124e   :  { %v4276_v49 = vpop.f32.mrb[51].mxu0  ;;  %v4281_v50 = vpop.f32.mrb[41].mxu1 }
0x124f   :  { %v1556_v51 = vpop.f32.mrb[42].mxu1 }
0x1250   :  { %v4282_v52 = vpop.f32.mrb[43].mxu1 }
0x1253   :  { %v1603_v53 = vpop.f32.mrb[52].mxu0 }
0x1254   :  { %v4287_v54 = vpop.f32.mrb[53].mxu0  ;;  %v1659_v57 = vsel %vm1072_vm4, %v1603_v53, -inf }
0x1255   :  { %v1653_v58 = vpop.f32.mrb[44].mxu1  ;;  %1660 = vmax.xlane.f32.xlu1 %v1659_v57  ;;  %v1606_v59 = vpop.f32.mrb[54].mxu0 }
0x1256   :  { %v4288_v60 = vpop.f32.mrb[55].mxu0  ;;  %v4293_v61 = vpop.f32.mrb[45].mxu1  ;;  %v1662_v62 = vsel %vm1072_vm4, %v1653_v58, -inf }
0x1257   :  { %1663 = vmax.xlane.f32.xlu0 %v1662_v62  ;;  %v1656_v16 = vpop.f32.mrb[46].mxu1 }
0x1258   :  { %v4294_v0 = vpop.f32.mrb[47].mxu1 }
0x1266   :  { %1683 = vrot.lane.b32.xlu1 %v5100_v56, %s4814_s24 }
0x126a   :  { %1777 = vrot.lane.b32.xlu1 %v5100_v56, %s4818_s28 }
0x126e   :  { %1827 = vrot.lane.b32.xlu1 %v5098_v55, %s4818_s28 }
0x1272   :  { %1775 = vrot.lane.b32.xlu1 %v5108_v2, %s4818_s28 }
0x12e2   :  { %v1661_v1 = vpop.xlane.xlu1 %1660 }
0x12e3   :  { %v1665_v12 = vsub.f32 %v1603_v53, %v1661_v1 }
0x12e4   :  { %v1664_v5 = vpop.xlane.xlu0 %1663 }
0x12e5   :  { %v1667_v7 = vmul.f32 1.442695, %v1665_v12  ;;  %v1666_v9 = vsub.f32 %v1653_v58, %v1664_v5 }
0x12e6   :  { %v1684_v10 = vpop.permute.xlu1 %1683 }
0x12e7   :  { %4654 = vpow2.f32 %v1667_v7  ;;  %v1669_v11 = vmul.f32 1.442695, %v1666_v9  ;;  %4296 = vmatpush3.bf16.msra.mxu0 %v1684_v10 }
0x12e8   :  { %4307 = vmatprep.subr.bf16.mxu0 %v4811_v8 }
0x12e9   :  { %4656 = vpow2.f32 %v1669_v11 }
0x12ea   :  { %v1778_v18 = vpop.permute.xlu1 %1777 }
0x12eb   :  { %v1783_v22 = vsel %vm169_vm2, %v1778_v18, 0 }
0x12ee   :  { %v1828_v24 = vpop.permute.xlu1 %1827 }
0x12ef   :  { %v1833_v27 = vsel %vm169_vm2, %v1828_v24, 0 }
0x12f1   :  { %v4655_v13 = vpop.eup %4654 }
0x12f2   :  { %v1671_v14 = vsel %vm1072_vm4, %v4655_v13, 0.0  ;;  %v1776_v29 = vpop.permute.xlu1 %1775 }
0x12f3   :  { %v4657_v15 = vpop.eup %4656  ;;  %1672 = vadd.xlane.f32.xlu0 %v1671_v14 }
0x12f4   :  { %v1674_v17 = vsel %vm1072_vm4, %v4657_v15, 0.0 }
0x12f7   :  { %1675 = vadd.xlane.f32.xlu0 %v1674_v17 }
0x130d   :  { %1729 = vrot.lane.b32.xlu0 %v5098_v55, %s4814_s24 }
0x1311   :  { %1825 = vrot.lane.b32.xlu0 %v5110_v6, %s4818_s28 }
0x1380   :  { %v1673_v19 = vpop.xlane.xlu0 %1672 }
0x1381   :  { %4658 = vrcp.f32 %v1673_v19 }
0x1384   :  { %v1676_v20 = vpop.xlane.xlu0 %1675 }
0x1385   :  { %4660 = vrcp.f32 %v1676_v20 }
0x1388   :  { %v1730_v21 = vpop.permute.xlu0 %1729 }
0x1389   :  { %4302 = vmatpush3.bf16.msra.mxu1 %v1730_v21 }
0x138a   :  { %4313 = vmatprep.subr.bf16.mxu1 %v4811_v8 }
0x138b   :  { %v4659_v28 = vpop.eup %4658 }
0x138c   :  { %v1679_v63 = vmul.f32 %v4659_v28, %v4655_v13  ;;  %v1826_v30 = vpop.permute.xlu0 %1825 }
0x138e   :  { %v1681_v3 = vpack.c.bf16 %v1679_v63, %v1679_v63 }
0x138f   :  { %v4661_v4 = vpop.eup %4660 }
0x1390   :  { %v1680_v23 = vmul.f32 %v4661_v4, %v4657_v15  ;;  %4298 = vmatmul.mubr.msk.bf16.vlgmr.msra.gmra.mrb[56].mxu0 %vm1072_vm4, %v1681_v3 }
0x1391   :  { %4308 = vmatpush3.bf16.xpose.msra.mxu0 %v1783_v22  ;;  %4309 = vmatprep.mubr.msk.bf16.mxu0 %vm4812_vm1, %v4811_v8 }
0x1392   :  { %v1682_v26 = vpack.c.bf16 %v1680_v23, %v1680_v23  ;;  %4319 = vmatprep.subr.bf16.mxu0 %v4811_v8 }
0x1394   :  { %4304 = vmatmul.mubr.msk.bf16.vlgmr.msra.gmra.mrb[48].mxu1 %vm1072_vm4, %v1682_v26 }
0x1395   :  { %4314 = vmatpush3.bf16.xpose.msra.mxu1 %v1833_v27  ;;  %4315 = vmatprep.mubr.msk.bf16.mxu1 %vm4812_vm1, %v4811_v8 }
0x1396   :  { %4325 = vmatprep.subr.bf16.mxu1 %v4811_v8 }
0x1398   :  { %4310 = vmatmul.mubr.msk.bf16.vlgmr.msra.gmra.mrb[60].mxu0 %vm169_vm2, %v1776_v29 }
0x1399   :  { %4321 = vmatprep.mubr.msk.bf16.mxu0 %vm4812_vm1, %v4811_v8 }
0x139c   :  { %4316 = vmatmul.mubr.msk.bf16.vlgmr.msra.gmra.mrb[52].mxu1 %vm169_vm2, %v1826_v30 }
0x139d   :  { %4327 = vmatprep.mubr.msk.bf16.mxu1 %vm4812_vm1, %v4811_v8 }
0x1463   :  { %v5192_v31 = vpop.f32.mrb[56].mxu0 }
0x1464   :  { %v4299_v32 = vpop.f32.mrb[57].mxu0 }
0x1465   :  { %v1726_v25 = vpop.f32.mrb[58].mxu0 }
0x1466   :  { %v4300_v34 = vpop.f32.mrb[59].mxu0 }
0x1467   :  { %v5194_v35 = vpop.f32.mrb[48].mxu1 }
0x1468   :  { %v4551_v36 = vpack.i.bf16 %v5194_v35, %v5192_v31  ;;  %v4305_v37 = vpop.f32.mrb[49].mxu1 }
0x1469   :  { %v1772_v38 = vpop.f32.mrb[50].mxu1 }
0x146a   :  { %v4306_v39 = vpop.f32.mrb[51].mxu1 }
0x146b   :  { %v1819_v40 = vpop.f32.mrb[60].mxu0 }
0x146c   :  { %v4311_v41 = vpop.f32.mrb[61].mxu0  ;;  %v1875_v42 = vsel %vm1072_vm4, %v1819_v40, -inf }
0x146d   :  { %1876 = vmax.xlane.f32.xlu1 %v1875_v42  ;;  %v1822_v43 = vpop.f32.mrb[62].mxu0 }
0x146e   :  { %v4312_v47 = vpop.f32.mrb[63].mxu0 }
0x146f   :  { %v1869_v33 = vpop.f32.mrb[52].mxu1 }
0x1470   :  { %v4317_v49 = vpop.f32.mrb[53].mxu1  ;;  %v1878_v50 = vsel %vm1072_vm4, %v1869_v33, -inf }
0x1471   :  { %1879 = vmax.xlane.f32.xlu0 %v1878_v50  ;;  %v1872_v51 = vpop.f32.mrb[54].mxu1 }
0x1472   :  { %v4318_v52 = vpop.f32.mrb[55].mxu1 }
0x147e   :  { %1899 = vrot.lane.b32.xlu1 %v5100_v56, %s4817_s27 }
0x1482   :  { %1993 = vrot.lane.b32.xlu1 %v5100_v56, %s4821_s4 }
0x1486   :  { %2043 = vrot.lane.b32.xlu1 %v5098_v55, %s4821_s4 }
0x148a   :  { %1991 = vrot.lane.b32.xlu1 %v5108_v2, %s4821_s4 }
0x14fa   :  { %v1877_v53 = vpop.xlane.xlu1 %1876 }
0x14fb   :  { %v1881_v54 = vsub.f32 %v1819_v40, %v1877_v53 }
0x14fd   :  { %v1883_v57 = vmul.f32 1.442695, %v1881_v54 }
0x14fe   :  { %v1880_v58 = vpop.xlane.xlu0 %1879  ;;  %v1900_v59 = vpop.permute.xlu1 %1899 }
0x14ff   :  { %4662 = vpow2.f32 %v1883_v57  ;;  %v1882_v60 = vsub.f32 %v1869_v33, %v1880_v58  ;;  %4320 = vmatpush3.bf16.msra.mxu0 %v1900_v59 }
0x1500   :  { %4331 = vmatprep.subr.bf16.mxu0 %v4811_v8 }
0x1501   :  { %v1885_v61 = vmul.f32 1.442695, %v1882_v60 }
0x1502   :  { %v1994_v9 = vpop.permute.xlu1 %1993 }
0x1503   :  { %4664 = vpow2.f32 %v1885_v61  ;;  %v1999_v14 = vsel %vm169_vm2, %v1994_v9, 0 }
0x1506   :  { %v2044_v17 = vpop.permute.xlu1 %2043 }
0x1507   :  { %v2049_v19 = vsel %vm169_vm2, %v2044_v17, 0 }
0x1509   :  { %v4663_v62 = vpop.eup %4662 }
0x150a   :  { %v1887_v16 = vsel %vm1072_vm4, %v4663_v62, 0.0  ;;  %v1992_v20 = vpop.permute.xlu1 %1991 }
0x150b   :  { %1888 = vadd.xlane.f32.xlu0 %v1887_v16 }
0x150d   :  { %v4665_v0 = vpop.eup %4664 }
0x150e   :  { %v1890_v1 = vsel %vm1072_vm4, %v4665_v0, 0.0 }
0x150f   :  { %1891 = vadd.xlane.f32.xlu0 %v1890_v1 }
0x1525   :  { %1945 = vrot.lane.b32.xlu0 %v5098_v55, %s4817_s27 }
0x1529   :  { %2041 = vrot.lane.b32.xlu0 %v5110_v6, %s4821_s4 }
0x1598   :  { %v1889_v2 = vpop.xlane.xlu0 %1888 }
0x1599   :  { %4666 = vrcp.f32 %v1889_v2 }
0x159c   :  { %v1892_v12 = vpop.xlane.xlu0 %1891 }
0x159d   :  { %4668 = vrcp.f32 %v1892_v12 }
0x15a0   :  { %v1946_v5 = vpop.permute.xlu0 %1945 }
0x15a1   :  { %4326 = vmatpush3.bf16.msra.mxu1 %v1946_v5 }
0x15a2   :  { %4337 = vmatprep.subr.bf16.mxu1 %v4811_v8 }
0x15a3   :  { %v4667_v7 = vpop.eup %4666 }
0x15a4   :  { %v1895_v10 = vmul.f32 %v4667_v7, %v4663_v62  ;;  %v2042_v21 = vpop.permute.xlu0 %2041  ;;  %v4591_v62 = vld [vmem:[#allocation4 + $0x50] sm:$0xff]  }
0x15a6   :  { %v1897_v11 = vpack.c.bf16 %v1895_v10, %v1895_v10 }
0x15a7   :  { %v4669_v13 = vpop.eup %4668 }
0x15a8   :  { %v1896_v15 = vmul.f32 %v4669_v13, %v4665_v0  ;;  %4322 = vmatmul.mubr.msk.bf16.vlgmr.msra.gmra.mrb[64].mxu0 %vm1072_vm4, %v1897_v11 }
0x15a9   :  { %4332 = vmatpush3.bf16.xpose.msra.mxu0 %v1999_v14  ;;  %4333 = vmatprep.mubr.msk.bf16.mxu0 %vm4812_vm1, %v4811_v8 }
0x15aa   :  { %v1898_v6 = vpack.c.bf16 %v1896_v15, %v1896_v15  ;;  %4343 = vmatprep.subr.bf16.mxu0 %v4811_v8 }
0x15ac   :  { %4328 = vmatmul.mubr.msk.bf16.vlgmr.msra.gmra.mrb[56].mxu1 %vm1072_vm4, %v1898_v6 }
0x15ad   :  { %4338 = vmatpush3.bf16.xpose.msra.mxu1 %v2049_v19  ;;  %4339 = vmatprep.mubr.msk.bf16.mxu1 %vm4812_vm1, %v4811_v8 }
0x15ae   :  { %4349 = vmatprep.subr.bf16.mxu1 %v4811_v8 }
0x15b0   :  { %4334 = vmatmul.mubr.msk.bf16.vlgmr.msra.gmra.mrb[68].mxu0 %vm169_vm2, %v1992_v20 }
0x15b1   :  { %4345 = vmatprep.mubr.msk.bf16.mxu0 %vm4812_vm1, %v4811_v8 }
0x15b4   :  { %4340 = vmatmul.mubr.msk.bf16.vlgmr.msra.gmra.mrb[60].mxu1 %vm169_vm2, %v2042_v21 }
0x15b5   :  { %4351 = vmatprep.mubr.msk.bf16.mxu1 %vm4812_vm1, %v4811_v8 }
0x167b   :  { %v1939_v28 = vpop.f32.mrb[64].mxu0 }
0x167c   :  { %v4323_v18 = vpop.f32.mrb[65].mxu0 }
0x167d   :  { %v1942_v63 = vpop.f32.mrb[66].mxu0 }
0x167e   :  { %v4324_v3 = vpop.f32.mrb[67].mxu0 }
0x167f   :  { %v1985_v4 = vpop.f32.mrb[56].mxu1 }
0x1680   :  { %v4556_v22 = vpack.i.bf16 %v1985_v4, %v1939_v28  ;;  %v4329_v23 = vpop.f32.mrb[57].mxu1 }
0x1681   :  { %v1988_v24 = vpop.f32.mrb[58].mxu1 }
0x1682   :  { %v4330_v26 = vpop.f32.mrb[59].mxu1 }
0x1683   :  { %v2035_v27 = vpop.f32.mrb[68].mxu0 }
0x1684   :  { %v4335_v29 = vpop.f32.mrb[69].mxu0  ;;  %v2091_v30 = vsel %vm1072_vm4, %v2035_v27, -inf }
0x1685   :  { %2092 = vmax.xlane.f32.xlu1 %v2091_v30  ;;  %v2038_v32 = vpop.f32.mrb[70].mxu0 }
0x1686   :  { %v4336_v25 = vpop.f32.mrb[71].mxu0 }
0x1687   :  { %v2085_v34 = vpop.f32.mrb[60].mxu1 }
0x1688   :  { %v4341_v37 = vpop.f32.mrb[61].mxu1  ;;  %v2094_v38 = vsel %vm1072_vm4, %v2085_v34, -inf }
0x1689   :  { %2095 = vmax.xlane.f32.xlu0 %v2094_v38  ;;  %v2088_v39 = vpop.f32.mrb[62].mxu1 }
0x168a   :  { %v4342_v40 = vpop.f32.mrb[63].mxu1 }
0x1696   :  { %2115 = vrot.lane.b32.xlu1 %v5100_v56, %s4820_s30 }
0x169a   :  { %4552 = vrot.lane.b32.xlu1 %v4551_v36, %s4809_s9 }
0x169e   :  { %4557 = vrot.lane.b32.xlu1 %v4556_v22, %s4823_s6 }
0x1712   :  { %v2093_v41 = vpop.xlane.xlu1 %2092 }
0x1713   :  { %v2097_v42 = vsub.f32 %v2035_v27, %v2093_v41 }
0x1715   :  { %v2099_v43 = vmul.f32 1.442695, %v2097_v42 }
0x1716   :  { %v2096_v47 = vpop.xlane.xlu0 %2095  ;;  %v2116_v33 = vpop.permute.xlu1 %2115 }
0x1717   :  { %4670 = vpow2.f32 %v2099_v43  ;;  %v2098_v49 = vsub.f32 %v2085_v34, %v2096_v47  ;;  %4344 = vmatpush3.bf16.msra.mxu0 %v2116_v33 }
0x1718   :  { %4355 = vmatprep.subr.bf16.mxu0 %v4811_v8 }
0x1719   :  { %v2101_v50 = vmul.f32 1.442695, %v2098_v49 }
0x171a   :  { %v4553_v11 = vpop.permute.xlu1 %4552 }
0x171b   :  { %4672 = vpow2.f32 %v2101_v50  ;;  %v4555_v14 = vunpack.i.h.bf16 %v4553_v11  ;;  %v4554_v15 = vunpack.i.l.bf16 %v4553_v11  ;;  %v4592_v50 = vld [vmem:[#allocation4 + $0x58] sm:$0xff]  }
0x171d   :  { %v2232_v20 = vsel %vm169_vm2, %v5156_v48, %v4555_v14  ;;  %v2231_v21 = vsel %vm169_vm2, %v5154_v46, %v4554_v15  ;;  %v3924_v48 = vld [vmem:[#allocation6 + $0x48] ss:$0 sm:$0xff] }
0x171e   :  { %v4558_v13 = vpop.permute.xlu1 %4557 }
0x171f   :  { %v4560_v17 = vunpack.i.h.bf16 %v4558_v13  ;;  %v4559_v6 = vunpack.i.l.bf16 %v4558_v13 }
0x1721   :  { %v4671_v56 = vpop.eup %4670  ;;  %v2233_v63 = vsel %vm1072_vm4, %v2231_v21, %v4559_v6  ;;  %v2234_v3 = vsel %vm1072_vm4, %v2232_v20, %v4560_v17 }
0x1722   :  { %v2103_v51 = vsel %vm1072_vm4, %v4671_v56, 0.0 }
0x1723   :  { %2104 = vadd.xlane.f32.xlu0 %v2103_v51 }
0x1725   :  { %v4673_v31 = vpop.eup %4672 }
0x1726   :  { %v2106_v35 = vsel %vm1072_vm4, %v4673_v31, 0.0 }
0x1727   :  { %2107 = vadd.xlane.f32.xlu0 %v2106_v35 }
0x173d   :  { %2161 = vrot.lane.b32.xlu0 %v5098_v55, %s4820_s30  ;;  %v4590_v55 = vld [vmem:[#allocation4 + $0x48] sm:$0xff]  }
0x17b0   :  { %v2105_v36 = vpop.xlane.xlu0 %2104 }
0x17b1   :  { %4674 = vrcp.f32 %v2105_v36 }
0x17b4   :  { %v2108_v52 = vpop.xlane.xlu0 %2107 }
0x17b5   :  { %4676 = vrcp.f32 %v2108_v52 }
0x17b8   :  { %v2162_v53 = vpop.permute.xlu0 %2161 }
0x17b9   :  { %4350 = vmatpush3.bf16.msra.mxu1 %v2162_v53 }
0x17ba   :  { %4363 = vmatprep.subr.bf16.mxu1 %v4811_v8 }
0x17bb   :  { %v4675_v54 = vpop.eup %4674 }
0x17bc   :  { %v2111_v57 = vmul.f32 %v4675_v54, %v4671_v56 }
0x17be   :  { %v2113_v58 = vpack.c.bf16 %v2111_v57, %v2111_v57  ;;  %v3928_v57 = vld [vmem:[#allocation6 + $0x50] ss:$0 sm:$0xff] }
0x17bf   :  { %v4677_v59 = vpop.eup %4676 }
0x17c0   :  { %v2112_v60 = vmul.f32 %v4677_v59, %v4673_v31  ;;  %4346 = vmatmul.mubr.msk.bf16.vlgmr.msra.gmra.mrb[72].mxu0 %vm1072_vm4, %v2113_v58 }
0x17c1   :  { %4359 = vmatprep.mubr.msk.bf16.mxu0 %vm4812_vm1, %v4811_v8  ;;  %4356 = vmatpush3.bf16.msra.mxu0 %v4590_v55 }
0x17c2   :  { %v2114_v61 = vpack.c.bf16 %v2112_v60, %v2112_v60  ;;  %4357 = vmatprep.subr.bf16.mxu0 %v4811_v8 }
0x17c4   :  { %4352 = vmatmul.mubr.msk.bf16.vlgmr.msra.gmra.mrb[64].mxu1 %vm1072_vm4, %v2114_v61  ;;  %v3929_v61 = vld [vmem:[#allocation6 + $0x58] ss:$0 sm:$0xff] }
0x17c5   :  { %4367 = vmatprep.mubr.msk.bf16.mxu1 %vm4812_vm1, %v4811_v8  ;;  %4358 = vmatpush3.bf16.msra.mxu0 %v4591_v62 }
0x17c6   :  { %4371 = vmatprep.subr.bf16.mxu0 %v4811_v8  ;;  %4364 = vmatpush3.bf16.msra.mxu1 %v4592_v50 }
0x17c7   :  { %4365 = vmatprep.subr.bf16.mxu1 %v4811_v8 }
0x1893   :  { %v2155_v16 = vpop.f32.mrb[72].mxu0 }
0x1894   :  { %v4347_v0 = vpop.f32.mrb[73].mxu0 }
0x1895   :  { %v2158_v1 = vpop.f32.mrb[74].mxu0 }
0x1896   :  { %v4348_v2 = vpop.f32.mrb[75].mxu0  ;;  %v4594_v1 = vld [vmem:[#allocation4 + $0x68] sm:$0xff]  }
0x1897   :  { %v2201_v12 = vpop.f32.mrb[64].mxu1  ;;  %v4595_v2 = vld [vmem:[#allocation4 + $0x70] sm:$0xff]  }
0x1898   :  { %v4561_v5 = vpack.i.bf16 %v2201_v12, %v2155_v16  ;;  %v4353_v7 = vpop.f32.mrb[65].mxu1  ;;  %v4596_v12 = vld [vmem:[#allocation4 + $0x78] sm:$0xff]  }
0x1899   :  { %v2204_v9 = vpop.f32.mrb[66].mxu1  ;;  %v3930_v7 = vld [vmem:[#allocation6 + $0x60] ss:$0 sm:$0xff] }
0x189a   :  { %v4354_v10 = vpop.f32.mrb[67].mxu1  ;;  %4562 = vrot.lane.b32.xlu1 %v4561_v5, %s4824_s7  ;;  %v4597_v5 = vld [vmem:[#allocation4 + $0x80] sm:$0xff]  }
0x190c   :  { %v4563_v19 = vpop.permute.xlu1 %4562 }
0x190d   :  { %v4565_v28 = vunpack.i.h.bf16 %v4563_v19  ;;  %v4564_v18 = vunpack.i.l.bf16 %v4563_v19 }
0x190f   :  { %v2236_v4 = vsel %vm1075_vm5, %v2234_v3, %v4565_v28  ;;  %v2235_v22 = vsel %vm1075_vm5, %v2233_v63, %v4564_v18 }
0x1910   :  { %v2237_v23 = vpack.c.bf16 %v2236_v4, %v2235_v22 }
0x1912   :  { %4360 = vmatmul.mubr.msk.bf16.vlgmr.msra.gmra.mrb[76].mxu0 %vm61_vm0, %v2237_v23 }
0x1913   :  { %4379 = vmatprep.mubr.msk.bf16.mxu0 %vm4812_vm1, %v4811_v8  ;;  %4372 = vmatpush3.bf16.msra.mxu0 %v4594_v1 }
0x1914   :  { %4373 = vmatprep.subr.bf16.mxu0 %v4811_v8 }
0x1917   :  { %4374 = vmatpush3.bf16.msra.mxu0 %v4595_v2 }
0x1918   :  { %4375 = vmatprep.subr.bf16.mxu0 %v4811_v8 }
0x191b   :  { %4376 = vmatpush3.bf16.msra.mxu0 %v4596_v12  ;;  %v3941_v12 = vld [vmem:[#allocation6 + $0x78] ss:$0 sm:$0xff] }
0x191c   :  { %4377 = vmatprep.subr.bf16.mxu0 %v4811_v8 }
0x191f   :  { %4378 = vmatpush3.bf16.msra.mxu0 %v4597_v5 }
0x1920   :  { %4397 = vmatprep.subr.bf16.mxu0 %v4811_v8 }
0x19e5   :  { %v2296_v24 = vpop.f32.mrb[76].mxu0 }
0x19e6   :  { %v2297_v26 = vadd.f32 %v3924_v48, %v2296_v24  ;;  %v4361_v46 = vpop.f32.mrb[77].mxu0 }
0x19e7   :  { %v2299_v27 = vpop.f32.mrb[78].mxu0 }
0x19e8   :  { %v2300_v29 = vadd.f32 %v3924_v48, %v2299_v27  ;;  %v4362_v30 = vpop.f32.mrb[79].mxu0  ;;  %v2303_v32 = vadd.f32 %v2297_v26, %v5089_v44 }
0x19ea   :  { %v2305_v25 = vsel %vm61_vm0, %v2303_v32, 0.0  ;;  %v2304_v34 = vadd.f32 %v2300_v29, %v5091_v45  ;;  %v4593_v45 = vld [vmem:[#allocation4 + $0x60] sm:$0xff]  }
0x19eb   :  { %2306 = vadd.xlane.f32.xlu0 %v2305_v25  ;;  %4366 = vmatpush3.bf16.msra.mxu1 %v4593_v45 }
0x19ec   :  { %v2308_v37 = vsel %vm61_vm0, %v2304_v34, 0.0  ;;  %4383 = vmatprep.subr.bf16.mxu1 %v4811_v8 }
0x19ed   :  { %2309 = vadd.xlane.f32.xlu1 %v2308_v37 }
0x1a78   :  { %v2307_v38 = vpop.xlane.xlu0 %2306 }
0x1a79   :  { %v2311_v39 = vmul.f32 0.03125, %v2307_v38 }
0x1a7a   :  { %v2310_v40 = vpop.xlane.xlu1 %2309 }
0x1a7b   :  { %v2313_v41 = vsub.f32 %v2303_v32, %v2311_v39  ;;  %v2312_v42 = vmul.f32 0.03125, %v2310_v40  ;;  %v3934_v32 = vld [vmem:[#allocation6 + $0x68] ss:$0 sm:$0xff] }
0x1a7d   :  { %v2314_v43 = vsub.f32 %v2304_v34, %v2312_v42  ;;  %v2315_v47 = vmul.f32 %v2313_v41, %v2313_v41 }
0x1a7f   :  { %v2317_v33 = vsel %vm61_vm0, %v2315_v47, 0.0  ;;  %v2316_v49 = vmul.f32 %v2314_v43, %v2314_v43 }
0x1a80   :  { %2318 = vadd.xlane.f32.xlu0 %v2317_v33 }
0x1a81   :  { %v2320_v44 = vsel %vm61_vm0, %v2316_v49, 0.0 }
0x1a84   :  { %2321 = vadd.xlane.f32.xlu0 %v2320_v44 }
0x1b0d   :  { %v2319_v56 = vpop.xlane.xlu0 %2318 }
0x1b0e   :  { %v2323_v51 = vmul.f32 0.03125, %v2319_v56 }
0x1b10   :  { %v2325_v31 = vadd.f32 1e-12, %v2323_v51 }
0x1b11   :  { %v2322_v35 = vpop.xlane.xlu0 %2321 }
0x1b12   :  { %4678 = vrsqrt.f32 %v2325_v31  ;;  %v2324_v36 = vmul.f32 0.03125, %v2322_v35 }
0x1b14   :  { %v2326_v52 = vadd.f32 1e-12, %v2324_v36 }
0x1b16   :  { %4680 = vrsqrt.f32 %v2326_v52  ;;  %v4598_v52 = vld [vmem:[#allocation4 + $0x88] sm:$0xff]  }
0x1b1c   :  { %v4679_v53 = vpop.eup %4678 }
0x1b1d   :  { %v2329_v54 = vmul.f32 %v4679_v53, %v2313_v41  ;;  %v4599_v53 = vld [vmem:[#allocation4 + $0x90] sm:$0xff]  }
0x1b1f   :  { %v2336_v59 = vmul.f32 %v3928_v57, %v2329_v54 }
0x1b20   :  { %v4681_v58 = vpop.eup %4680 }
0x1b21   :  { %v2330_v60 = vmul.f32 %v4681_v58, %v2314_v43  ;;  %v2343_v62 = vadd.f32 %v3929_v61, %v2336_v59 }
0x1b23   :  { %v2337_v55 = vmul.f32 %v3928_v57, %v2330_v60 }
0x1b25   :  { %v2344_v16 = vadd.f32 %v3929_v61, %v2337_v55 }
0x1b27   :  { %v2345_v0 = vpack.c.bf16 %v2344_v16, %v2343_v62 }
0x1b29   :  { %4368 = vmatmul.mubr.msk.bf16.vlgmr.msra.gmra.mrb[68].mxu1 %vm61_vm0, %v2345_v0 }
0x1b2a   :  { %4387 = vmatprep.mubr.msk.bf16.mxu1 %vm4812_vm1, %v4811_v8  ;;  %4384 = vmatpush3.bf16.msra.mxu1 %v4598_v52 }
0x1b2b   :  { %4385 = vmatprep.subr.bf16.mxu1 %v4811_v8 }
0x1b2e   :  { %4386 = vmatpush3.bf16.msra.mxu1 %v4599_v53 }
0x1b2f   :  { %4391 = vmatprep.subr.bf16.mxu1 %v4811_v8 }
0x1bfc   :  { %v2404_v9 = vpop.f32.mrb[68].mxu1 }
0x1bfd   :  { %v2405_v10 = vadd.f32 %v3930_v7, %v2404_v9  ;;  %v4369_v11 = vpop.f32.mrb[69].mxu1 }
0x1bfe   :  { %v2407_v13 = vpop.f32.mrb[70].mxu1  ;;  %v3942_v11 = vld [vmem:[#allocation6 + $0x80] ss:$0 sm:$0xff] }
0x1bff   :  { %v2413_v14 = vmul.f32 0.044715, %v2405_v10  ;;  %v2408_v15 = vadd.f32 %v3930_v7, %v2407_v13  ;;  %v4370_v17 = vpop.f32.mrb[71].mxu1  ;;  %v2411_v24 = vmul.f32 0.5, %v2405_v10 }
0x1c01   :  { %v2415_v6 = vmul.f32 %v2413_v14, %v2405_v10  ;;  %v2414_v19 = vmul.f32 0.044715, %v2408_v15  ;;  %v2412_v26 = vmul.f32 0.5, %v2408_v15 }
0x1c03   :  { %v2417_v20 = vmul.f32 %v2415_v6, %v2405_v10  ;;  %v2416_v21 = vmul.f32 %v2414_v19, %v2408_v15 }
0x1c05   :  { %v2419_v28 = vadd.f32 %v2417_v20, %v2405_v10  ;;  %v2418_v18 = vmul.f32 %v2416_v21, %v2408_v15 }
0x1c07   :  { %v2421_v63 = vmul.f32 0.7978846, %v2419_v28  ;;  %v2420_v3 = vadd.f32 %v2418_v18, %v2408_v15 }
0x1c09   :  { %4682 = vtanh.f32 %v2421_v63  ;;  %v2422_v4 = vmul.f32 0.7978846, %v2420_v3 }
0x1c0b   :  { %4684 = vtanh.f32 %v2422_v4 }
0x1c13   :  { %v4683_v22 = vpop.eup %4682 }
0x1c14   :  { %v2425_v23 = vadd.f32 1.0, %v4683_v22 }
0x1c15   :  { %v4685_v48 = vpop.eup %4684 }
0x1c16   :  { %v2426_v46 = vadd.f32 1.0, %v4685_v48  ;;  %v2427_v27 = vmul.f32 %v2425_v23, %v2411_v24 }
0x1c18   :  { %v2428_v29 = vmul.f32 %v2426_v46, %v2412_v26 }
0x1c1a   :  { %v2429_v30 = vpack.c.bf16 %v2428_v29, %v2427_v27 }
0x1c1c   :  { %4380 = vmatmul.mubr.msk.bf16.vlgmr.msra.gmra.mrb[80].mxu0 %vm2467_vm7, %v2429_v30 }
0x1c1d   :  { %4399 = vmatprep.mubr.msk.bf16.mxu0 %vm4812_vm1, %v4811_v8 }
0x1cef   :  { %v2505_v25 = vpop.f32.mrb[80].mxu0 }
0x1cf0   :  { %v2506_v34 = vadd.f32 %v3934_v32, %v2505_v25  ;;  %v4381_v37 = vpop.f32.mrb[81].mxu0 }
0x1cf1   :  { %v2508_v38 = vpop.f32.mrb[82].mxu0 }
0x1cf2   :  { %v2512_v39 = vadd.f32 %v2506_v34, %v2343_v62  ;;  %v2509_v40 = vadd.f32 %v3934_v32, %v2508_v38  ;;  %v4382_v41 = vpop.f32.mrb[83].mxu0  ;;  %v3940_v62 = vld [vmem:[#allocation6 + $0x70] ss:$0 sm:$0xff] }
0x1cf4   :  { %v2514_v42 = vsel %vm61_vm0, %v2512_v39, 0.0  ;;  %v2513_v43 = vadd.f32 %v2509_v40, %v2344_v16 }
0x1cf5   :  { %2515 = vadd.xlane.f32.xlu0 %v2514_v42 }
0x1cf6   :  { %v2517_v47 = vsel %vm61_vm0, %v2513_v43, 0.0 }
0x1cf7   :  { %2518 = vadd.xlane.f32.xlu1 %v2517_v47 }
0x1d82   :  { %v2516_v33 = vpop.xlane.xlu0 %2515 }
0x1d83   :  { %v2520_v49 = vmul.f32 0.03125, %v2516_v33 }
0x1d84   :  { %v2519_v44 = vpop.xlane.xlu1 %2518 }
0x1d85   :  { %v2522_v50 = vsub.f32 %v2512_v39, %v2520_v49  ;;  %v2521_v45 = vmul.f32 0.03125, %v2519_v44 }
0x1d87   :  { %v2523_v56 = vsub.f32 %v2513_v43, %v2521_v45  ;;  %v2524_v51 = vmul.f32 %v2522_v50, %v2522_v50 }
0x1d89   :  { %v2526_v31 = vsel %vm61_vm0, %v2524_v51, 0.0  ;;  %v2525_v35 = vmul.f32 %v2523_v56, %v2523_v56 }
0x1d8a   :  { %2527 = vadd.xlane.f32.xlu0 %v2526_v31 }
0x1d8b   :  { %v2529_v36 = vsel %vm61_vm0, %v2525_v35, 0.0 }
0x1d8c   :  { %2530 = vadd.xlane.f32.xlu1 %v2529_v36 }
0x1e17   :  { %v2528_v54 = vpop.xlane.xlu0 %2527 }
0x1e18   :  { %v2532_v57 = vmul.f32 0.03125, %v2528_v54 }
0x1e19   :  { %v2531_v58 = vpop.xlane.xlu1 %2530 }
0x1e1a   :  { %v2534_v59 = vadd.f32 1e-12, %v2532_v57  ;;  %v2533_v60 = vmul.f32 0.03125, %v2531_v58 }
0x1e1c   :  { %4686 = vrsqrt.f32 %v2534_v59  ;;  %v2535_v61 = vadd.f32 1e-12, %v2533_v60 }
0x1e1e   :  { %4688 = vrsqrt.f32 %v2535_v61 }
0x1e26   :  { %v4687_v55 = vpop.eup %4686 }
0x1e27   :  { %v2538_v16 = vmul.f32 %v4687_v55, %v2522_v50 }
0x1e28   :  { %v4689_v0 = vpop.eup %4688 }
0x1e29   :  { %v2545_v1 = vmul.f32 %v3940_v62, %v2538_v16  ;;  %v2539_v2 = vmul.f32 %v4689_v0, %v2523_v56 }
0x1e2b   :  { %v2546_v5 = vmul.f32 %v3940_v62, %v2539_v2  ;;  %v5291_v7 = vadd.f32 %v3941_v12, %v2545_v1 }
0x1e2d   :  { %v5293_v9 = vadd.f32 %v3941_v12, %v2546_v5 }
0x1e2f   :  { %v2554_v10 = vpack.c.bf16 %v5293_v9, %v5291_v7 }
0x1e31   :  { %4388 = vmatmul.mubr.msk.bf16.vlgmr.msra.gmra.mrb[72].mxu1 %vm61_vm0, %v2554_v10 }
0x1e32   :  { %4393 = vmatprep.mubr.msk.bf16.mxu1 %vm4812_vm1, %v4811_v8 }
0x1f04   :  { %v2613_v13 = vpop.f32.mrb[72].mxu1 }
0x1f05   :  { %v2614_v14 = vadd.f32 %v3942_v11, %v2613_v13  ;;  %v4389_v15 = vpop.f32.mrb[73].mxu1 }
0x1f06   :  { %v2616_v17 = vpop.f32.mrb[74].mxu1 }
0x1f07   :  { %v5300_v6 = vpack.c.bf16 %v2614_v14, %v2614_v14  ;;  %v2617_v19 = vadd.f32 %v3942_v11, %v2616_v17  ;;  %v4390_v20 = vpop.f32.mrb[75].mxu1  ;;  %v2620_v3 = vmul.f32 0.35355338, %v2614_v14 }
0x1f09   :  { %v5302_v21 = vpack.c.bf16 %v2617_v19, %v2617_v19  ;;  %2633 = vrot.lane.b32.xlu0 %v5300_v6, %s4813_s2  ;;  %v2621_v22 = vmul.f32 0.35355338, %v2617_v19  ;;  %v5312_v23 = vpack.c.bf16 %v2620_v3, %v2620_v3 }
0x1f0b   :  { %2682 = vrot.lane.b32.xlu1 %v5302_v21, %s4813_s2  ;;  %v5314_v48 = vpack.c.bf16 %v2621_v22, %v2621_v22 }
0x1f7b   :  { %v2634_v28 = vpop.permute.xlu0 %2633 }
0x1f7c   :  { %v2639_v18 = vsel %vm169_vm2, %v2634_v28, 0 }
0x1f7d   :  { %4392 = vmatpush3.bf16.xpose.msra.mxu1 %v2639_v18  ;;  %v2683_v63 = vpop.permute.xlu1 %2682 }
0x1f7e   :  { %v2688_v4 = vsel %vm169_vm2, %v2683_v63, 0  ;;  %4403 = vmatprep.subr.bf16.mxu1 %v4811_v8 }
0x1f7f   :  { %4398 = vmatpush3.bf16.xpose.msra.mxu0 %v2688_v4 }
0x1f80   :  { %4409 = vmatprep.subr.bf16.mxu0 %v4811_v8 }
0x1f84   :  { %4394 = vmatmul.mubr.msk.bf16.vlgmr.msra.gmra.mrb[76].mxu1 %vm169_vm2, %v5312_v23 }
0x1f85   :  { %4405 = vmatprep.mubr.msk.bf16.mxu1 %vm4812_vm1, %v4811_v8 }
0x1f86   :  { %4400 = vmatmul.mubr.msk.bf16.vlgmr.msra.gmra.mrb[84].mxu0 %vm169_vm2, %v5314_v48 }
0x1f87   :  { %4411 = vmatprep.mubr.msk.bf16.mxu0 %vm4812_vm1, %v4811_v8 }
0x2057   :  { %v2675_v24 = vpop.f32.mrb[76].mxu1 }
0x2058   :  { %v4395_v26 = vpop.f32.mrb[77].mxu1  ;;  %v2730_v46 = vsel %vm169_vm2, %v2675_v24, -inf }
0x2059   :  { %2731 = vmax.xlane.f32.xlu1 %v2730_v46  ;;  %v2678_v27 = vpop.f32.mrb[78].mxu1  ;;  %v2724_v29 = vpop.f32.mrb[84].mxu0 }
0x205a   :  { %v4396_v30 = vpop.f32.mrb[79].mxu1  ;;  %v4401_v32 = vpop.f32.mrb[85].mxu0  ;;  %v2733_v25 = vsel %vm169_vm2, %v2724_v29, -inf }
0x205b   :  { %2734 = vmax.xlane.f32.xlu0 %v2733_v25  ;;  %v2727_v34 = vpop.f32.mrb[86].mxu0 }
0x205c   :  { %v4402_v37 = vpop.f32.mrb[87].mxu0 }
0x206a   :  { %2802 = vrot.lane.b32.xlu1 %v5302_v21, %s4805_s22 }
0x206e   :  { %2852 = vrot.lane.b32.xlu1 %v5300_v6, %s4814_s24 }
0x20e6   :  { %v2732_v38 = vpop.xlane.xlu1 %2731 }
0x20e7   :  { %v2736_v39 = vsub.f32 %v2675_v24, %v2732_v38 }
0x20e8   :  { %v2735_v40 = vpop.xlane.xlu0 %2734 }
0x20e9   :  { %v2738_v41 = vmul.f32 1.442695, %v2736_v39  ;;  %v2737_v42 = vsub.f32 %v2724_v29, %v2735_v40 }
0x20ea   :  { %v2803_v43 = vpop.permute.xlu1 %2802 }
0x20eb   :  { %4690 = vpow2.f32 %v2738_v41  ;;  %v2740_v47 = vmul.f32 1.442695, %v2737_v42  ;;  %v2808_v33 = vsel %vm294_vm3, %v2803_v43, 0 }
0x20ec   :  { %4410 = vmatpush3.bf16.msra.mxu0 %v2808_v33 }
0x20ed   :  { %4692 = vpow2.f32 %v2740_v47  ;;  %4421 = vmatprep.subr.bf16.mxu0 %v4811_v8 }
0x20ee   :  { %v2853_v56 = vpop.permute.xlu1 %2852 }
0x20ef   :  { %v2858_v60 = vsel %vm169_vm2, %v2853_v56, 0 }
0x20f5   :  { %v4691_v49 = vpop.eup %4690 }
0x20f6   :  { %v2742_v44 = vsel %vm169_vm2, %v4691_v49, 0.0 }
0x20f7   :  { %v4693_v50 = vpop.eup %4692  ;;  %2743 = vadd.xlane.f32.xlu0 %v2742_v44 }
0x20f8   :  { %v2745_v45 = vsel %vm169_vm2, %v4693_v50, 0.0 }
0x20f9   :  { %2746 = vadd.xlane.f32.xlu1 %v2745_v45 }
0x210a   :  { %2902 = vrot.lane.b32.xlu1 %v5302_v21, %s4814_s24 }
0x210d   :  { %2754 = vrot.lane.b32.xlu0 %v5300_v6, %s4805_s22 }
0x210e   :  { %2900 = vrot.lane.b32.xlu1 %v5314_v48, %s4815_s25 }
0x2111   :  { %2850 = vrot.lane.b32.xlu0 %v5312_v23, %s4815_s25 }
0x2184   :  { %v2744_v51 = vpop.xlane.xlu0 %2743 }
0x2185   :  { %4694 = vrcp.f32 %v2744_v51 }
0x2186   :  { %v2747_v31 = vpop.xlane.xlu1 %2746 }
0x2187   :  { %4696 = vrcp.f32 %v2747_v31 }
0x2188   :  { %v2755_v35 = vpop.permute.xlu0 %2754 }
0x2189   :  { %v2760_v36 = vsel %vm294_vm3, %v2755_v35, 0 }
0x218a   :  { %4404 = vmatpush3.bf16.msra.mxu1 %v2760_v36  ;;  %v2903_v59 = vpop.permute.xlu1 %2902 }
0x218b   :  { %4415 = vmatprep.subr.bf16.mxu1 %v4811_v8  ;;  %v2908_v55 = vsel %vm169_vm2, %v2903_v59, 0 }
0x218c   :  { %v2851_v62 = vpop.permute.xlu0 %2850 }
0x218e   :  { %v2901_v16 = vpop.permute.xlu1 %2900 }
0x218f   :  { %v4695_v52 = vpop.eup %4694 }
0x2190   :  { %v2750_v53 = vmul.f32 %v4695_v52, %v4691_v49 }
0x2191   :  { %v4697_v54 = vpop.eup %4696 }
0x2192   :  { %v2751_v57 = vmul.f32 %v4697_v54, %v4693_v50  ;;  %v2752_v58 = vpack.c.bf16 %v2750_v53, %v2750_v53 }
0x2194   :  { %4406 = vmatmul.mubr.msk.bf16.vlgmr.msra.gmra.mrb[80].mxu1 %vm169_vm2, %v2752_v58  ;;  %v2753_v61 = vpack.c.bf16 %v2751_v57, %v2751_v57 }
0x2195   :  { %4416 = vmatpush3.bf16.xpose.msra.mxu1 %v2858_v60  ;;  %4417 = vmatprep.mubr.msk.bf16.mxu1 %vm4812_vm1, %v4811_v8 }
0x2196   :  { %4412 = vmatmul.mubr.msk.bf16.vlgmr.msra.gmra.mrb[88].mxu0 %vm169_vm2, %v2753_v61  ;;  %4427 = vmatprep.subr.bf16.mxu1 %v4811_v8 }
0x2197   :  { %4422 = vmatpush3.bf16.xpose.msra.mxu0 %v2908_v55  ;;  %4423 = vmatprep.mubr.msk.bf16.mxu0 %vm4812_vm1, %v4811_v8 }
0x2198   :  { %4433 = vmatprep.subr.bf16.mxu0 %v4811_v8 }
0x219c   :  { %4418 = vmatmul.mubr.msk.bf16.vlgmr.msra.gmra.mrb[84].mxu1 %vm169_vm2, %v2851_v62 }
0x219d   :  { %4429 = vmatprep.mubr.msk.bf16.mxu1 %vm4812_vm1, %v4811_v8 }
0x219e   :  { %4424 = vmatmul.mubr.msk.bf16.vlgmr.msra.gmra.mrb[92].mxu0 %vm169_vm2, %v2901_v16 }
0x219f   :  { %4435 = vmatprep.mubr.msk.bf16.mxu0 %vm4812_vm1, %v4811_v8 }
0x2267   :  { %v5360_v0 = vpop.f32.mrb[80].mxu1 }
0x2268   :  { %v4407_v1 = vpop.f32.mrb[81].mxu1 }
0x2269   :  { %v2799_v2 = vpop.f32.mrb[82].mxu1  ;;  %v5362_v12 = vpop.f32.mrb[88].mxu0 }
0x226a   :  { %v4408_v5 = vpop.f32.mrb[83].mxu1  ;;  %v4413_v10 = vpop.f32.mrb[89].mxu0 }
0x226b   :  { %v2847_v11 = vpop.f32.mrb[90].mxu0 }
0x226c   :  { %v4414_v13 = vpop.f32.mrb[91].mxu0 }
0x226f   :  { %v2894_v14 = vpop.f32.mrb[84].mxu1 }
0x2270   :  { %v4419_v15 = vpop.f32.mrb[85].mxu1  ;;  %v2950_v17 = vsel %vm169_vm2, %v2894_v14, -inf }
0x2271   :  { %2951 = vmax.xlane.f32.xlu0 %v2950_v17  ;;  %v2897_v19 = vpop.f32.mrb[86].mxu1  ;;  %v2944_v20 = vpop.f32.mrb[92].mxu0 }
0x2272   :  { %v4420_v28 = vpop.f32.mrb[87].mxu1  ;;  %v4425_v18 = vpop.f32.mrb[93].mxu0  ;;  %v2953_v63 = vsel %vm169_vm2, %v2944_v20, -inf }
0x2273   :  { %2954 = vmax.xlane.f32.xlu1 %v2953_v63  ;;  %v2947_v3 = vpop.f32.mrb[94].mxu0 }
0x2274   :  { %v4426_v4 = vpop.f32.mrb[95].mxu0 }
0x2284   :  { %3022 = vrot.lane.b32.xlu1 %v5302_v21, %s4816_s26 }
0x2288   :  { %3072 = vrot.lane.b32.xlu1 %v5300_v6, %s4817_s27 }
0x228c   :  { %3122 = vrot.lane.b32.xlu1 %v5302_v21, %s4817_s27 }
0x2290   :  { %3120 = vrot.lane.b32.xlu1 %v5314_v48, %s4818_s28 }
0x22fe   :  { %v2952_v22 = vpop.xlane.xlu0 %2951 }
0x22ff   :  { %v2956_v24 = vsub.f32 %v2894_v14, %v2952_v22 }
0x2300   :  { %v2955_v26 = vpop.xlane.xlu1 %2954 }
0x2301   :  { %v2958_v46 = vmul.f32 1.442695, %v2956_v24  ;;  %v2957_v27 = vsub.f32 %v2944_v20, %v2955_v26 }
0x2303   :  { %4698 = vpow2.f32 %v2958_v46  ;;  %v2960_v29 = vmul.f32 1.442695, %v2957_v27 }
0x2304   :  { %v3023_v30 = vpop.permute.xlu1 %3022 }
0x2305   :  { %4700 = vpow2.f32 %v2960_v29  ;;  %v3028_v32 = vsel %vm294_vm3, %v3023_v30, 0 }
0x2306   :  { %4434 = vmatpush3.bf16.msra.mxu0 %v3028_v32 }
0x2307   :  { %4445 = vmatprep.subr.bf16.mxu0 %v4811_v8 }
0x2308   :  { %v3073_v47 = vpop.permute.xlu1 %3072 }
0x2309   :  { %v3078_v56 = vsel %vm169_vm2, %v3073_v47, 0 }
0x230c   :  { %v3123_v45 = vpop.permute.xlu1 %3122 }
0x230d   :  { %v4699_v25 = vpop.eup %4698  ;;  %v3128_v31 = vsel %vm169_vm2, %v3123_v45, 0 }
0x230e   :  { %v2962_v34 = vsel %vm169_vm2, %v4699_v25, 0.0 }
0x230f   :  { %v4701_v37 = vpop.eup %4700  ;;  %2963 = vadd.xlane.f32.xlu0 %v2962_v34 }
0x2310   :  { %v2965_v38 = vsel %vm169_vm2, %v4701_v37, 0.0  ;;  %v3121_v36 = vpop.permute.xlu1 %3120 }
0x2313   :  { %2966 = vadd.xlane.f32.xlu0 %v2965_v38 }
0x2329   :  { %2974 = vrot.lane.b32.xlu0 %v5300_v6, %s4816_s26 }
0x232d   :  { %3070 = vrot.lane.b32.xlu0 %v5312_v23, %s4818_s28 }
0x239c   :  { %v2964_v39 = vpop.xlane.xlu0 %2963 }
0x239d   :  { %4702 = vrcp.f32 %v2964_v39 }
0x23a0   :  { %v2967_v40 = vpop.xlane.xlu0 %2966 }
0x23a1   :  { %4704 = vrcp.f32 %v2967_v40 }
0x23a4   :  { %v2975_v41 = vpop.permute.xlu0 %2974 }
0x23a5   :  { %v2980_v42 = vsel %vm294_vm3, %v2975_v41, 0 }
0x23a6   :  { %4428 = vmatpush3.bf16.msra.mxu1 %v2980_v42 }
0x23a7   :  { %v4703_v43 = vpop.eup %4702  ;;  %4439 = vmatprep.subr.bf16.mxu1 %v4811_v8 }
0x23a8   :  { %v2970_v33 = vmul.f32 %v4703_v43, %v4699_v25  ;;  %v3071_v35 = vpop.permute.xlu0 %3070 }
0x23aa   :  { %v2972_v49 = vpack.c.bf16 %v2970_v33, %v2970_v33 }
0x23ab   :  { %v4705_v44 = vpop.eup %4704 }
0x23ac   :  { %v2971_v50 = vmul.f32 %v4705_v44, %v4701_v37  ;;  %4430 = vmatmul.mubr.msk.bf16.vlgmr.msra.gmra.mrb[88].mxu1 %vm169_vm2, %v2972_v49 }
0x23ad   :  { %4441 = vmatprep.mubr.msk.bf16.mxu1 %vm4812_vm1, %v4811_v8 }
0x23ae   :  { %v2973_v51 = vpack.c.bf16 %v2971_v50, %v2971_v50 }
0x23af   :  { %4440 = vmatpush3.bf16.xpose.msra.mxu1 %v3078_v56 }
0x23b0   :  { %4436 = vmatmul.mubr.msk.bf16.vlgmr.msra.gmra.mrb[96].mxu0 %vm169_vm2, %v2973_v51  ;;  %4451 = vmatprep.subr.bf16.mxu1 %v4811_v8 }
0x23b1   :  { %4446 = vmatpush3.bf16.xpose.msra.mxu0 %v3128_v31  ;;  %4447 = vmatprep.mubr.msk.bf16.mxu0 %vm4812_vm1, %v4811_v8 }
0x23b2   :  { %4457 = vmatprep.subr.bf16.mxu0 %v4811_v8 }
0x23b6   :  { %4442 = vmatmul.mubr.msk.bf16.vlgmr.msra.gmra.mrb[92].mxu1 %vm169_vm2, %v3071_v35 }
0x23b7   :  { %4453 = vmatprep.mubr.msk.bf16.mxu1 %vm4812_vm1, %v4811_v8 }
0x23b8   :  { %4448 = vmatmul.mubr.msk.bf16.vlgmr.msra.gmra.mrb[100].mxu0 %vm169_vm2, %v3121_v36 }
0x23b9   :  { %4459 = vmatprep.mubr.msk.bf16.mxu0 %vm4812_vm1, %v4811_v8 }
0x247f   :  { %v5400_v52 = vpop.f32.mrb[88].mxu1 }
0x2480   :  { %v4431_v53 = vpop.f32.mrb[89].mxu1 }
0x2481   :  { %v3019_v54 = vpop.f32.mrb[90].mxu1 }
0x2482   :  { %v4432_v57 = vpop.f32.mrb[91].mxu1 }
0x2483   :  { %v5402_v58 = vpop.f32.mrb[96].mxu0 }
0x2484   :  { %v4566_v59 = vpack.i.bf16 %v5402_v58, %v5400_v52  ;;  %v4437_v60 = vpop.f32.mrb[97].mxu0 }
0x2485   :  { %v3067_v61 = vpop.f32.mrb[98].mxu0 }
0x2486   :  { %v4438_v55 = vpop.f32.mrb[99].mxu0 }
0x2489   :  { %v3114_v62 = vpop.f32.mrb[92].mxu1 }
0x248a   :  { %v4443_v16 = vpop.f32.mrb[93].mxu1  ;;  %v3170_v1 = vsel %vm169_vm2, %v3114_v62, -inf }
0x248b   :  { %3171 = vmax.xlane.f32.xlu0 %v3170_v1  ;;  %v3117_v2 = vpop.f32.mrb[94].mxu1  ;;  %v3164_v5 = vpop.f32.mrb[100].mxu0 }
0x248c   :  { %v4444_v10 = vpop.f32.mrb[95].mxu1  ;;  %v4449_v11 = vpop.f32.mrb[101].mxu0  ;;  %v3173_v13 = vsel %vm169_vm2, %v3164_v5, -inf }
0x248d   :  { %3174 = vmax.xlane.f32.xlu1 %v3173_v13  ;;  %v3167_v14 = vpop.f32.mrb[102].mxu0 }
0x248e   :  { %v4450_v15 = vpop.f32.mrb[103].mxu0 }
0x249e   :  { %3242 = vrot.lane.b32.xlu1 %v5302_v21, %s4819_s29 }
0x24a2   :  { %3292 = vrot.lane.b32.xlu1 %v5300_v6, %s4820_s30 }
0x24a6   :  { %3342 = vrot.lane.b32.xlu1 %v5302_v21, %s4820_s30 }
0x24aa   :  { %3340 = vrot.lane.b32.xlu1 %v5314_v48, %s4821_s4 }
0x2518   :  { %v3172_v17 = vpop.xlane.xlu0 %3171 }
0x2519   :  { %v3176_v19 = vsub.f32 %v3114_v62, %v3172_v17 }
0x251a   :  { %v3175_v20 = vpop.xlane.xlu1 %3174 }
0x251b   :  { %v3178_v28 = vmul.f32 1.442695, %v3176_v19  ;;  %v3177_v18 = vsub.f32 %v3164_v5, %v3175_v20 }
0x251d   :  { %4706 = vpow2.f32 %v3178_v28  ;;  %v3180_v63 = vmul.f32 1.442695, %v3177_v18 }
0x251e   :  { %v3243_v3 = vpop.permute.xlu1 %3242 }
0x251f   :  { %4708 = vpow2.f32 %v3180_v63  ;;  %v3248_v4 = vsel %vm294_vm3, %v3243_v3, 0 }
0x2520   :  { %4458 = vmatpush3.bf16.msra.mxu0 %v3248_v4 }
0x2521   :  { %4469 = vmatprep.subr.bf16.mxu0 %v4811_v8 }
0x2522   :  { %v3293_v25 = vpop.permute.xlu1 %3292 }
0x2526   :  { %v3343_v40 = vpop.permute.xlu1 %3342 }
0x2527   :  { %v4707_v22 = vpop.eup %4706  ;;  %v3348_v42 = vsel %vm169_vm2, %v3343_v40, 0 }
0x2528   :  { %v3182_v24 = vsel %vm169_vm2, %v4707_v22, 0.0 }
0x2529   :  { %v4709_v26 = vpop.eup %4708  ;;  %3183 = vadd.xlane.f32.xlu0 %v3182_v24 }
0x252a   :  { %v3185_v48 = vsel %vm169_vm2, %v4709_v26, 0.0  ;;  %v3341_v47 = vpop.permute.xlu1 %3340 }
0x252d   :  { %3186 = vadd.xlane.f32.xlu0 %v3185_v48  ;;  %v4601_v48 = vld [vmem:[#allocation4 + $0xa0] sm:$0xff]  }
0x2543   :  { %3194 = vrot.lane.b32.xlu0 %v5300_v6, %s4819_s29 }
0x2547   :  { %3290 = vrot.lane.b32.xlu0 %v5312_v23, %s4821_s4  ;;  %v3298_v23 = vsel %vm169_vm2, %v3293_v25, 0 }
0x25b6   :  { %v3184_v46 = vpop.xlane.xlu0 %3183 }
0x25b7   :  { %4710 = vrcp.f32 %v3184_v46 }
0x25ba   :  { %v3187_v27 = vpop.xlane.xlu0 %3186 }
0x25bb   :  { %4712 = vrcp.f32 %v3187_v27 }
0x25be   :  { %v3195_v29 = vpop.permute.xlu0 %3194 }
0x25bf   :  { %v3200_v30 = vsel %vm294_vm3, %v3195_v29, 0 }
0x25c0   :  { %4452 = vmatpush3.bf16.msra.mxu1 %v3200_v30 }
0x25c1   :  { %v4711_v32 = vpop.eup %4710  ;;  %4463 = vmatprep.subr.bf16.mxu1 %v4811_v8 }
0x25c2   :  { %v3190_v34 = vmul.f32 %v4711_v32, %v4707_v22  ;;  %v3291_v43 = vpop.permute.xlu0 %3290 }
0x25c4   :  { %v3192_v37 = vpack.c.bf16 %v3190_v34, %v3190_v34 }
0x25c5   :  { %v4713_v38 = vpop.eup %4712 }
0x25c6   :  { %v3191_v39 = vmul.f32 %v4713_v38, %v4709_v26  ;;  %4454 = vmatmul.mubr.msk.bf16.vlgmr.msra.gmra.mrb[96].mxu1 %vm169_vm2, %v3192_v37  ;;  %v4600_v26 = vld [vmem:[#allocation4 + $0x98] sm:$0xff]  }
0x25c7   :  { %4465 = vmatprep.mubr.msk.bf16.mxu1 %vm4812_vm1, %v4811_v8 }
0x25c8   :  { %v3193_v41 = vpack.c.bf16 %v3191_v39, %v3191_v39 }
0x25c9   :  { %4464 = vmatpush3.bf16.xpose.msra.mxu1 %v3298_v23 }
0x25ca   :  { %4460 = vmatmul.mubr.msk.bf16.vlgmr.msra.gmra.mrb[104].mxu0 %vm169_vm2, %v3193_v41  ;;  %4475 = vmatprep.subr.bf16.mxu1 %v4811_v8 }
0x25cb   :  { %4470 = vmatpush3.bf16.xpose.msra.mxu0 %v3348_v42  ;;  %4471 = vmatprep.mubr.msk.bf16.mxu0 %vm4812_vm1, %v4811_v8 }
0x25cc   :  { %4481 = vmatprep.subr.bf16.mxu0 %v4811_v8 }
0x25d0   :  { %4466 = vmatmul.mubr.msk.bf16.vlgmr.msra.gmra.mrb[100].mxu1 %vm169_vm2, %v3291_v43 }
0x25d1   :  { %4477 = vmatprep.mubr.msk.bf16.mxu1 %vm4812_vm1, %v4811_v8 }
0x25d2   :  { %4472 = vmatmul.mubr.msk.bf16.vlgmr.msra.gmra.mrb[108].mxu0 %vm169_vm2, %v3341_v47 }
0x25d3   :  { %4483 = vmatprep.mubr.msk.bf16.mxu0 %vm4812_vm1, %v4811_v8 }
0x2699   :  { %v3236_v33 = vpop.f32.mrb[96].mxu1 }
0x269a   :  { %v4455_v49 = vpop.f32.mrb[97].mxu1 }
0x269b   :  { %v3239_v44 = vpop.f32.mrb[98].mxu1 }
0x269c   :  { %v4456_v50 = vpop.f32.mrb[99].mxu1 }
0x269d   :  { %v3284_v45 = vpop.f32.mrb[104].mxu0 }
0x269e   :  { %v4571_v56 = vpack.i.bf16 %v3284_v45, %v3236_v33  ;;  %v4461_v51 = vpop.f32.mrb[105].mxu0 }
0x269f   :  { %v3287_v31 = vpop.f32.mrb[106].mxu0 }
0x26a0   :  { %v4462_v35 = vpop.f32.mrb[107].mxu0 }
0x26a3   :  { %v3334_v36 = vpop.f32.mrb[100].mxu1 }
0x26a4   :  { %v4467_v53 = vpop.f32.mrb[101].mxu1  ;;  %v3390_v54 = vsel %vm169_vm2, %v3334_v36, -inf }
0x26a5   :  { %3391 = vmax.xlane.f32.xlu0 %v3390_v54  ;;  %v3337_v57 = vpop.f32.mrb[102].mxu1  ;;  %v3384_v60 = vpop.f32.mrb[108].mxu0 }
0x26a6   :  { %v4468_v61 = vpop.f32.mrb[103].mxu1  ;;  %v4473_v55 = vpop.f32.mrb[109].mxu0  ;;  %v3393_v62 = vsel %vm169_vm2, %v3384_v60, -inf }
0x26a7   :  { %3394 = vmax.xlane.f32.xlu1 %v3393_v62  ;;  %v3387_v16 = vpop.f32.mrb[110].mxu0 }
0x26a8   :  { %v4474_v1 = vpop.f32.mrb[111].mxu0 }
0x26b8   :  { %3462 = vrot.lane.b32.xlu1 %v5302_v21, %s4822_s5 }
0x26bc   :  { %4567 = vrot.lane.b32.xlu1 %v4566_v59, %s4809_s9 }
0x26c0   :  { %4572 = vrot.lane.b32.xlu1 %v4571_v56, %s4823_s6 }
0x2732   :  { %v3392_v2 = vpop.xlane.xlu0 %3391 }
0x2733   :  { %v3396_v5 = vsub.f32 %v3334_v36, %v3392_v2 }
0x2734   :  { %v3395_v10 = vpop.xlane.xlu1 %3394 }
0x2735   :  { %v3398_v11 = vmul.f32 1.442695, %v3396_v5  ;;  %v3397_v13 = vsub.f32 %v3384_v60, %v3395_v10 }
0x2737   :  { %4714 = vpow2.f32 %v3398_v11  ;;  %v3400_v14 = vmul.f32 1.442695, %v3397_v13 }
0x2738   :  { %v3463_v15 = vpop.permute.xlu1 %3462 }
0x2739   :  { %4716 = vpow2.f32 %v3400_v14  ;;  %v3468_v17 = vsel %vm294_vm3, %v3463_v15, 0 }
0x273a   :  { %4482 = vmatpush3.bf16.msra.mxu0 %v3468_v17 }
0x273b   :  { %4495 = vmatprep.subr.bf16.mxu0 %v4811_v8 }
0x273c   :  { %v4568_v39 = vpop.permute.xlu1 %4567 }
0x273d   :  { %v4570_v23 = vunpack.i.h.bf16 %v4568_v39  ;;  %v4569_v41 = vunpack.i.l.bf16 %v4568_v39 }
0x273f   :  { %v3535_v33 = vsel %vm169_vm2, %v5362_v12, %v4570_v23  ;;  %v3534_v49 = vsel %vm169_vm2, %v5360_v0, %v4569_v41  ;;  %v3966_v12 = vld [vmem:[#allocation6 + $0x88] ss:$0 sm:$0xff] }
0x2740   :  { %v4573_v40 = vpop.permute.xlu1 %4572 }
0x2741   :  { %v4715_v21 = vpop.eup %4714  ;;  %v4575_v42 = vunpack.i.h.bf16 %v4573_v40  ;;  %v4574_v43 = vunpack.i.l.bf16 %v4573_v40 }
0x2742   :  { %v3402_v52 = vsel %vm169_vm2, %v4715_v21, 0.0 }
0x2743   :  { %v4717_v58 = vpop.eup %4716  ;;  %3403 = vadd.xlane.f32.xlu0 %v3402_v52  ;;  %v3536_v45 = vsel %vm1072_vm4, %v3534_v49, %v4574_v43  ;;  %v3537_v56 = vsel %vm1072_vm4, %v3535_v33, %v4575_v42 }
0x2744   :  { %v3405_v59 = vsel %vm169_vm2, %v4717_v58, 0.0 }
0x2747   :  { %3406 = vadd.xlane.f32.xlu0 %v3405_v59 }
0x275d   :  { %3414 = vrot.lane.b32.xlu0 %v5300_v6, %s4822_s5 }
0x27d0   :  { %v3404_v19 = vpop.xlane.xlu0 %3403 }
0x27d1   :  { %4718 = vrcp.f32 %v3404_v19 }
0x27d4   :  { %v3407_v20 = vpop.xlane.xlu0 %3406 }
0x27d5   :  { %4720 = vrcp.f32 %v3407_v20 }
0x27d8   :  { %v3415_v28 = vpop.permute.xlu0 %3414 }
0x27d9   :  { %v3420_v18 = vsel %vm294_vm3, %v3415_v28, 0 }
0x27da   :  { %4476 = vmatpush3.bf16.msra.mxu1 %v3420_v18 }
0x27db   :  { %v4719_v63 = vpop.eup %4718  ;;  %4487 = vmatprep.subr.bf16.mxu1 %v4811_v8 }
0x27dc   :  { %v3410_v3 = vmul.f32 %v4719_v63, %v4715_v21  ;;  %v4603_v21 = vld [vmem:[#allocation4 + $0xb0] sm:$0xff]  }
0x27de   :  { %v3412_v4 = vpack.c.bf16 %v3410_v3, %v3410_v3  ;;  %v3970_v3 = vld [vmem:[#allocation6 + $0x90] ss:$0 sm:$0xff] }
0x27df   :  { %v4721_v22 = vpop.eup %4720 }
0x27e0   :  { %v3411_v24 = vmul.f32 %v4721_v22, %v4717_v58  ;;  %4478 = vmatmul.mubr.msk.bf16.vlgmr.msra.gmra.mrb[104].mxu1 %vm169_vm2, %v3412_v4 }
0x27e1   :  { %4491 = vmatprep.mubr.msk.bf16.mxu1 %vm4812_vm1, %v4811_v8  ;;  %4488 = vmatpush3.bf16.msra.mxu1 %v4600_v26 }
0x27e2   :  { %v3413_v6 = vpack.c.bf16 %v3411_v24, %v3411_v24  ;;  %4489 = vmatprep.subr.bf16.mxu1 %v4811_v8 }
0x27e4   :  { %4484 = vmatmul.mubr.msk.bf16.vlgmr.msra.gmra.mrb[112].mxu0 %vm169_vm2, %v3413_v6  ;;  %v3971_v6 = vld [vmem:[#allocation6 + $0x98] ss:$0 sm:$0xff] }
0x27e5   :  { %4499 = vmatprep.mubr.msk.bf16.mxu0 %vm4812_vm1, %v4811_v8  ;;  %4490 = vmatpush3.bf16.msra.mxu1 %v4601_v48 }
0x27e6   :  { %4503 = vmatprep.subr.bf16.mxu1 %v4811_v8 }
0x28b3   :  { %v3456_v46 = vpop.f32.mrb[104].mxu1 }
0x28b4   :  { %v4479_v27 = vpop.f32.mrb[105].mxu1 }
0x28b5   :  { %v3459_v29 = vpop.f32.mrb[106].mxu1 }
0x28b6   :  { %v4480_v30 = vpop.f32.mrb[107].mxu1  ;;  %v4604_v29 = vld [vmem:[#allocation4 + $0xb8] sm:$0xff]  }
0x28b7   :  { %v3504_v32 = vpop.f32.mrb[112].mxu0  ;;  %v4605_v30 = vld [vmem:[#allocation4 + $0xc0] sm:$0xff]  }
0x28b8   :  { %v4576_v25 = vpack.i.bf16 %v3504_v32, %v3456_v46  ;;  %v4485_v34 = vpop.f32.mrb[113].mxu0  ;;  %v4606_v32 = vld [vmem:[#allocation4 + $0xc8] sm:$0xff]  }
0x28b9   :  { %v3507_v37 = vpop.f32.mrb[114].mxu0  ;;  %v3972_v34 = vld [vmem:[#allocation6 + $0xa0] ss:$0 sm:$0xff] }
0x28ba   :  { %4577 = vrot.lane.b32.xlu0 %v4576_v25, %s4824_s7  ;;  %v4486_v38 = vpop.f32.mrb[115].mxu0  ;;  %v4607_v25 = vld [vmem:[#allocation4 + $0xd0] sm:$0xff]  }
0x292c   :  { %v4578_v47 = vpop.permute.xlu0 %4577 }
0x292d   :  { %v4580_v44 = vunpack.i.h.bf16 %v4578_v47  ;;  %v4579_v50 = vunpack.i.l.bf16 %v4578_v47 }
0x292f   :  { %v3539_v51 = vsel %vm1075_vm5, %v3537_v56, %v4580_v44  ;;  %v3538_v31 = vsel %vm1075_vm5, %v3536_v45, %v4579_v50 }
0x2930   :  { %v3540_v35 = vpack.c.bf16 %v3539_v51, %v3538_v31 }
0x2932   :  { %4492 = vmatmul.mubr.msk.bf16.vlgmr.msra.gmra.mrb[108].mxu1 %vm61_vm0, %v3540_v35 }
0x2933   :  { %4511 = vmatprep.mubr.msk.bf16.mxu1 %vm4812_vm1, %v4811_v8  ;;  %4504 = vmatpush3.bf16.msra.mxu1 %v4604_v29 }
0x2934   :  { %4505 = vmatprep.subr.bf16.mxu1 %v4811_v8 }
0x2937   :  { %4506 = vmatpush3.bf16.msra.mxu1 %v4605_v30 }
0x2938   :  { %4507 = vmatprep.subr.bf16.mxu1 %v4811_v8 }
0x293b   :  { %4508 = vmatpush3.bf16.msra.mxu1 %v4606_v32 }
0x293c   :  { %4509 = vmatprep.subr.bf16.mxu1 %v4811_v8 }
0x293f   :  { %4510 = vmatpush3.bf16.msra.mxu1 %v4607_v25 }
0x2a05   :  { %v3599_v36 = vpop.f32.mrb[108].mxu1 }
0x2a06   :  { %v3600_v53 = vadd.f32 %v3966_v12, %v3599_v36  ;;  %v4493_v0 = vpop.f32.mrb[109].mxu1 }
0x2a07   :  { %v3602_v54 = vpop.f32.mrb[110].mxu1 }
0x2a08   :  { %v3606_v57 = vadd.f32 %v3600_v53, %v5291_v7  ;;  %v3603_v60 = vadd.f32 %v3966_v12, %v3602_v54  ;;  %v4494_v61 = vpop.f32.mrb[111].mxu1 }
0x2a0a   :  { %v3607_v55 = vadd.f32 %v3603_v60, %v5293_v9  ;;  %v3608_v62 = vsel %vm61_vm0, %v3606_v57, 0.0  ;;  %v4602_v9 = vld [vmem:[#allocation4 + $0xa8] sm:$0xff]   ;;  %v3976_v60 = vld [vmem:[#allocation6 + $0xa8] ss:$0 sm:$0xff] }
0x2a0b   :  { %3609 = vadd.xlane.f32.xlu1 %v3608_v62  ;;  %4496 = vmatpush3.bf16.msra.mxu0 %v4602_v9 }
0x2a0c   :  { %v3611_v16 = vsel %vm61_vm0, %v3607_v55, 0.0  ;;  %4497 = vmatprep.subr.bf16.mxu0 %v4811_v8 }
0x2a0d   :  { %3612 = vadd.xlane.f32.xlu0 %v3611_v16 }
0x2a0f   :  { %4498 = vmatpush3.bf16.msra.mxu0 %v4603_v21 }
0x2a98   :  { %v3610_v1 = vpop.xlane.xlu1 %3609 }
0x2a99   :  { %v3614_v2 = vmul.f32 0.03125, %v3610_v1 }
0x2a9a   :  { %v3613_v5 = vpop.xlane.xlu0 %3612 }
0x2a9b   :  { %v3616_v10 = vsub.f32 %v3606_v57, %v3614_v2  ;;  %v3615_v11 = vmul.f32 0.03125, %v3613_v5 }
0x2a9d   :  { %v3617_v13 = vsub.f32 %v3607_v55, %v3615_v11  ;;  %v3618_v14 = vmul.f32 %v3616_v10, %v3616_v10 }
0x2a9f   :  { %v3620_v15 = vsel %vm61_vm0, %v3618_v14, 0.0  ;;  %v3619_v7 = vmul.f32 %v3617_v13, %v3617_v13 }
0x2aa0   :  { %3621 = vadd.xlane.f32.xlu0 %v3620_v15 }
0x2aa1   :  { %v3623_v17 = vsel %vm61_vm0, %v3619_v7, 0.0 }
0x2aa4   :  { %3624 = vadd.xlane.f32.xlu0 %v3623_v17 }
0x2b2d   :  { %v3622_v52 = vpop.xlane.xlu0 %3621 }
0x2b2e   :  { %v3626_v58 = vmul.f32 0.03125, %v3622_v52 }
0x2b30   :  { %v3628_v59 = vadd.f32 1e-12, %v3626_v58 }
0x2b31   :  { %v3625_v19 = vpop.xlane.xlu0 %3624 }
0x2b32   :  { %4722 = vrsqrt.f32 %v3628_v59  ;;  %v3627_v20 = vmul.f32 0.03125, %v3625_v19 }
0x2b34   :  { %v3629_v28 = vadd.f32 1e-12, %v3627_v20 }
0x2b36   :  { %4724 = vrsqrt.f32 %v3629_v28 }
0x2b3c   :  { %v4723_v18 = vpop.eup %4722 }
0x2b3d   :  { %v3632_v63 = vmul.f32 %v4723_v18, %v3616_v10 }
0x2b3f   :  { %v3639_v22 = vmul.f32 %v3970_v3, %v3632_v63 }
0x2b40   :  { %v4725_v4 = vpop.eup %4724 }
0x2b41   :  { %v3633_v24 = vmul.f32 %v4725_v4, %v3617_v13  ;;  %v3646_v48 = vadd.f32 %v3971_v6, %v3639_v22 }
0x2b43   :  { %v3640_v26 = vmul.f32 %v3970_v3, %v3633_v24  ;;  %v3982_v24 = vld [vmem:[#allocation6 + $0xb0] ss:$0 sm:$0xff] }
0x2b45   :  { %v3647_v46 = vadd.f32 %v3971_v6, %v3640_v26 }
0x2b47   :  { %v3648_v27 = vpack.c.bf16 %v3647_v46, %v3646_v48 }
0x2b49   :  { %4500 = vmatmul.mubr.msk.bf16.vlgmr.msra.gmra.mrb[116].mxu0 %vm61_vm0, %v3648_v27 }
0x2c1c   :  { %v3707_v37 = vpop.f32.mrb[116].mxu0 }
0x2c1d   :  { %v3708_v38 = vadd.f32 %v3972_v34, %v3707_v37  ;;  %v4501_v39 = vpop.f32.mrb[117].mxu0 }
0x2c1e   :  { %v3710_v40 = vpop.f32.mrb[118].mxu0 }
0x2c1f   :  { %v3716_v23 = vmul.f32 0.044715, %v3708_v38  ;;  %v3711_v41 = vadd.f32 %v3972_v34, %v3710_v40  ;;  %v4502_v42 = vpop.f32.mrb[119].mxu0  ;;  %v3714_v12 = vmul.f32 0.5, %v3708_v38 }
0x2c21   :  { %v3718_v43 = vmul.f32 %v3716_v23, %v3708_v38  ;;  %v3717_v47 = vmul.f32 0.044715, %v3711_v41  ;;  %v3715_v36 = vmul.f32 0.5, %v3711_v41 }
0x2c23   :  { %v3720_v33 = vmul.f32 %v3718_v43, %v3708_v38  ;;  %v3719_v49 = vmul.f32 %v3717_v47, %v3711_v41 }
0x2c25   :  { %v3722_v44 = vadd.f32 %v3720_v33, %v3708_v38  ;;  %v3721_v50 = vmul.f32 %v3719_v49, %v3711_v41 }
0x2c27   :  { %v3724_v45 = vmul.f32 0.7978846, %v3722_v44  ;;  %v3723_v56 = vadd.f32 %v3721_v50, %v3711_v41 }
0x2c29   :  { %4726 = vtanh.f32 %v3724_v45  ;;  %v3725_v51 = vmul.f32 0.7978846, %v3723_v56 }
0x2c2b   :  { %4728 = vtanh.f32 %v3725_v51 }
0x2c33   :  { %v4727_v8 = vpop.eup %4726 }
0x2c34   :  { %v3728_v31 = vadd.f32 1.0, %v4727_v8 }
0x2c35   :  { %v4729_v35 = vpop.eup %4728 }
0x2c36   :  { %v3729_v53 = vadd.f32 1.0, %v4729_v35  ;;  %v3730_v0 = vmul.f32 %v3728_v31, %v3714_v12 }
0x2c38   :  { %v3731_v54 = vmul.f32 %v3729_v53, %v3715_v36 }
0x2c3a   :  { %v3732_v57 = vpack.c.bf16 %v3731_v54, %v3730_v0 }
0x2c3c   :  { %4512 = vmatmul.mubr.msk.bf16.vlgmr.msra.gmra.mrb[112].mxu1 %vm2467_vm7, %v3732_v57 }
0x2d0f   :  { %v3807_v61 = vpop.f32.mrb[112].mxu1 }
0x2d10   :  { %v3808_v55 = vadd.f32 %v3976_v60, %v3807_v61  ;;  %v4513_v62 = vpop.f32.mrb[113].mxu1 }
0x2d11   :  { %v3810_v16 = vpop.f32.mrb[114].mxu1 }
0x2d12   :  { %v3814_v1 = vadd.f32 %v3808_v55, %v3646_v48  ;;  %v3811_v2 = vadd.f32 %v3976_v60, %v3810_v16  ;;  %v4514_v5 = vpop.f32.mrb[115].mxu1  ;;  %v3983_v48 = vld [vmem:[#allocation6 + $0xb8] ss:$0 sm:$0xff] }
0x2d14   :  { %v3815_v10 = vadd.f32 %v3811_v2, %v3647_v46  ;;  %v3816_v11 = vsel %vm61_vm0, %v3814_v1, 0.0 }
0x2d15   :  { %3817 = vadd.xlane.f32.xlu1 %v3816_v11 }
0x2d16   :  { %v3819_v13 = vsel %vm61_vm0, %v3815_v10, 0.0 }
0x2d17   :  { %3820 = vadd.xlane.f32.xlu0 %v3819_v13 }
0x2da2   :  { %v3818_v14 = vpop.xlane.xlu1 %3817 }
0x2da3   :  { %v3822_v15 = vmul.f32 0.03125, %v3818_v14 }
0x2da4   :  { %v3821_v7 = vpop.xlane.xlu0 %3820 }
0x2da5   :  { %v3824_v17 = vsub.f32 %v3814_v1, %v3822_v15  ;;  %v3823_v9 = vmul.f32 0.03125, %v3821_v7 }
0x2da7   :  { %v3825_v21 = vsub.f32 %v3815_v10, %v3823_v9  ;;  %v3826_v52 = vmul.f32 %v3824_v17, %v3824_v17 }
0x2da9   :  { %v3828_v58 = vsel %vm61_vm0, %v3826_v52, 0.0  ;;  %v3827_v59 = vmul.f32 %v3825_v21, %v3825_v21 }
0x2daa   :  { %3829 = vadd.xlane.f32.xlu1 %v3828_v58 }
0x2dab   :  { %v3831_v19 = vsel %vm61_vm0, %v3827_v59, 0.0 }
0x2dac   :  { %3832 = vadd.xlane.f32.xlu0 %v3831_v19 }
0x2e37   :  { %v3830_v20 = vpop.xlane.xlu1 %3829 }
0x2e38   :  { %v3834_v28 = vmul.f32 0.03125, %v3830_v20 }
0x2e39   :  { %v3833_v18 = vpop.xlane.xlu0 %3832 }
0x2e3a   :  { %v3836_v63 = vadd.f32 1e-12, %v3834_v28  ;;  %v3835_v3 = vmul.f32 0.03125, %v3833_v18 }
0x2e3c   :  { %4730 = vrsqrt.f32 %v3836_v63  ;;  %v3837_v4 = vadd.f32 1e-12, %v3835_v3 }
0x2e3e   :  { %4732 = vrsqrt.f32 %v3837_v4 }
0x2e46   :  { %v4731_v22 = vpop.eup %4730 }
0x2e47   :  { %v3840_v6 = vmul.f32 %v4731_v22, %v3824_v17 }
0x2e48   :  { %v4733_v26 = vpop.eup %4732 }
0x2e49   :  { %v3847_v46 = vmul.f32 %v3982_v24, %v3840_v6  ;;  %v3841_v27 = vmul.f32 %v4733_v26, %v3825_v21 }
0x2e4b   :  { %v3854_v29 = vadd.f32 %v3983_v48, %v3847_v46  ;;  %v3848_v30 = vmul.f32 %v3982_v24, %v3841_v27 }
0x2e4d   :  { %3856 = vst.msk [vmem:[%s5506_s3] sm:$0xff] %vm61_vm0, %v3854_v29  ;;  %v3855_v32 = vadd.f32 %v3983_v48, %v3848_v30 }
0x2e4f   :  { %3857 = vst.msk [vmem:[%s5506_s3 + $0x8] sm:$0xff] %vm61_vm0, %v3855_v32 }
0x2e50   :  { %3862 = vsyncpa [#allocation3], 1 }
0x2e51   :  { %3863 = vsyncpa [#allocation5], 1 }

</bundles_post_ra>
